<compile_context>
chip_gen: v7x
topology: tpu7x:2x2x1
jax: 0.10.0
libtpu: 0.0.40
codegen_flags: <defaults>
</compile_context>

<pallas_src>
import math

import jax
import jax.numpy as jnp
from jax import lax
from jax.experimental import pallas as pl
from jax.experimental.pallas import tpu as pltpu


def _round_up(x, m):
    return (x + m - 1) // m * m


def lstm_stack_kernel(pre0_ref, wih_ref, whh_ref, b_ref,
                      out_ref, hn_ref, cn_ref, seq_scr):
    """All LSTM layers over the whole sequence in a single invocation.

    pre0_ref: (T, Bp, 4*Hp) f32  layer-0 pre-gates (x @ W_ih^T + b), 128-wide slabs
    wih_ref : (L-1, Hp, 4*Hp) bf16 input->gate weights for layers >= 1
    whh_ref : (L, Hp, 4*Hp) bf16 hidden->gate weights (rows >= H zero-padded)
    b_ref   : (L-1, 1, 4*Hp) f32  fused b_ih+b_hh for layers >= 1
    out_ref : (T, Bp, Hp) f32  last-layer hidden sequence (time-major)
    hn_ref  : (L, Bp, Hp) f32  final hidden state per layer
    cn_ref  : (L, Bp, Hp) f32  final cell state per layer
    seq_scr : (T, Bp, 4*Hp) f32 pre-gates of the current layer for layers >= 1
    """
    T, Bp, _ = pre0_ref.shape
    L, Hp, _ = whh_ref.shape
    mm_dtype = whh_ref.dtype

    for l in range(L):                               # static unroll over layers
        pre = pre0_ref if l == 0 else seq_scr        # static choice

        # ---- t = 0 peeled: h = c = 0 -> no recurrent matmul, no f*c term ----
        g0 = pre[0]                                  # (Bp, 4Hp)
        i0 = jax.nn.sigmoid(g0[:, 0 * Hp:1 * Hp])
        gg0 = jnp.tanh(g0[:, 2 * Hp:3 * Hp])
        o0 = jax.nn.sigmoid(g0[:, 3 * Hp:4 * Hp])
        c = i0 * gg0
        h = o0 * jnp.tanh(c)
        out_ref[0] = h

        # ---- t = 1 .. T-1: h/c live in vregs (fori_loop carry) --------------
        def step(t, carry):
            h, c = carry
            # Only the recurrent matmul is on the serial path; RHS is loaded
            # from VMEM inside the loop (not held live across the unroll).
            gates = pre[t] + jnp.dot(h.astype(mm_dtype), whh_ref[l],
                                     preferred_element_type=jnp.float32)
            # 128-aligned gate slabs -> these slices are lane-dense (free).
            i = jax.nn.sigmoid(gates[:, 0 * Hp:1 * Hp])
            f = jax.nn.sigmoid(gates[:, 1 * Hp:2 * Hp])
            g = jnp.tanh(gates[:, 2 * Hp:3 * Hp])
            o = jax.nn.sigmoid(gates[:, 3 * Hp:4 * Hp])
            c_new = f * c + i * g
            h_new = o * jnp.tanh(c_new)
            out_ref[t] = h_new                       # (Bp, Hp) = full (8,128) tile
            return (h_new, c_new)

        h, c = lax.fori_loop(1, T, step, (h, c), unroll=True)
        hn_ref[l] = h                                # written once per layer
        cn_ref[l] = c

        if l + 1 < L:
            # Next layer's (hoisted) input projection: ONE big MXU matmul over
            # all time steps instead of T tiny ones inside the recurrence.
            outs = out_ref[...].reshape(T * Bp, Hp).astype(mm_dtype)
            pre_next = (jnp.dot(outs, wih_ref[l],     # layer l+1 weights live at slot l
                                preferred_element_type=jnp.float32)
                        + b_ref[l])
            seq_scr[...] = pre_next.reshape(T, Bp, 4 * Hp)


def init_lstm_params(key, input_size, hidden_size, num_layers):
    """PyTorch nn.LSTM default init: U(-1/sqrt(H), 1/sqrt(H)); gate order i,f,g,o."""
    k = 1.0 / math.sqrt(hidden_size)
    params = []
    for layer in range(num_layers):
        d_in = input_size if layer == 0 else hidden_size
        key, k1, k2, k3, k4 = jax.random.split(key, 5)
        w_ih = jax.random.uniform(k1, (4 * hidden_size, d_in), jnp.float32, -k, k)
        w_hh = jax.random.uniform(k2, (4 * hidden_size, hidden_size), jnp.float32, -k, k)
        b_ih = jax.random.uniform(k3, (4 * hidden_size,), jnp.float32, -k, k)
        b_hh = jax.random.uniform(k4, (4 * hidden_size,), jnp.float32, -k, k)
        params.append((w_ih, w_hh, b_ih, b_hh))
    return params


def _pad_gate_cols(w_t, H, Hp):
    """(rows, 4H) fused i|f|g|o -> (rows, 4Hp): each gate in its own 128-wide slab."""
    rows = w_t.shape[0]
    out = jnp.zeros((rows, 4 * Hp), w_t.dtype)
    for g in range(4):
        out = out.at[:, g * Hp:g * Hp + H].set(w_t[:, g * H:(g + 1) * H])
    return out


def pack_params(params, hidden_size, Hp, matmul_dtype):
    """Pad / fuse raw nn.LSTM weights into the kernel's lane-dense layout."""
    H = hidden_size
    L = len(params)
    Lm1 = max(L - 1, 1)

    w_ih0, _, b_ih0, b_hh0 = params[0]
    wih0_pad = _pad_gate_cols(w_ih0.T, H, Hp)                     # (D, 4Hp) f32
    b0_pad = _pad_gate_cols((b_ih0 + b_hh0)[None, :], H, Hp)      # (1, 4Hp) f32

    whh_all = jnp.zeros((L, Hp, 4 * Hp), matmul_dtype)
    wih_rest = jnp.zeros((Lm1, Hp, 4 * Hp), matmul_dtype)         # no zero layer-0 slot
    b_rest = jnp.zeros((Lm1, 1, 4 * Hp), jnp.float32)
    for l, (w_ih, w_hh, b_ih, b_hh) in enumerate(params):
        whh_pad = jnp.zeros((Hp, 4 * Hp), jnp.float32)
        whh_pad = whh_pad.at[:H].set(_pad_gate_cols(w_hh.T, H, Hp))
        whh_all = whh_all.at[l].set(whh_pad.astype(matmul_dtype))
        if l > 0:
            wih_pad = jnp.zeros((Hp, 4 * Hp), jnp.float32)
            wih_pad = wih_pad.at[:H].set(_pad_gate_cols(w_ih.T, H, Hp))
            wih_rest = wih_rest.at[l - 1].set(wih_pad.astype(matmul_dtype))
            b_rest = b_rest.at[l - 1].set(
                _pad_gate_cols((b_ih + b_hh)[None, :], H, Hp))
    return wih0_pad, b0_pad, wih_rest, whh_all, b_rest


def temporal_model_forward(x, params, hidden_size, matmul_dtype=jnp.bfloat16):
    """x: (B, T, input_size), batch_first=True. Returns (output, (hn, cn)).

    matmul_dtype: dtype fed to the MXU for W_hh / W_ih (>=1) / h.  bf16 is ~3x
    cheaper per recurrent matmul; pass jnp.float32 for exact nn.LSTM numerics.
    """
    B, T, _ = x.shape
    H = hidden_size
    L = len(params)
    Bp = _round_up(max(B, 8), 8)        # sublane-dense batch
    Hp = _round_up(max(H, 128), 128)    # lane-dense hidden / gate slabs
    Lm1 = max(L - 1, 1)

    wih0_pad, b0_pad, wih_rest, whh_all, b_rest = pack_params(
        params, H, Hp, matmul_dtype)

    # Hoisted layer-0 input projection: one (T*B, D) x (D, 4Hp) f32 matmul for
    # all time steps, laid out time-major so each per-step read is a dense tile.
    pre0 = jnp.einsum('btd,dg->tbg', x, wih0_pad,
                      preferred_element_type=jnp.float32) + b0_pad[None]
    pre0 = jnp.pad(pre0, ((0, 0), (0, Bp - B), (0, 0)))            # (T, Bp, 4Hp)

    # TODO(synk): for large Hp / many layers (v7x 64 MiB VMEM) switch to
    # grid=(L,) with per-layer weight BlockSpecs so only ~2 layers are
    # resident; at this toy size a single resident block is optimal.
    out_pad, hn_pad, cn_pad = pl.pallas_call(
        lstm_stack_kernel,
        out_shape=(
            jax.ShapeDtypeStruct((T, Bp, Hp), jnp.float32),
            jax.ShapeDtypeStruct((L, Bp, Hp), jnp.float32),
            jax.ShapeDtypeStruct((L, Bp, Hp), jnp.float32),
        ),
        grid_spec=pltpu.PrefetchScalarGridSpec(
            num_scalar_prefetch=0,
            grid=(1,),  # whole problem resident in VMEM; no per-step grid overhead
            in_specs=[
                pl.BlockSpec((T, Bp, 4 * Hp), lambda i: (0, 0, 0)),   # pre-gates L0
                pl.BlockSpec((Lm1, Hp, 4 * Hp), lambda i: (0, 0, 0)), # W_ih (l>=1)
                pl.BlockSpec((L, Hp, 4 * Hp), lambda i: (0, 0, 0)),   # W_hh
                pl.BlockSpec((Lm1, 1, 4 * Hp), lambda i: (0, 0, 0)),  # bias (l>=1)
            ],
            out_specs=[
                pl.BlockSpec((T, Bp, Hp), lambda i: (0, 0, 0)),       # output seq
                pl.BlockSpec((L, Bp, Hp), lambda i: (0, 0, 0)),       # hn
                pl.BlockSpec((L, Bp, Hp), lambda i: (0, 0, 0)),       # cn
            ],
            scratch_shapes=[pltpu.VMEM((T, Bp, 4 * Hp), jnp.float32)],  # layer>=1 pre-gates
        ),
        compiler_params=pltpu.CompilerParams(
            dimension_semantics=("arbitrary",)),
    )(pre0, wih_rest, whh_all, b_rest)

    # Tiny (T,B,H) un-pad + transpose back to batch_first; negligible at these sizes.
    output = jnp.transpose(out_pad[:, :B, :H], (1, 0, 2))
    hn = hn_pad[:, :B, :H]
    cn = cn_pad[:, :B, :H]
    return output, (hn, cn)


def temporal_model_reference(x, params, matmul_dtype=None):
    """Pure-JAX reference (lax.scan) matching nn.LSTM semantics.

    If matmul_dtype is set, matmul operands are quantized the same way the
    kernel feeds the MXU (layer-0 input projection stays f32, recurrent and
    layer>=1 projections use matmul_dtype operands with f32 accumulation).
    """
    x_t = jnp.transpose(x, (1, 0, 2)).astype(jnp.float32)
    hns, cns = [], []
    layer_in = x_t
    for idx, (w_ih, w_hh, b_ih, b_hh) in enumerate(params):
        H = w_hh.shape[1]
        B = layer_in.shape[1]
        b = (b_ih + b_hh)[None, :]
        wih_t = w_ih.T
        whh_t = w_hh.T
        xin = layer_in
        if matmul_dtype is not None:
            whh_t = whh_t.astype(matmul_dtype)
            if idx > 0:
                wih_t = wih_t.astype(matmul_dtype)
                xin = xin.astype(matmul_dtype)
        pre = jnp.einsum('tbd,dg->tbg', xin, wih_t,
                         preferred_element_type=jnp.float32) + b

        def step(carry, pre_t):
            h, c = carry
            hq = h.astype(matmul_dtype) if matmul_dtype is not None else h
            gates = pre_t + jnp.dot(hq, whh_t, preferred_element_type=jnp.float32)
            i = jax.nn.sigmoid(gates[:, 0 * H:1 * H])
            f = jax.nn.sigmoid(gates[:, 1 * H:2 * H])
            g = jnp.tanh(gates[:, 2 * H:3 * H])
            o = jax.nn.sigmoid(gates[:, 3 * H:4 * H])
            c_new = f * c + i * g
            h_new = o * jnp.tanh(c_new)
            return (h_new, c_new), h_new

        init = (jnp.zeros((B, H), jnp.float32), jnp.zeros((B, H), jnp.float32))
        (hn, cn), out = lax.scan(step, init, pre)
        hns.append(hn)
        cns.append(cn)
        layer_in = out
    return (jnp.transpose(layer_in, (1, 0, 2)),
            (jnp.stack(hns, axis=0), jnp.stack(cns, axis=0)))


if __name__ == "__main__":
    B, T, INPUT_SIZE, HIDDEN_SIZE, NUM_LAYERS = 2, 8, 16, 32, 2

    key = jax.random.PRNGKey(0)
    key, xkey, pkey = jax.random.split(key, 3)
    x = jax.random.normal(xkey, (B, T, INPUT_SIZE), jnp.float32)
    params = init_lstm_params(pkey, INPUT_SIZE, HIDDEN_SIZE, NUM_LAYERS)

    output, (hn, cn) = temporal_model_forward(x, params, HIDDEN_SIZE)
    jax.block_until_ready((output, hn, cn))

    assert output.shape == (B, T, HIDDEN_SIZE)
    assert hn.shape == (NUM_LAYERS, B, HIDDEN_SIZE)
    assert cn.shape == (NUM_LAYERS, B, HIDDEN_SIZE)

    # Reference with the same bf16 MXU-operand quantization -> tight tolerance.
    ref_out_q, (ref_hn_q, ref_cn_q) = temporal_model_reference(
        x, params, matmul_dtype=jnp.bfloat16)
    assert jnp.allclose(output, ref_out_q, atol=2e-3, rtol=2e-3)
    assert jnp.allclose(hn, ref_hn_q, atol=2e-3, rtol=2e-3)
    assert jnp.allclose(cn, ref_cn_q, atol=2e-3, rtol=2e-3)

    # Exact f32 nn.LSTM reference -> loose tolerance (bf16 MXU operand drift).
    ref_out, (ref_hn, ref_cn) = temporal_model_reference(x, params)
    assert jnp.allclose(output, ref_out, atol=3e-2, rtol=3e-2)
    assert jnp.allclose(hn, ref_hn, atol=3e-2, rtol=3e-2)
    assert jnp.allclose(cn, ref_cn, atol=3e-2, rtol=3e-2)

    print("KERNEL_OK")
</pallas_src>

<mosaic_0001>
module attributes {stable_mosaic.version = 11 : i64} {
  func.func @lstm_stack_kernel(%arg0: i32, %arg1: memref<8x8x512xf32, #tpu.memory_space<vmem>>, %arg2: memref<1x128x512xbf16, #tpu.memory_space<vmem>>, %arg3: memref<2x128x512xbf16, #tpu.memory_space<vmem>>, %arg4: memref<1x1x512xf32, #tpu.memory_space<vmem>>, %arg5: memref<8x8x128xf32, #tpu.memory_space<vmem>>, %arg6: memref<2x8x128xf32, #tpu.memory_space<vmem>>, %arg7: memref<2x8x128xf32, #tpu.memory_space<vmem>>, %arg8: memref<8x8x512xf32, #tpu.memory_space<vmem>>) attributes {dimension_semantics = [#tpu.dimension_semantics<arbitrary>], iteration_bounds = array<i64: 1>, scalar_prefetch = 0 : i64, scratch_operands = 1 : i64, tpu.core_type = #tpu.core_type<tc>, window_params = [{pipeline_mode = #tpu.pipeline_mode<synchronous>, transform_indices = @transform_0, window_bounds = array<i64: 8, 8, 512>}, {pipeline_mode = #tpu.pipeline_mode<synchronous>, transform_indices = @transform_1, window_bounds = array<i64: 1, 128, 512>}, {pipeline_mode = #tpu.pipeline_mode<synchronous>, transform_indices = @transform_2, window_bounds = array<i64: 2, 128, 512>}, {pipeline_mode = #tpu.pipeline_mode<synchronous>, transform_indices = @transform_3, window_bounds = array<i64: 1, 1, 512>}, {pipeline_mode = #tpu.pipeline_mode<synchronous>, transform_indices = @transform_4, window_bounds = array<i64: 8, 8, 128>}, {pipeline_mode = #tpu.pipeline_mode<synchronous>, transform_indices = @transform_5, window_bounds = array<i64: 2, 8, 128>}, {pipeline_mode = #tpu.pipeline_mode<synchronous>, transform_indices = @transform_6, window_bounds = array<i64: 2, 8, 128>}]} {
    %c0 = arith.constant 0 : index
    %c0_0 = arith.constant 0 : index
    %c0_1 = arith.constant 0 : index
    %0 = vector.load %arg1[%c0, %c0_0, %c0_1] : memref<8x8x512xf32, #tpu.memory_space<vmem>>, vector<1x8x512xf32>
    %1 = vector.shape_cast %0 : vector<1x8x512xf32> to vector<8x512xf32>
    %2 = vector.extract_strided_slice %1 {offsets = [0, 0], sizes = [8, 128], strides = [1, 1]} : vector<8x512xf32> to vector<8x128xf32>
    %3 = arith.negf %2 : vector<8x128xf32>
    %4 = math.exp %3 : vector<8x128xf32>
    %cst = arith.constant 1.000000e+00 : f32
    %5 = vector.broadcast %cst : f32 to vector<8x128xf32>
    %6 = arith.addf %5, %4 : vector<8x128xf32>
    %7 = arith.divf %5, %6 : vector<8x128xf32>
    %8 = vector.extract_strided_slice %1 {offsets = [0, 256], sizes = [8, 128], strides = [1, 1]} : vector<8x512xf32> to vector<8x128xf32>
    %9 = math.tanh %8 : vector<8x128xf32>
    %10 = vector.extract_strided_slice %1 {offsets = [0, 384], sizes = [8, 128], strides = [1, 1]} : vector<8x512xf32> to vector<8x128xf32>
    %11 = arith.negf %10 : vector<8x128xf32>
    %12 = math.exp %11 : vector<8x128xf32>
    %cst_2 = arith.constant 1.000000e+00 : f32
    %13 = vector.broadcast %cst_2 : f32 to vector<8x128xf32>
    %14 = arith.addf %13, %12 : vector<8x128xf32>
    %15 = arith.divf %13, %14 : vector<8x128xf32>
    %16 = arith.mulf %7, %9 : vector<8x128xf32>
    %17 = math.tanh %16 : vector<8x128xf32>
    %18 = arith.mulf %15, %17 : vector<8x128xf32>
    %c0_3 = arith.constant 0 : index
    %c0_4 = arith.constant 0 : index
    %c0_5 = arith.constant 0 : index
    %19 = vector.load %arg5[%c0_3, %c0_4, %c0_5] : memref<8x8x128xf32, #tpu.memory_space<vmem>>, vector<1x8x128xf32>
    %20 = vector.shape_cast %19 : vector<1x8x128xf32> to vector<8x128xf32>
    %21 = vector.shape_cast %18 : vector<8x128xf32> to vector<1x8x128xf32>
    tpu.vector_store %arg5[%c0_3, %c0_4, %c0_5], %21 {strides = array<i32>} : memref<8x8x128xf32, #tpu.memory_space<vmem>>, vector<1x8x128xf32>,
    %c1_i32 = arith.constant 1 : i32
    %22 = arith.index_cast %c1_i32 : i32 to index
    %c0_6 = arith.constant 0 : index
    %c0_7 = arith.constant 0 : index
    %23 = vector.load %arg1[%22, %c0_6, %c0_7] : memref<8x8x512xf32, #tpu.memory_space<vmem>>, vector<1x8x512xf32>
    %24 = vector.shape_cast %23 : vector<1x8x512xf32> to vector<8x512xf32>
    %25 = arith.truncf %18 : vector<8x128xf32> to vector<8x128xbf16>
    %c0_8 = arith.constant 0 : index
    %c0_9 = arith.constant 0 : index
    %c0_10 = arith.constant 0 : index
    %26 = vector.load %arg3[%c0_8, %c0_9, %c0_10] : memref<2x128x512xbf16, #tpu.memory_space<vmem>>, vector<1x128x512xbf16>
    %27 = vector.shape_cast %26 : vector<1x128x512xbf16> to vector<128x512xbf16>
    %cst_11 = arith.constant dense<0.000000e+00> : vector<8x512xf32>
    %28 = tpu.matmul %25, %27, %cst_11 {dimension_numbers = #tpu.dot_dimension_numbers<[1], [0], [0], [1], [0, 0, 1, 1], [], []>} : vector<8x128xbf16>, vector<128x512xbf16>, vector<8x512xf32> -> vector<8x512xf32>
    %29 = arith.addf %24, %28 : vector<8x512xf32>
    %30 = vector.extract_strided_slice %29 {offsets = [0, 0], sizes = [8, 128], strides = [1, 1]} : vector<8x512xf32> to vector<8x128xf32>
    %31 = arith.negf %30 : vector<8x128xf32>
    %32 = math.exp %31 : vector<8x128xf32>
    %cst_12 = arith.constant 1.000000e+00 : f32
    %33 = vector.broadcast %cst_12 : f32 to vector<8x128xf32>
    %34 = arith.addf %33, %32 : vector<8x128xf32>
    %35 = arith.divf %33, %34 : vector<8x128xf32>
    %36 = vector.extract_strided_slice %29 {offsets = [0, 128], sizes = [8, 128], strides = [1, 1]} : vector<8x512xf32> to vector<8x128xf32>
    %37 = arith.negf %36 : vector<8x128xf32>
    %38 = math.exp %37 : vector<8x128xf32>
    %cst_13 = arith.constant 1.000000e+00 : f32
    %39 = vector.broadcast %cst_13 : f32 to vector<8x128xf32>
    %40 = arith.addf %39, %38 : vector<8x128xf32>
    %41 = arith.divf %39, %40 : vector<8x128xf32>
    %42 = vector.extract_strided_slice %29 {offsets = [0, 256], sizes = [8, 128], strides = [1, 1]} : vector<8x512xf32> to vector<8x128xf32>
    %43 = math.tanh %42 : vector<8x128xf32>
    %44 = vector.extract_strided_slice %29 {offsets = [0, 384], sizes = [8, 128], strides = [1, 1]} : vector<8x512xf32> to vector<8x128xf32>
    %45 = arith.negf %44 : vector<8x128xf32>
    %46 = math.exp %45 : vector<8x128xf32>
    %cst_14 = arith.constant 1.000000e+00 : f32
    %47 = vector.broadcast %cst_14 : f32 to vector<8x128xf32>
    %48 = arith.addf %47, %46 : vector<8x128xf32>
    %49 = arith.divf %47, %48 : vector<8x128xf32>
    %50 = arith.mulf %41, %16 : vector<8x128xf32>
    %51 = arith.mulf %35, %43 : vector<8x128xf32>
    %52 = arith.addf %50, %51 : vector<8x128xf32>
    %53 = math.tanh %52 : vector<8x128xf32>
    %54 = arith.mulf %49, %53 : vector<8x128xf32>
    %55 = arith.index_cast %c1_i32 : i32 to index
    %c0_15 = arith.constant 0 : index
    %c0_16 = arith.constant 0 : index
    %56 = vector.load %arg5[%55, %c0_15, %c0_16] : memref<8x8x128xf32, #tpu.memory_space<vmem>>, vector<1x8x128xf32>
    %57 = vector.shape_cast %56 : vector<1x8x128xf32> to vector<8x128xf32>
    %58 = vector.shape_cast %54 : vector<8x128xf32> to vector<1x8x128xf32>
    tpu.vector_store %arg5[%55, %c0_15, %c0_16], %58 {strides = array<i32>} : memref<8x8x128xf32, #tpu.memory_space<vmem>>, vector<1x8x128xf32>,
    %c2_i32 = arith.constant 2 : i32
    %59 = arith.index_cast %c2_i32 : i32 to index
    %c0_17 = arith.constant 0 : index
    %c0_18 = arith.constant 0 : index
    %60 = vector.load %arg1[%59, %c0_17, %c0_18] : memref<8x8x512xf32, #tpu.memory_space<vmem>>, vector<1x8x512xf32>
    %61 = vector.shape_cast %60 : vector<1x8x512xf32> to vector<8x512xf32>
    %62 = arith.truncf %54 : vector<8x128xf32> to vector<8x128xbf16>
    %c0_19 = arith.constant 0 : index
    %c0_20 = arith.constant 0 : index
    %c0_21 = arith.constant 0 : index
    %63 = vector.load %arg3[%c0_19, %c0_20, %c0_21] : memref<2x128x512xbf16, #tpu.memory_space<vmem>>, vector<1x128x512xbf16>
    %64 = vector.shape_cast %63 : vector<1x128x512xbf16> to vector<128x512xbf16>
    %cst_22 = arith.constant dense<0.000000e+00> : vector<8x512xf32>
    %65 = tpu.matmul %62, %64, %cst_22 {dimension_numbers = #tpu.dot_dimension_numbers<[1], [0], [0], [1], [0, 0, 1, 1], [], []>} : vector<8x128xbf16>, vector<128x512xbf16>, vector<8x512xf32> -> vector<8x512xf32>
    %66 = arith.addf %61, %65 : vector<8x512xf32>
    %67 = vector.extract_strided_slice %66 {offsets = [0, 0], sizes = [8, 128], strides = [1, 1]} : vector<8x512xf32> to vector<8x128xf32>
    %68 = arith.negf %67 : vector<8x128xf32>
    %69 = math.exp %68 : vector<8x128xf32>
    %cst_23 = arith.constant 1.000000e+00 : f32
    %70 = vector.broadcast %cst_23 : f32 to vector<8x128xf32>
    %71 = arith.addf %70, %69 : vector<8x128xf32>
    %72 = arith.divf %70, %71 : vector<8x128xf32>
    %73 = vector.extract_strided_slice %66 {offsets = [0, 128], sizes = [8, 128], strides = [1, 1]} : vector<8x512xf32> to vector<8x128xf32>
    %74 = arith.negf %73 : vector<8x128xf32>
    %75 = math.exp %74 : vector<8x128xf32>
    %cst_24 = arith.constant 1.000000e+00 : f32
    %76 = vector.broadcast %cst_24 : f32 to vector<8x128xf32>
    %77 = arith.addf %76, %75 : vector<8x128xf32>
    %78 = arith.divf %76, %77 : vector<8x128xf32>
    %79 = vector.extract_strided_slice %66 {offsets = [0, 256], sizes = [8, 128], strides = [1, 1]} : vector<8x512xf32> to vector<8x128xf32>
    %80 = math.tanh %79 : vector<8x128xf32>
    %81 = vector.extract_strided_slice %66 {offsets = [0, 384], sizes = [8, 128], strides = [1, 1]} : vector<8x512xf32> to vector<8x128xf32>
    %82 = arith.negf %81 : vector<8x128xf32>
    %83 = math.exp %82 : vector<8x128xf32>
    %cst_25 = arith.constant 1.000000e+00 : f32
    %84 = vector.broadcast %cst_25 : f32 to vector<8x128xf32>
    %85 = arith.addf %84, %83 : vector<8x128xf32>
    %86 = arith.divf %84, %85 : vector<8x128xf32>
    %87 = arith.mulf %78, %52 : vector<8x128xf32>
    %88 = arith.mulf %72, %80 : vector<8x128xf32>
    %89 = arith.addf %87, %88 : vector<8x128xf32>
    %90 = math.tanh %89 : vector<8x128xf32>
    %91 = arith.mulf %86, %90 : vector<8x128xf32>
    %92 = arith.index_cast %c2_i32 : i32 to index
    %c0_26 = arith.constant 0 : index
    %c0_27 = arith.constant 0 : index
    %93 = vector.load %arg5[%92, %c0_26, %c0_27] : memref<8x8x128xf32, #tpu.memory_space<vmem>>, vector<1x8x128xf32>
    %94 = vector.shape_cast %93 : vector<1x8x128xf32> to vector<8x128xf32>
    %95 = vector.shape_cast %91 : vector<8x128xf32> to vector<1x8x128xf32>
    tpu.vector_store %arg5[%92, %c0_26, %c0_27], %95 {strides = array<i32>} : memref<8x8x128xf32, #tpu.memory_space<vmem>>, vector<1x8x128xf32>,
    %c3_i32 = arith.constant 3 : i32
    %96 = arith.index_cast %c3_i32 : i32 to index
    %c0_28 = arith.constant 0 : index
    %c0_29 = arith.constant 0 : index
    %97 = vector.load %arg1[%96, %c0_28, %c0_29] : memref<8x8x512xf32, #tpu.memory_space<vmem>>, vector<1x8x512xf32>
    %98 = vector.shape_cast %97 : vector<1x8x512xf32> to vector<8x512xf32>
    %99 = arith.truncf %91 : vector<8x128xf32> to vector<8x128xbf16>
    %c0_30 = arith.constant 0 : index
    %c0_31 = arith.constant 0 : index
    %c0_32 = arith.constant 0 : index
    %100 = vector.load %arg3[%c0_30, %c0_31, %c0_32] : memref<2x128x512xbf16, #tpu.memory_space<vmem>>, vector<1x128x512xbf16>
    %101 = vector.shape_cast %100 : vector<1x128x512xbf16> to vector<128x512xbf16>
    %cst_33 = arith.constant dense<0.000000e+00> : vector<8x512xf32>
    %102 = tpu.matmul %99, %101, %cst_33 {dimension_numbers = #tpu.dot_dimension_numbers<[1], [0], [0], [1], [0, 0, 1, 1], [], []>} : vector<8x128xbf16>, vector<128x512xbf16>, vector<8x512xf32> -> vector<8x512xf32>
    %103 = arith.addf %98, %102 : vector<8x512xf32>
    %104 = vector.extract_strided_slice %103 {offsets = [0, 0], sizes = [8, 128], strides = [1, 1]} : vector<8x512xf32> to vector<8x128xf32>
    %105 = arith.negf %104 : vector<8x128xf32>
    %106 = math.exp %105 : vector<8x128xf32>
    %cst_34 = arith.constant 1.000000e+00 : f32
    %107 = vector.broadcast %cst_34 : f32 to vector<8x128xf32>
    %108 = arith.addf %107, %106 : vector<8x128xf32>
    %109 = arith.divf %107, %108 : vector<8x128xf32>
    %110 = vector.extract_strided_slice %103 {offsets = [0, 128], sizes = [8, 128], strides = [1, 1]} : vector<8x512xf32> to vector<8x128xf32>
    %111 = arith.negf %110 : vector<8x128xf32>
    %112 = math.exp %111 : vector<8x128xf32>
    %cst_35 = arith.constant 1.000000e+00 : f32
    %113 = vector.broadcast %cst_35 : f32 to vector<8x128xf32>
    %114 = arith.addf %113, %112 : vector<8x128xf32>
    %115 = arith.divf %113, %114 : vector<8x128xf32>
    %116 = vector.extract_strided_slice %103 {offsets = [0, 256], sizes = [8, 128], strides = [1, 1]} : vector<8x512xf32> to vector<8x128xf32>
    %117 = math.tanh %116 : vector<8x128xf32>
    %118 = vector.extract_strided_slice %103 {offsets = [0, 384], sizes = [8, 128], strides = [1, 1]} : vector<8x512xf32> to vector<8x128xf32>
    %119 = arith.negf %118 : vector<8x128xf32>
    %120 = math.exp %119 : vector<8x128xf32>
    %cst_36 = arith.constant 1.000000e+00 : f32
    %121 = vector.broadcast %cst_36 : f32 to vector<8x128xf32>
    %122 = arith.addf %121, %120 : vector<8x128xf32>
    %123 = arith.divf %121, %122 : vector<8x128xf32>
    %124 = arith.mulf %115, %89 : vector<8x128xf32>
    %125 = arith.mulf %109, %117 : vector<8x128xf32>
    %126 = arith.addf %124, %125 : vector<8x128xf32>
    %127 = math.tanh %126 : vector<8x128xf32>
    %128 = arith.mulf %123, %127 : vector<8x128xf32>
    %129 = arith.index_cast %c3_i32 : i32 to index
    %c0_37 = arith.constant 0 : index
    %c0_38 = arith.constant 0 : index
    %130 = vector.load %arg5[%129, %c0_37, %c0_38] : memref<8x8x128xf32, #tpu.memory_space<vmem>>, vector<1x8x128xf32>
    %131 = vector.shape_cast %130 : vector<1x8x128xf32> to vector<8x128xf32>
    %132 = vector.shape_cast %128 : vector<8x128xf32> to vector<1x8x128xf32>
    tpu.vector_store %arg5[%129, %c0_37, %c0_38], %132 {strides = array<i32>} : memref<8x8x128xf32, #tpu.memory_space<vmem>>, vector<1x8x128xf32>,
    %c4_i32 = arith.constant 4 : i32
    %133 = arith.index_cast %c4_i32 : i32 to index
    %c0_39 = arith.constant 0 : index
    %c0_40 = arith.constant 0 : index
    %134 = vector.load %arg1[%133, %c0_39, %c0_40] : memref<8x8x512xf32, #tpu.memory_space<vmem>>, vector<1x8x512xf32>
    %135 = vector.shape_cast %134 : vector<1x8x512xf32> to vector<8x512xf32>
    %136 = arith.truncf %128 : vector<8x128xf32> to vector<8x128xbf16>
    %c0_41 = arith.constant 0 : index
    %c0_42 = arith.constant 0 : index
    %c0_43 = arith.constant 0 : index
    %137 = vector.load %arg3[%c0_41, %c0_42, %c0_43] : memref<2x128x512xbf16, #tpu.memory_space<vmem>>, vector<1x128x512xbf16>
    %138 = vector.shape_cast %137 : vector<1x128x512xbf16> to vector<128x512xbf16>
    %cst_44 = arith.constant dense<0.000000e+00> : vector<8x512xf32>
    %139 = tpu.matmul %136, %138, %cst_44 {dimension_numbers = #tpu.dot_dimension_numbers<[1], [0], [0], [1], [0, 0, 1, 1], [], []>} : vector<8x128xbf16>, vector<128x512xbf16>, vector<8x512xf32> -> vector<8x512xf32>
    %140 = arith.addf %135, %139 : vector<8x512xf32>
    %141 = vector.extract_strided_slice %140 {offsets = [0, 0], sizes = [8, 128], strides = [1, 1]} : vector<8x512xf32> to vector<8x128xf32>
    %142 = arith.negf %141 : vector<8x128xf32>
    %143 = math.exp %142 : vector<8x128xf32>
    %cst_45 = arith.constant 1.000000e+00 : f32
    %144 = vector.broadcast %cst_45 : f32 to vector<8x128xf32>
    %145 = arith.addf %144, %143 : vector<8x128xf32>
    %146 = arith.divf %144, %145 : vector<8x128xf32>
    %147 = vector.extract_strided_slice %140 {offsets = [0, 128], sizes = [8, 128], strides = [1, 1]} : vector<8x512xf32> to vector<8x128xf32>
    %148 = arith.negf %147 : vector<8x128xf32>
    %149 = math.exp %148 : vector<8x128xf32>
    %cst_46 = arith.constant 1.000000e+00 : f32
    %150 = vector.broadcast %cst_46 : f32 to vector<8x128xf32>
    %151 = arith.addf %150, %149 : vector<8x128xf32>
    %152 = arith.divf %150, %151 : vector<8x128xf32>
    %153 = vector.extract_strided_slice %140 {offsets = [0, 256], sizes = [8, 128], strides = [1, 1]} : vector<8x512xf32> to vector<8x128xf32>
    %154 = math.tanh %153 : vector<8x128xf32>
    %155 = vector.extract_strided_slice %140 {offsets = [0, 384], sizes = [8, 128], strides = [1, 1]} : vector<8x512xf32> to vector<8x128xf32>
    %156 = arith.negf %155 : vector<8x128xf32>
    %157 = math.exp %156 : vector<8x128xf32>
    %cst_47 = arith.constant 1.000000e+00 : f32
    %158 = vector.broadcast %cst_47 : f32 to vector<8x128xf32>
    %159 = arith.addf %158, %157 : vector<8x128xf32>
    %160 = arith.divf %158, %159 : vector<8x128xf32>
    %161 = arith.mulf %152, %126 : vector<8x128xf32>
    %162 = arith.mulf %146, %154 : vector<8x128xf32>
    %163 = arith.addf %161, %162 : vector<8x128xf32>
    %164 = math.tanh %163 : vector<8x128xf32>
    %165 = arith.mulf %160, %164 : vector<8x128xf32>
    %166 = arith.index_cast %c4_i32 : i32 to index
    %c0_48 = arith.constant 0 : index
    %c0_49 = arith.constant 0 : index
    %167 = vector.load %arg5[%166, %c0_48, %c0_49] : memref<8x8x128xf32, #tpu.memory_space<vmem>>, vector<1x8x128xf32>
    %168 = vector.shape_cast %167 : vector<1x8x128xf32> to vector<8x128xf32>
    %169 = vector.shape_cast %165 : vector<8x128xf32> to vector<1x8x128xf32>
    tpu.vector_store %arg5[%166, %c0_48, %c0_49], %169 {strides = array<i32>} : memref<8x8x128xf32, #tpu.memory_space<vmem>>, vector<1x8x128xf32>,
    %c5_i32 = arith.constant 5 : i32
    %170 = arith.index_cast %c5_i32 : i32 to index
    %c0_50 = arith.constant 0 : index
    %c0_51 = arith.constant 0 : index
    %171 = vector.load %arg1[%170, %c0_50, %c0_51] : memref<8x8x512xf32, #tpu.memory_space<vmem>>, vector<1x8x512xf32>
    %172 = vector.shape_cast %171 : vector<1x8x512xf32> to vector<8x512xf32>
    %173 = arith.truncf %165 : vector<8x128xf32> to vector<8x128xbf16>
    %c0_52 = arith.constant 0 : index
    %c0_53 = arith.constant 0 : index
    %c0_54 = arith.constant 0 : index
    %174 = vector.load %arg3[%c0_52, %c0_53, %c0_54] : memref<2x128x512xbf16, #tpu.memory_space<vmem>>, vector<1x128x512xbf16>
    %175 = vector.shape_cast %174 : vector<1x128x512xbf16> to vector<128x512xbf16>
    %cst_55 = arith.constant dense<0.000000e+00> : vector<8x512xf32>
    %176 = tpu.matmul %173, %175, %cst_55 {dimension_numbers = #tpu.dot_dimension_numbers<[1], [0], [0], [1], [0, 0, 1, 1], [], []>} : vector<8x128xbf16>, vector<128x512xbf16>, vector<8x512xf32> -> vector<8x512xf32>
    %177 = arith.addf %172, %176 : vector<8x512xf32>
    %178 = vector.extract_strided_slice %177 {offsets = [0, 0], sizes = [8, 128], strides = [1, 1]} : vector<8x512xf32> to vector<8x128xf32>
    %179 = arith.negf %178 : vector<8x128xf32>
    %180 = math.exp %179 : vector<8x128xf32>
    %cst_56 = arith.constant 1.000000e+00 : f32
    %181 = vector.broadcast %cst_56 : f32 to vector<8x128xf32>
    %182 = arith.addf %181, %180 : vector<8x128xf32>
    %183 = arith.divf %181, %182 : vector<8x128xf32>
    %184 = vector.extract_strided_slice %177 {offsets = [0, 128], sizes = [8, 128], strides = [1, 1]} : vector<8x512xf32> to vector<8x128xf32>
    %185 = arith.negf %184 : vector<8x128xf32>
    %186 = math.exp %185 : vector<8x128xf32>
    %cst_57 = arith.constant 1.000000e+00 : f32
    %187 = vector.broadcast %cst_57 : f32 to vector<8x128xf32>
    %188 = arith.addf %187, %186 : vector<8x128xf32>
    %189 = arith.divf %187, %188 : vector<8x128xf32>
    %190 = vector.extract_strided_slice %177 {offsets = [0, 256], sizes = [8, 128], strides = [1, 1]} : vector<8x512xf32> to vector<8x128xf32>
    %191 = math.tanh %190 : vector<8x128xf32>
    %192 = vector.extract_strided_slice %177 {offsets = [0, 384], sizes = [8, 128], strides = [1, 1]} : vector<8x512xf32> to vector<8x128xf32>
    %193 = arith.negf %192 : vector<8x128xf32>
    %194 = math.exp %193 : vector<8x128xf32>
    %cst_58 = arith.constant 1.000000e+00 : f32
    %195 = vector.broadcast %cst_58 : f32 to vector<8x128xf32>
    %196 = arith.addf %195, %194 : vector<8x128xf32>
    %197 = arith.divf %195, %196 : vector<8x128xf32>
    %198 = arith.mulf %189, %163 : vector<8x128xf32>
    %199 = arith.mulf %183, %191 : vector<8x128xf32>
    %200 = arith.addf %198, %199 : vector<8x128xf32>
    %201 = math.tanh %200 : vector<8x128xf32>
    %202 = arith.mulf %197, %201 : vector<8x128xf32>
    %203 = arith.index_cast %c5_i32 : i32 to index
    %c0_59 = arith.constant 0 : index
    %c0_60 = arith.constant 0 : index
    %204 = vector.load %arg5[%203, %c0_59, %c0_60] : memref<8x8x128xf32, #tpu.memory_space<vmem>>, vector<1x8x128xf32>
    %205 = vector.shape_cast %204 : vector<1x8x128xf32> to vector<8x128xf32>
    %206 = vector.shape_cast %202 : vector<8x128xf32> to vector<1x8x128xf32>
    tpu.vector_store %arg5[%203, %c0_59, %c0_60], %206 {strides = array<i32>} : memref<8x8x128xf32, #tpu.memory_space<vmem>>, vector<1x8x128xf32>,
    %c6_i32 = arith.constant 6 : i32
    %207 = arith.index_cast %c6_i32 : i32 to index
    %c0_61 = arith.constant 0 : index
    %c0_62 = arith.constant 0 : index
    %208 = vector.load %arg1[%207, %c0_61, %c0_62] : memref<8x8x512xf32, #tpu.memory_space<vmem>>, vector<1x8x512xf32>
    %209 = vector.shape_cast %208 : vector<1x8x512xf32> to vector<8x512xf32>
    %210 = arith.truncf %202 : vector<8x128xf32> to vector<8x128xbf16>
    %c0_63 = arith.constant 0 : index
    %c0_64 = arith.constant 0 : index
    %c0_65 = arith.constant 0 : index
    %211 = vector.load %arg3[%c0_63, %c0_64, %c0_65] : memref<2x128x512xbf16, #tpu.memory_space<vmem>>, vector<1x128x512xbf16>
    %212 = vector.shape_cast %211 : vector<1x128x512xbf16> to vector<128x512xbf16>
    %cst_66 = arith.constant dense<0.000000e+00> : vector<8x512xf32>
    %213 = tpu.matmul %210, %212, %cst_66 {dimension_numbers = #tpu.dot_dimension_numbers<[1], [0], [0], [1], [0, 0, 1, 1], [], []>} : vector<8x128xbf16>, vector<128x512xbf16>, vector<8x512xf32> -> vector<8x512xf32>
    %214 = arith.addf %209, %213 : vector<8x512xf32>
    %215 = vector.extract_strided_slice %214 {offsets = [0, 0], sizes = [8, 128], strides = [1, 1]} : vector<8x512xf32> to vector<8x128xf32>
    %216 = arith.negf %215 : vector<8x128xf32>
    %217 = math.exp %216 : vector<8x128xf32>
    %cst_67 = arith.constant 1.000000e+00 : f32
    %218 = vector.broadcast %cst_67 : f32 to vector<8x128xf32>
    %219 = arith.addf %218, %217 : vector<8x128xf32>
    %220 = arith.divf %218, %219 : vector<8x128xf32>
    %221 = vector.extract_strided_slice %214 {offsets = [0, 128], sizes = [8, 128], strides = [1, 1]} : vector<8x512xf32> to vector<8x128xf32>
    %222 = arith.negf %221 : vector<8x128xf32>
    %223 = math.exp %222 : vector<8x128xf32>
    %cst_68 = arith.constant 1.000000e+00 : f32
    %224 = vector.broadcast %cst_68 : f32 to vector<8x128xf32>
    %225 = arith.addf %224, %223 : vector<8x128xf32>
    %226 = arith.divf %224, %225 : vector<8x128xf32>
    %227 = vector.extract_strided_slice %214 {offsets = [0, 256], sizes = [8, 128], strides = [1, 1]} : vector<8x512xf32> to vector<8x128xf32>
    %228 = math.tanh %227 : vector<8x128xf32>
    %229 = vector.extract_strided_slice %214 {offsets = [0, 384], sizes = [8, 128], strides = [1, 1]} : vector<8x512xf32> to vector<8x128xf32>
    %230 = arith.negf %229 : vector<8x128xf32>
    %231 = math.exp %230 : vector<8x128xf32>
    %cst_69 = arith.constant 1.000000e+00 : f32
    %232 = vector.broadcast %cst_69 : f32 to vector<8x128xf32>
    %233 = arith.addf %232, %231 : vector<8x128xf32>
    %234 = arith.divf %232, %233 : vector<8x128xf32>
    %235 = arith.mulf %226, %200 : vector<8x128xf32>
    %236 = arith.mulf %220, %228 : vector<8x128xf32>
    %237 = arith.addf %235, %236 : vector<8x128xf32>
    %238 = math.tanh %237 : vector<8x128xf32>
    %239 = arith.mulf %234, %238 : vector<8x128xf32>
    %240 = arith.index_cast %c6_i32 : i32 to index
    %c0_70 = arith.constant 0 : index
    %c0_71 = arith.constant 0 : index
    %241 = vector.load %arg5[%240, %c0_70, %c0_71] : memref<8x8x128xf32, #tpu.memory_space<vmem>>, vector<1x8x128xf32>
    %242 = vector.shape_cast %241 : vector<1x8x128xf32> to vector<8x128xf32>
    %243 = vector.shape_cast %239 : vector<8x128xf32> to vector<1x8x128xf32>
    tpu.vector_store %arg5[%240, %c0_70, %c0_71], %243 {strides = array<i32>} : memref<8x8x128xf32, #tpu.memory_space<vmem>>, vector<1x8x128xf32>,
    %c7_i32 = arith.constant 7 : i32
    %244 = arith.index_cast %c7_i32 : i32 to index
    %c0_72 = arith.constant 0 : index
    %c0_73 = arith.constant 0 : index
    %245 = vector.load %arg1[%244, %c0_72, %c0_73] : memref<8x8x512xf32, #tpu.memory_space<vmem>>, vector<1x8x512xf32>
    %246 = vector.shape_cast %245 : vector<1x8x512xf32> to vector<8x512xf32>
    %247 = arith.truncf %239 : vector<8x128xf32> to vector<8x128xbf16>
    %c0_74 = arith.constant 0 : index
    %c0_75 = arith.constant 0 : index
    %c0_76 = arith.constant 0 : index
    %248 = vector.load %arg3[%c0_74, %c0_75, %c0_76] : memref<2x128x512xbf16, #tpu.memory_space<vmem>>, vector<1x128x512xbf16>
    %249 = vector.shape_cast %248 : vector<1x128x512xbf16> to vector<128x512xbf16>
    %cst_77 = arith.constant dense<0.000000e+00> : vector<8x512xf32>
    %250 = tpu.matmul %247, %249, %cst_77 {dimension_numbers = #tpu.dot_dimension_numbers<[1], [0], [0], [1], [0, 0, 1, 1], [], []>} : vector<8x128xbf16>, vector<128x512xbf16>, vector<8x512xf32> -> vector<8x512xf32>
    %251 = arith.addf %246, %250 : vector<8x512xf32>
    %252 = vector.extract_strided_slice %251 {offsets = [0, 0], sizes = [8, 128], strides = [1, 1]} : vector<8x512xf32> to vector<8x128xf32>
    %253 = arith.negf %252 : vector<8x128xf32>
    %254 = math.exp %253 : vector<8x128xf32>
    %cst_78 = arith.constant 1.000000e+00 : f32
    %255 = vector.broadcast %cst_78 : f32 to vector<8x128xf32>
    %256 = arith.addf %255, %254 : vector<8x128xf32>
    %257 = arith.divf %255, %256 : vector<8x128xf32>
    %258 = vector.extract_strided_slice %251 {offsets = [0, 128], sizes = [8, 128], strides = [1, 1]} : vector<8x512xf32> to vector<8x128xf32>
    %259 = arith.negf %258 : vector<8x128xf32>
    %260 = math.exp %259 : vector<8x128xf32>
    %cst_79 = arith.constant 1.000000e+00 : f32
    %261 = vector.broadcast %cst_79 : f32 to vector<8x128xf32>
    %262 = arith.addf %261, %260 : vector<8x128xf32>
    %263 = arith.divf %261, %262 : vector<8x128xf32>
    %264 = vector.extract_strided_slice %251 {offsets = [0, 256], sizes = [8, 128], strides = [1, 1]} : vector<8x512xf32> to vector<8x128xf32>
    %265 = math.tanh %264 : vector<8x128xf32>
    %266 = vector.extract_strided_slice %251 {offsets = [0, 384], sizes = [8, 128], strides = [1, 1]} : vector<8x512xf32> to vector<8x128xf32>
    %267 = arith.negf %266 : vector<8x128xf32>
    %268 = math.exp %267 : vector<8x128xf32>
    %cst_80 = arith.constant 1.000000e+00 : f32
    %269 = vector.broadcast %cst_80 : f32 to vector<8x128xf32>
    %270 = arith.addf %269, %268 : vector<8x128xf32>
    %271 = arith.divf %269, %270 : vector<8x128xf32>
    %272 = arith.mulf %263, %237 : vector<8x128xf32>
    %273 = arith.mulf %257, %265 : vector<8x128xf32>
    %274 = arith.addf %272, %273 : vector<8x128xf32>
    %275 = math.tanh %274 : vector<8x128xf32>
    %276 = arith.mulf %271, %275 : vector<8x128xf32>
    %277 = arith.index_cast %c7_i32 : i32 to index
    %c0_81 = arith.constant 0 : index
    %c0_82 = arith.constant 0 : index
    %278 = vector.load %arg5[%277, %c0_81, %c0_82] : memref<8x8x128xf32, #tpu.memory_space<vmem>>, vector<1x8x128xf32>
    %279 = vector.shape_cast %278 : vector<1x8x128xf32> to vector<8x128xf32>
    %280 = vector.shape_cast %276 : vector<8x128xf32> to vector<1x8x128xf32>
    tpu.vector_store %arg5[%277, %c0_81, %c0_82], %280 {strides = array<i32>} : memref<8x8x128xf32, #tpu.memory_space<vmem>>, vector<1x8x128xf32>,
    %c7_i32_83 = arith.constant 7 : i32
    %c0_84 = arith.constant 0 : index
    %c0_85 = arith.constant 0 : index
    %c0_86 = arith.constant 0 : index
    %281 = vector.load %arg6[%c0_84, %c0_85, %c0_86] : memref<2x8x128xf32, #tpu.memory_space<vmem>>, vector<1x8x128xf32>
    %282 = vector.shape_cast %281 : vector<1x8x128xf32> to vector<8x128xf32>
    %283 = vector.shape_cast %276 : vector<8x128xf32> to vector<1x8x128xf32>
    tpu.vector_store %arg6[%c0_84, %c0_85, %c0_86], %283 {strides = array<i32>} : memref<2x8x128xf32, #tpu.memory_space<vmem>>, vector<1x8x128xf32>,
    %c0_87 = arith.constant 0 : index
    %c0_88 = arith.constant 0 : index
    %c0_89 = arith.constant 0 : index
    %284 = vector.load %arg7[%c0_87, %c0_88, %c0_89] : memref<2x8x128xf32, #tpu.memory_space<vmem>>, vector<1x8x128xf32>
    %285 = vector.shape_cast %284 : vector<1x8x128xf32> to vector<8x128xf32>
    %286 = vector.shape_cast %274 : vector<8x128xf32> to vector<1x8x128xf32>
    tpu.vector_store %arg7[%c0_87, %c0_88, %c0_89], %286 {strides = array<i32>} : memref<2x8x128xf32, #tpu.memory_space<vmem>>, vector<1x8x128xf32>,
    %c0_90 = arith.constant 0 : index
    %c0_91 = arith.constant 0 : index
    %c0_92 = arith.constant 0 : index
    %287 = vector.load %arg5[%c0_90, %c0_91, %c0_92] : memref<8x8x128xf32, #tpu.memory_space<vmem>>, vector<8x8x128xf32>
    %288 = vector.shape_cast %287 : vector<8x8x128xf32> to vector<64x128xf32>
    %289 = arith.truncf %288 : vector<64x128xf32> to vector<64x128xbf16>
    %c0_93 = arith.constant 0 : index
    %c0_94 = arith.constant 0 : index
    %c0_95 = arith.constant 0 : index
    %290 = vector.load %arg2[%c0_93, %c0_94, %c0_95] : memref<1x128x512xbf16, #tpu.memory_space<vmem>>, vector<1x128x512xbf16>
    %291 = vector.shape_cast %290 : vector<1x128x512xbf16> to vector<128x512xbf16>
    %cst_96 = arith.constant dense<0.000000e+00> : vector<64x512xf32>
    %292 = tpu.matmul %289, %291, %cst_96 {dimension_numbers = #tpu.dot_dimension_numbers<[1], [0], [0], [1], [0, 0, 1, 1], [], []>} : vector<64x128xbf16>, vector<128x512xbf16>, vector<64x512xf32> -> vector<64x512xf32>
    %c0_97 = arith.constant 0 : index
    %c0_98 = arith.constant 0 : index
    %c0_99 = arith.constant 0 : index
    %293 = vector.load %arg4[%c0_97, %c0_98, %c0_99] : memref<1x1x512xf32, #tpu.memory_space<vmem>>, vector<1x1x512xf32>
    %294 = vector.shape_cast %293 : vector<1x1x512xf32> to vector<1x512xf32>
    %295 = vector.broadcast %294 : vector<1x512xf32> to vector<64x512xf32>
    %296 = arith.addf %292, %295 : vector<64x512xf32>
    %297 = vector.shape_cast %296 : vector<64x512xf32> to vector<8x8x512xf32>
    %c0_100 = arith.constant 0 : index
    %c0_101 = arith.constant 0 : index
    %c0_102 = arith.constant 0 : index
    %298 = vector.load %arg8[%c0_100, %c0_101, %c0_102] : memref<8x8x512xf32, #tpu.memory_space<vmem>>, vector<8x8x512xf32>
    tpu.vector_store %arg8[%c0_100, %c0_101, %c0_102], %297 {strides = array<i32>} : memref<8x8x512xf32, #tpu.memory_space<vmem>>, vector<8x8x512xf32>,
    %c0_103 = arith.constant 0 : index
    %c0_104 = arith.constant 0 : index
    %c0_105 = arith.constant 0 : index
    %299 = vector.load %arg8[%c0_103, %c0_104, %c0_105] : memref<8x8x512xf32, #tpu.memory_space<vmem>>, vector<1x8x512xf32>
    %300 = vector.shape_cast %299 : vector<1x8x512xf32> to vector<8x512xf32>
    %301 = vector.extract_strided_slice %300 {offsets = [0, 0], sizes = [8, 128], strides = [1, 1]} : vector<8x512xf32> to vector<8x128xf32>
    %302 = arith.negf %301 : vector<8x128xf32>
    %303 = math.exp %302 : vector<8x128xf32>
    %cst_106 = arith.constant 1.000000e+00 : f32
    %304 = vector.broadcast %cst_106 : f32 to vector<8x128xf32>
    %305 = arith.addf %304, %303 : vector<8x128xf32>
    %306 = arith.divf %304, %305 : vector<8x128xf32>
    %307 = vector.extract_strided_slice %300 {offsets = [0, 256], sizes = [8, 128], strides = [1, 1]} : vector<8x512xf32> to vector<8x128xf32>
    %308 = math.tanh %307 : vector<8x128xf32>
    %309 = vector.extract_strided_slice %300 {offsets = [0, 384], sizes = [8, 128], strides = [1, 1]} : vector<8x512xf32> to vector<8x128xf32>
    %310 = arith.negf %309 : vector<8x128xf32>
    %311 = math.exp %310 : vector<8x128xf32>
    %cst_107 = arith.constant 1.000000e+00 : f32
    %312 = vector.broadcast %cst_107 : f32 to vector<8x128xf32>
    %313 = arith.addf %312, %311 : vector<8x128xf32>
    %314 = arith.divf %312, %313 : vector<8x128xf32>
    %315 = arith.mulf %306, %308 : vector<8x128xf32>
    %316 = math.tanh %315 : vector<8x128xf32>
    %317 = arith.mulf %314, %316 : vector<8x128xf32>
    %c0_108 = arith.constant 0 : index
    %c0_109 = arith.constant 0 : index
    %c0_110 = arith.constant 0 : index
    %318 = vector.load %arg5[%c0_108, %c0_109, %c0_110] : memref<8x8x128xf32, #tpu.memory_space<vmem>>, vector<1x8x128xf32>
    %319 = vector.shape_cast %318 : vector<1x8x128xf32> to vector<8x128xf32>
    %320 = vector.shape_cast %317 : vector<8x128xf32> to vector<1x8x128xf32>
    tpu.vector_store %arg5[%c0_108, %c0_109, %c0_110], %320 {strides = array<i32>} : memref<8x8x128xf32, #tpu.memory_space<vmem>>, vector<1x8x128xf32>,
    %c1_i32_111 = arith.constant 1 : i32
    %321 = arith.index_cast %c1_i32_111 : i32 to index
    %c0_112 = arith.constant 0 : index
    %c0_113 = arith.constant 0 : index
    %322 = vector.load %arg8[%321, %c0_112, %c0_113] : memref<8x8x512xf32, #tpu.memory_space<vmem>>, vector<1x8x512xf32>
    %323 = vector.shape_cast %322 : vector<1x8x512xf32> to vector<8x512xf32>
    %324 = arith.truncf %317 : vector<8x128xf32> to vector<8x128xbf16>
    %c1 = arith.constant 1 : index
    %c0_114 = arith.constant 0 : index
    %c0_115 = arith.constant 0 : index
    %325 = vector.load %arg3[%c1, %c0_114, %c0_115] : memref<2x128x512xbf16, #tpu.memory_space<vmem>>, vector<1x128x512xbf16>
    %326 = vector.shape_cast %325 : vector<1x128x512xbf16> to vector<128x512xbf16>
    %cst_116 = arith.constant dense<0.000000e+00> : vector<8x512xf32>
    %327 = tpu.matmul %324, %326, %cst_116 {dimension_numbers = #tpu.dot_dimension_numbers<[1], [0], [0], [1], [0, 0, 1, 1], [], []>} : vector<8x128xbf16>, vector<128x512xbf16>, vector<8x512xf32> -> vector<8x512xf32>
    %328 = arith.addf %323, %327 : vector<8x512xf32>
    %329 = vector.extract_strided_slice %328 {offsets = [0, 0], sizes = [8, 128], strides = [1, 1]} : vector<8x512xf32> to vector<8x128xf32>
    %330 = arith.negf %329 : vector<8x128xf32>
    %331 = math.exp %330 : vector<8x128xf32>
    %cst_117 = arith.constant 1.000000e+00 : f32
    %332 = vector.broadcast %cst_117 : f32 to vector<8x128xf32>
    %333 = arith.addf %332, %331 : vector<8x128xf32>
    %334 = arith.divf %332, %333 : vector<8x128xf32>
    %335 = vector.extract_strided_slice %328 {offsets = [0, 128], sizes = [8, 128], strides = [1, 1]} : vector<8x512xf32> to vector<8x128xf32>
    %336 = arith.negf %335 : vector<8x128xf32>
    %337 = math.exp %336 : vector<8x128xf32>
    %cst_118 = arith.constant 1.000000e+00 : f32
    %338 = vector.broadcast %cst_118 : f32 to vector<8x128xf32>
    %339 = arith.addf %338, %337 : vector<8x128xf32>
    %340 = arith.divf %338, %339 : vector<8x128xf32>
    %341 = vector.extract_strided_slice %328 {offsets = [0, 256], sizes = [8, 128], strides = [1, 1]} : vector<8x512xf32> to vector<8x128xf32>
    %342 = math.tanh %341 : vector<8x128xf32>
    %343 = vector.extract_strided_slice %328 {offsets = [0, 384], sizes = [8, 128], strides = [1, 1]} : vector<8x512xf32> to vector<8x128xf32>
    %344 = arith.negf %343 : vector<8x128xf32>
    %345 = math.exp %344 : vector<8x128xf32>
    %cst_119 = arith.constant 1.000000e+00 : f32
    %346 = vector.broadcast %cst_119 : f32 to vector<8x128xf32>
    %347 = arith.addf %346, %345 : vector<8x128xf32>
    %348 = arith.divf %346, %347 : vector<8x128xf32>
    %349 = arith.mulf %340, %315 : vector<8x128xf32>
    %350 = arith.mulf %334, %342 : vector<8x128xf32>
    %351 = arith.addf %349, %350 : vector<8x128xf32>
    %352 = math.tanh %351 : vector<8x128xf32>
    %353 = arith.mulf %348, %352 : vector<8x128xf32>
    %354 = arith.index_cast %c1_i32_111 : i32 to index
    %c0_120 = arith.constant 0 : index
    %c0_121 = arith.constant 0 : index
    %355 = vector.load %arg5[%354, %c0_120, %c0_121] : memref<8x8x128xf32, #tpu.memory_space<vmem>>, vector<1x8x128xf32>
    %356 = vector.shape_cast %355 : vector<1x8x128xf32> to vector<8x128xf32>
    %357 = vector.shape_cast %353 : vector<8x128xf32> to vector<1x8x128xf32>
    tpu.vector_store %arg5[%354, %c0_120, %c0_121], %357 {strides = array<i32>} : memref<8x8x128xf32, #tpu.memory_space<vmem>>, vector<1x8x128xf32>,
    %c2_i32_122 = arith.constant 2 : i32
    %358 = arith.index_cast %c2_i32_122 : i32 to index
    %c0_123 = arith.constant 0 : index
    %c0_124 = arith.constant 0 : index
    %359 = vector.load %arg8[%358, %c0_123, %c0_124] : memref<8x8x512xf32, #tpu.memory_space<vmem>>, vector<1x8x512xf32>
    %360 = vector.shape_cast %359 : vector<1x8x512xf32> to vector<8x512xf32>
    %361 = arith.truncf %353 : vector<8x128xf32> to vector<8x128xbf16>
    %c1_125 = arith.constant 1 : index
    %c0_126 = arith.constant 0 : index
    %c0_127 = arith.constant 0 : index
    %362 = vector.load %arg3[%c1_125, %c0_126, %c0_127] : memref<2x128x512xbf16, #tpu.memory_space<vmem>>, vector<1x128x512xbf16>
    %363 = vector.shape_cast %362 : vector<1x128x512xbf16> to vector<128x512xbf16>
    %cst_128 = arith.constant dense<0.000000e+00> : vector<8x512xf32>
    %364 = tpu.matmul %361, %363, %cst_128 {dimension_numbers = #tpu.dot_dimension_numbers<[1], [0], [0], [1], [0, 0, 1, 1], [], []>} : vector<8x128xbf16>, vector<128x512xbf16>, vector<8x512xf32> -> vector<8x512xf32>
    %365 = arith.addf %360, %364 : vector<8x512xf32>
    %366 = vector.extract_strided_slice %365 {offsets = [0, 0], sizes = [8, 128], strides = [1, 1]} : vector<8x512xf32> to vector<8x128xf32>
    %367 = arith.negf %366 : vector<8x128xf32>
    %368 = math.exp %367 : vector<8x128xf32>
    %cst_129 = arith.constant 1.000000e+00 : f32
    %369 = vector.broadcast %cst_129 : f32 to vector<8x128xf32>
    %370 = arith.addf %369, %368 : vector<8x128xf32>
    %371 = arith.divf %369, %370 : vector<8x128xf32>
    %372 = vector.extract_strided_slice %365 {offsets = [0, 128], sizes = [8, 128], strides = [1, 1]} : vector<8x512xf32> to vector<8x128xf32>
    %373 = arith.negf %372 : vector<8x128xf32>
    %374 = math.exp %373 : vector<8x128xf32>
    %cst_130 = arith.constant 1.000000e+00 : f32
    %375 = vector.broadcast %cst_130 : f32 to vector<8x128xf32>
    %376 = arith.addf %375, %374 : vector<8x128xf32>
    %377 = arith.divf %375, %376 : vector<8x128xf32>
    %378 = vector.extract_strided_slice %365 {offsets = [0, 256], sizes = [8, 128], strides = [1, 1]} : vector<8x512xf32> to vector<8x128xf32>
    %379 = math.tanh %378 : vector<8x128xf32>
    %380 = vector.extract_strided_slice %365 {offsets = [0, 384], sizes = [8, 128], strides = [1, 1]} : vector<8x512xf32> to vector<8x128xf32>
    %381 = arith.negf %380 : vector<8x128xf32>
    %382 = math.exp %381 : vector<8x128xf32>
    %cst_131 = arith.constant 1.000000e+00 : f32
    %383 = vector.broadcast %cst_131 : f32 to vector<8x128xf32>
    %384 = arith.addf %383, %382 : vector<8x128xf32>
    %385 = arith.divf %383, %384 : vector<8x128xf32>
    %386 = arith.mulf %377, %351 : vector<8x128xf32>
    %387 = arith.mulf %371, %379 : vector<8x128xf32>
    %388 = arith.addf %386, %387 : vector<8x128xf32>
    %389 = math.tanh %388 : vector<8x128xf32>
    %390 = arith.mulf %385, %389 : vector<8x128xf32>
    %391 = arith.index_cast %c2_i32_122 : i32 to index
    %c0_132 = arith.constant 0 : index
    %c0_133 = arith.constant 0 : index
    %392 = vector.load %arg5[%391, %c0_132, %c0_133] : memref<8x8x128xf32, #tpu.memory_space<vmem>>, vector<1x8x128xf32>
    %393 = vector.shape_cast %392 : vector<1x8x128xf32> to vector<8x128xf32>
    %394 = vector.shape_cast %390 : vector<8x128xf32> to vector<1x8x128xf32>
    tpu.vector_store %arg5[%391, %c0_132, %c0_133], %394 {strides = array<i32>} : memref<8x8x128xf32, #tpu.memory_space<vmem>>, vector<1x8x128xf32>,
    %c3_i32_134 = arith.constant 3 : i32
    %395 = arith.index_cast %c3_i32_134 : i32 to index
    %c0_135 = arith.constant 0 : index
    %c0_136 = arith.constant 0 : index
    %396 = vector.load %arg8[%395, %c0_135, %c0_136] : memref<8x8x512xf32, #tpu.memory_space<vmem>>, vector<1x8x512xf32>
    %397 = vector.shape_cast %396 : vector<1x8x512xf32> to vector<8x512xf32>
    %398 = arith.truncf %390 : vector<8x128xf32> to vector<8x128xbf16>
    %c1_137 = arith.constant 1 : index
    %c0_138 = arith.constant 0 : index
    %c0_139 = arith.constant 0 : index
    %399 = vector.load %arg3[%c1_137, %c0_138, %c0_139] : memref<2x128x512xbf16, #tpu.memory_space<vmem>>, vector<1x128x512xbf16>
    %400 = vector.shape_cast %399 : vector<1x128x512xbf16> to vector<128x512xbf16>
    %cst_140 = arith.constant dense<0.000000e+00> : vector<8x512xf32>
    %401 = tpu.matmul %398, %400, %cst_140 {dimension_numbers = #tpu.dot_dimension_numbers<[1], [0], [0], [1], [0, 0, 1, 1], [], []>} : vector<8x128xbf16>, vector<128x512xbf16>, vector<8x512xf32> -> vector<8x512xf32>
    %402 = arith.addf %397, %401 : vector<8x512xf32>
    %403 = vector.extract_strided_slice %402 {offsets = [0, 0], sizes = [8, 128], strides = [1, 1]} : vector<8x512xf32> to vector<8x128xf32>
    %404 = arith.negf %403 : vector<8x128xf32>
    %405 = math.exp %404 : vector<8x128xf32>
    %cst_141 = arith.constant 1.000000e+00 : f32
    %406 = vector.broadcast %cst_141 : f32 to vector<8x128xf32>
    %407 = arith.addf %406, %405 : vector<8x128xf32>
    %408 = arith.divf %406, %407 : vector<8x128xf32>
    %409 = vector.extract_strided_slice %402 {offsets = [0, 128], sizes = [8, 128], strides = [1, 1]} : vector<8x512xf32> to vector<8x128xf32>
    %410 = arith.negf %409 : vector<8x128xf32>
    %411 = math.exp %410 : vector<8x128xf32>
    %cst_142 = arith.constant 1.000000e+00 : f32
    %412 = vector.broadcast %cst_142 : f32 to vector<8x128xf32>
    %413 = arith.addf %412, %411 : vector<8x128xf32>
    %414 = arith.divf %412, %413 : vector<8x128xf32>
    %415 = vector.extract_strided_slice %402 {offsets = [0, 256], sizes = [8, 128], strides = [1, 1]} : vector<8x512xf32> to vector<8x128xf32>
    %416 = math.tanh %415 : vector<8x128xf32>
    %417 = vector.extract_strided_slice %402 {offsets = [0, 384], sizes = [8, 128], strides = [1, 1]} : vector<8x512xf32> to vector<8x128xf32>
    %418 = arith.negf %417 : vector<8x128xf32>
    %419 = math.exp %418 : vector<8x128xf32>
    %cst_143 = arith.constant 1.000000e+00 : f32
    %420 = vector.broadcast %cst_143 : f32 to vector<8x128xf32>
    %421 = arith.addf %420, %419 : vector<8x128xf32>
    %422 = arith.divf %420, %421 : vector<8x128xf32>
    %423 = arith.mulf %414, %388 : vector<8x128xf32>
    %424 = arith.mulf %408, %416 : vector<8x128xf32>
    %425 = arith.addf %423, %424 : vector<8x128xf32>
    %426 = math.tanh %425 : vector<8x128xf32>
    %427 = arith.mulf %422, %426 : vector<8x128xf32>
    %428 = arith.index_cast %c3_i32_134 : i32 to index
    %c0_144 = arith.constant 0 : index
    %c0_145 = arith.constant 0 : index
    %429 = vector.load %arg5[%428, %c0_144, %c0_145] : memref<8x8x128xf32, #tpu.memory_space<vmem>>, vector<1x8x128xf32>
    %430 = vector.shape_cast %429 : vector<1x8x128xf32> to vector<8x128xf32>
    %431 = vector.shape_cast %427 : vector<8x128xf32> to vector<1x8x128xf32>
    tpu.vector_store %arg5[%428, %c0_144, %c0_145], %431 {strides = array<i32>} : memref<8x8x128xf32, #tpu.memory_space<vmem>>, vector<1x8x128xf32>,
    %c4_i32_146 = arith.constant 4 : i32
    %432 = arith.index_cast %c4_i32_146 : i32 to index
    %c0_147 = arith.constant 0 : index
    %c0_148 = arith.constant 0 : index
    %433 = vector.load %arg8[%432, %c0_147, %c0_148] : memref<8x8x512xf32, #tpu.memory_space<vmem>>, vector<1x8x512xf32>
    %434 = vector.shape_cast %433 : vector<1x8x512xf32> to vector<8x512xf32>
    %435 = arith.truncf %427 : vector<8x128xf32> to vector<8x128xbf16>
    %c1_149 = arith.constant 1 : index
    %c0_150 = arith.constant 0 : index
    %c0_151 = arith.constant 0 : index
    %436 = vector.load %arg3[%c1_149, %c0_150, %c0_151] : memref<2x128x512xbf16, #tpu.memory_space<vmem>>, vector<1x128x512xbf16>
    %437 = vector.shape_cast %436 : vector<1x128x512xbf16> to vector<128x512xbf16>
    %cst_152 = arith.constant dense<0.000000e+00> : vector<8x512xf32>
    %438 = tpu.matmul %435, %437, %cst_152 {dimension_numbers = #tpu.dot_dimension_numbers<[1], [0], [0], [1], [0, 0, 1, 1], [], []>} : vector<8x128xbf16>, vector<128x512xbf16>, vector<8x512xf32> -> vector<8x512xf32>
    %439 = arith.addf %434, %438 : vector<8x512xf32>
    %440 = vector.extract_strided_slice %439 {offsets = [0, 0], sizes = [8, 128], strides = [1, 1]} : vector<8x512xf32> to vector<8x128xf32>
    %441 = arith.negf %440 : vector<8x128xf32>
    %442 = math.exp %441 : vector<8x128xf32>
    %cst_153 = arith.constant 1.000000e+00 : f32
    %443 = vector.broadcast %cst_153 : f32 to vector<8x128xf32>
    %444 = arith.addf %443, %442 : vector<8x128xf32>
    %445 = arith.divf %443, %444 : vector<8x128xf32>
    %446 = vector.extract_strided_slice %439 {offsets = [0, 128], sizes = [8, 128], strides = [1, 1]} : vector<8x512xf32> to vector<8x128xf32>
    %447 = arith.negf %446 : vector<8x128xf32>
    %448 = math.exp %447 : vector<8x128xf32>
    %cst_154 = arith.constant 1.000000e+00 : f32
    %449 = vector.broadcast %cst_154 : f32 to vector<8x128xf32>
    %450 = arith.addf %449, %448 : vector<8x128xf32>
    %451 = arith.divf %449, %450 : vector<8x128xf32>
    %452 = vector.extract_strided_slice %439 {offsets = [0, 256], sizes = [8, 128], strides = [1, 1]} : vector<8x512xf32> to vector<8x128xf32>
    %453 = math.tanh %452 : vector<8x128xf32>
    %454 = vector.extract_strided_slice %439 {offsets = [0, 384], sizes = [8, 128], strides = [1, 1]} : vector<8x512xf32> to vector<8x128xf32>
    %455 = arith.negf %454 : vector<8x128xf32>
    %456 = math.exp %455 : vector<8x128xf32>
    %cst_155 = arith.constant 1.000000e+00 : f32
    %457 = vector.broadcast %cst_155 : f32 to vector<8x128xf32>
    %458 = arith.addf %457, %456 : vector<8x128xf32>
    %459 = arith.divf %457, %458 : vector<8x128xf32>
    %460 = arith.mulf %451, %425 : vector<8x128xf32>
    %461 = arith.mulf %445, %453 : vector<8x128xf32>
    %462 = arith.addf %460, %461 : vector<8x128xf32>
    %463 = math.tanh %462 : vector<8x128xf32>
    %464 = arith.mulf %459, %463 : vector<8x128xf32>
    %465 = arith.index_cast %c4_i32_146 : i32 to index
    %c0_156 = arith.constant 0 : index
    %c0_157 = arith.constant 0 : index
    %466 = vector.load %arg5[%465, %c0_156, %c0_157] : memref<8x8x128xf32, #tpu.memory_space<vmem>>, vector<1x8x128xf32>
    %467 = vector.shape_cast %466 : vector<1x8x128xf32> to vector<8x128xf32>
    %468 = vector.shape_cast %464 : vector<8x128xf32> to vector<1x8x128xf32>
    tpu.vector_store %arg5[%465, %c0_156, %c0_157], %468 {strides = array<i32>} : memref<8x8x128xf32, #tpu.memory_space<vmem>>, vector<1x8x128xf32>,
    %c5_i32_158 = arith.constant 5 : i32
    %469 = arith.index_cast %c5_i32_158 : i32 to index
    %c0_159 = arith.constant 0 : index
    %c0_160 = arith.constant 0 : index
    %470 = vector.load %arg8[%469, %c0_159, %c0_160] : memref<8x8x512xf32, #tpu.memory_space<vmem>>, vector<1x8x512xf32>
    %471 = vector.shape_cast %470 : vector<1x8x512xf32> to vector<8x512xf32>
    %472 = arith.truncf %464 : vector<8x128xf32> to vector<8x128xbf16>
    %c1_161 = arith.constant 1 : index
    %c0_162 = arith.constant 0 : index
    %c0_163 = arith.constant 0 : index
    %473 = vector.load %arg3[%c1_161, %c0_162, %c0_163] : memref<2x128x512xbf16, #tpu.memory_space<vmem>>, vector<1x128x512xbf16>
    %474 = vector.shape_cast %473 : vector<1x128x512xbf16> to vector<128x512xbf16>
    %cst_164 = arith.constant dense<0.000000e+00> : vector<8x512xf32>
    %475 = tpu.matmul %472, %474, %cst_164 {dimension_numbers = #tpu.dot_dimension_numbers<[1], [0], [0], [1], [0, 0, 1, 1], [], []>} : vector<8x128xbf16>, vector<128x512xbf16>, vector<8x512xf32> -> vector<8x512xf32>
    %476 = arith.addf %471, %475 : vector<8x512xf32>
    %477 = vector.extract_strided_slice %476 {offsets = [0, 0], sizes = [8, 128], strides = [1, 1]} : vector<8x512xf32> to vector<8x128xf32>
    %478 = arith.negf %477 : vector<8x128xf32>
    %479 = math.exp %478 : vector<8x128xf32>
    %cst_165 = arith.constant 1.000000e+00 : f32
    %480 = vector.broadcast %cst_165 : f32 to vector<8x128xf32>
    %481 = arith.addf %480, %479 : vector<8x128xf32>
    %482 = arith.divf %480, %481 : vector<8x128xf32>
    %483 = vector.extract_strided_slice %476 {offsets = [0, 128], sizes = [8, 128], strides = [1, 1]} : vector<8x512xf32> to vector<8x128xf32>
    %484 = arith.negf %483 : vector<8x128xf32>
    %485 = math.exp %484 : vector<8x128xf32>
    %cst_166 = arith.constant 1.000000e+00 : f32
    %486 = vector.broadcast %cst_166 : f32 to vector<8x128xf32>
    %487 = arith.addf %486, %485 : vector<8x128xf32>
    %488 = arith.divf %486, %487 : vector<8x128xf32>
    %489 = vector.extract_strided_slice %476 {offsets = [0, 256], sizes = [8, 128], strides = [1, 1]} : vector<8x512xf32> to vector<8x128xf32>
    %490 = math.tanh %489 : vector<8x128xf32>
    %491 = vector.extract_strided_slice %476 {offsets = [0, 384], sizes = [8, 128], strides = [1, 1]} : vector<8x512xf32> to vector<8x128xf32>
    %492 = arith.negf %491 : vector<8x128xf32>
    %493 = math.exp %492 : vector<8x128xf32>
    %cst_167 = arith.constant 1.000000e+00 : f32
    %494 = vector.broadcast %cst_167 : f32 to vector<8x128xf32>
    %495 = arith.addf %494, %493 : vector<8x128xf32>
    %496 = arith.divf %494, %495 : vector<8x128xf32>
    %497 = arith.mulf %488, %462 : vector<8x128xf32>
    %498 = arith.mulf %482, %490 : vector<8x128xf32>
    %499 = arith.addf %497, %498 : vector<8x128xf32>
    %500 = math.tanh %499 : vector<8x128xf32>
    %501 = arith.mulf %496, %500 : vector<8x128xf32>
    %502 = arith.index_cast %c5_i32_158 : i32 to index
    %c0_168 = arith.constant 0 : index
    %c0_169 = arith.constant 0 : index
    %503 = vector.load %arg5[%502, %c0_168, %c0_169] : memref<8x8x128xf32, #tpu.memory_space<vmem>>, vector<1x8x128xf32>
    %504 = vector.shape_cast %503 : vector<1x8x128xf32> to vector<8x128xf32>
    %505 = vector.shape_cast %501 : vector<8x128xf32> to vector<1x8x128xf32>
    tpu.vector_store %arg5[%502, %c0_168, %c0_169], %505 {strides = array<i32>} : memref<8x8x128xf32, #tpu.memory_space<vmem>>, vector<1x8x128xf32>,
    %c6_i32_170 = arith.constant 6 : i32
    %506 = arith.index_cast %c6_i32_170 : i32 to index
    %c0_171 = arith.constant 0 : index
    %c0_172 = arith.constant 0 : index
    %507 = vector.load %arg8[%506, %c0_171, %c0_172] : memref<8x8x512xf32, #tpu.memory_space<vmem>>, vector<1x8x512xf32>
    %508 = vector.shape_cast %507 : vector<1x8x512xf32> to vector<8x512xf32>
    %509 = arith.truncf %501 : vector<8x128xf32> to vector<8x128xbf16>
    %c1_173 = arith.constant 1 : index
    %c0_174 = arith.constant 0 : index
    %c0_175 = arith.constant 0 : index
    %510 = vector.load %arg3[%c1_173, %c0_174, %c0_175] : memref<2x128x512xbf16, #tpu.memory_space<vmem>>, vector<1x128x512xbf16>
    %511 = vector.shape_cast %510 : vector<1x128x512xbf16> to vector<128x512xbf16>
    %cst_176 = arith.constant dense<0.000000e+00> : vector<8x512xf32>
    %512 = tpu.matmul %509, %511, %cst_176 {dimension_numbers = #tpu.dot_dimension_numbers<[1], [0], [0], [1], [0, 0, 1, 1], [], []>} : vector<8x128xbf16>, vector<128x512xbf16>, vector<8x512xf32> -> vector<8x512xf32>
    %513 = arith.addf %508, %512 : vector<8x512xf32>
    %514 = vector.extract_strided_slice %513 {offsets = [0, 0], sizes = [8, 128], strides = [1, 1]} : vector<8x512xf32> to vector<8x128xf32>
    %515 = arith.negf %514 : vector<8x128xf32>
    %516 = math.exp %515 : vector<8x128xf32>
    %cst_177 = arith.constant 1.000000e+00 : f32
    %517 = vector.broadcast %cst_177 : f32 to vector<8x128xf32>
    %518 = arith.addf %517, %516 : vector<8x128xf32>
    %519 = arith.divf %517, %518 : vector<8x128xf32>
    %520 = vector.extract_strided_slice %513 {offsets = [0, 128], sizes = [8, 128], strides = [1, 1]} : vector<8x512xf32> to vector<8x128xf32>
    %521 = arith.negf %520 : vector<8x128xf32>
    %522 = math.exp %521 : vector<8x128xf32>
    %cst_178 = arith.constant 1.000000e+00 : f32
    %523 = vector.broadcast %cst_178 : f32 to vector<8x128xf32>
    %524 = arith.addf %523, %522 : vector<8x128xf32>
    %525 = arith.divf %523, %524 : vector<8x128xf32>
    %526 = vector.extract_strided_slice %513 {offsets = [0, 256], sizes = [8, 128], strides = [1, 1]} : vector<8x512xf32> to vector<8x128xf32>
    %527 = math.tanh %526 : vector<8x128xf32>
    %528 = vector.extract_strided_slice %513 {offsets = [0, 384], sizes = [8, 128], strides = [1, 1]} : vector<8x512xf32> to vector<8x128xf32>
    %529 = arith.negf %528 : vector<8x128xf32>
    %530 = math.exp %529 : vector<8x128xf32>
    %cst_179 = arith.constant 1.000000e+00 : f32
    %531 = vector.broadcast %cst_179 : f32 to vector<8x128xf32>
    %532 = arith.addf %531, %530 : vector<8x128xf32>
    %533 = arith.divf %531, %532 : vector<8x128xf32>
    %534 = arith.mulf %525, %499 : vector<8x128xf32>
    %535 = arith.mulf %519, %527 : vector<8x128xf32>
    %536 = arith.addf %534, %535 : vector<8x128xf32>
    %537 = math.tanh %536 : vector<8x128xf32>
    %538 = arith.mulf %533, %537 : vector<8x128xf32>
    %539 = arith.index_cast %c6_i32_170 : i32 to index
    %c0_180 = arith.constant 0 : index
    %c0_181 = arith.constant 0 : index
    %540 = vector.load %arg5[%539, %c0_180, %c0_181] : memref<8x8x128xf32, #tpu.memory_space<vmem>>, vector<1x8x128xf32>
    %541 = vector.shape_cast %540 : vector<1x8x128xf32> to vector<8x128xf32>
    %542 = vector.shape_cast %538 : vector<8x128xf32> to vector<1x8x128xf32>
    tpu.vector_store %arg5[%539, %c0_180, %c0_181], %542 {strides = array<i32>} : memref<8x8x128xf32, #tpu.memory_space<vmem>>, vector<1x8x128xf32>,
    %c7_i32_182 = arith.constant 7 : i32
    %543 = arith.index_cast %c7_i32_182 : i32 to index
    %c0_183 = arith.constant 0 : index
    %c0_184 = arith.constant 0 : index
    %544 = vector.load %arg8[%543, %c0_183, %c0_184] : memref<8x8x512xf32, #tpu.memory_space<vmem>>, vector<1x8x512xf32>
    %545 = vector.shape_cast %544 : vector<1x8x512xf32> to vector<8x512xf32>
    %546 = arith.truncf %538 : vector<8x128xf32> to vector<8x128xbf16>
    %c1_185 = arith.constant 1 : index
    %c0_186 = arith.constant 0 : index
    %c0_187 = arith.constant 0 : index
    %547 = vector.load %arg3[%c1_185, %c0_186, %c0_187] : memref<2x128x512xbf16, #tpu.memory_space<vmem>>, vector<1x128x512xbf16>
    %548 = vector.shape_cast %547 : vector<1x128x512xbf16> to vector<128x512xbf16>
    %cst_188 = arith.constant dense<0.000000e+00> : vector<8x512xf32>
    %549 = tpu.matmul %546, %548, %cst_188 {dimension_numbers = #tpu.dot_dimension_numbers<[1], [0], [0], [1], [0, 0, 1, 1], [], []>} : vector<8x128xbf16>, vector<128x512xbf16>, vector<8x512xf32> -> vector<8x512xf32>
    %550 = arith.addf %545, %549 : vector<8x512xf32>
    %551 = vector.extract_strided_slice %550 {offsets = [0, 0], sizes = [8, 128], strides = [1, 1]} : vector<8x512xf32> to vector<8x128xf32>
    %552 = arith.negf %551 : vector<8x128xf32>
    %553 = math.exp %552 : vector<8x128xf32>
    %cst_189 = arith.constant 1.000000e+00 : f32
    %554 = vector.broadcast %cst_189 : f32 to vector<8x128xf32>
    %555 = arith.addf %554, %553 : vector<8x128xf32>
    %556 = arith.divf %554, %555 : vector<8x128xf32>
    %557 = vector.extract_strided_slice %550 {offsets = [0, 128], sizes = [8, 128], strides = [1, 1]} : vector<8x512xf32> to vector<8x128xf32>
    %558 = arith.negf %557 : vector<8x128xf32>
    %559 = math.exp %558 : vector<8x128xf32>
    %cst_190 = arith.constant 1.000000e+00 : f32
    %560 = vector.broadcast %cst_190 : f32 to vector<8x128xf32>
    %561 = arith.addf %560, %559 : vector<8x128xf32>
    %562 = arith.divf %560, %561 : vector<8x128xf32>
    %563 = vector.extract_strided_slice %550 {offsets = [0, 256], sizes = [8, 128], strides = [1, 1]} : vector<8x512xf32> to vector<8x128xf32>
    %564 = math.tanh %563 : vector<8x128xf32>
    %565 = vector.extract_strided_slice %550 {offsets = [0, 384], sizes = [8, 128], strides = [1, 1]} : vector<8x512xf32> to vector<8x128xf32>
    %566 = arith.negf %565 : vector<8x128xf32>
    %567 = math.exp %566 : vector<8x128xf32>
    %cst_191 = arith.constant 1.000000e+00 : f32
    %568 = vector.broadcast %cst_191 : f32 to vector<8x128xf32>
    %569 = arith.addf %568, %567 : vector<8x128xf32>
    %570 = arith.divf %568, %569 : vector<8x128xf32>
    %571 = arith.mulf %562, %536 : vector<8x128xf32>
    %572 = arith.mulf %556, %564 : vector<8x128xf32>
    %573 = arith.addf %571, %572 : vector<8x128xf32>
    %574 = math.tanh %573 : vector<8x128xf32>
    %575 = arith.mulf %570, %574 : vector<8x128xf32>
    %576 = arith.index_cast %c7_i32_182 : i32 to index
    %c0_192 = arith.constant 0 : index
    %c0_193 = arith.constant 0 : index
    %577 = vector.load %arg5[%576, %c0_192, %c0_193] : memref<8x8x128xf32, #tpu.memory_space<vmem>>, vector<1x8x128xf32>
    %578 = vector.shape_cast %577 : vector<1x8x128xf32> to vector<8x128xf32>
    %579 = vector.shape_cast %575 : vector<8x128xf32> to vector<1x8x128xf32>
    tpu.vector_store %arg5[%576, %c0_192, %c0_193], %579 {strides = array<i32>} : memref<8x8x128xf32, #tpu.memory_space<vmem>>, vector<1x8x128xf32>,
    %c7_i32_194 = arith.constant 7 : i32
    %c1_195 = arith.constant 1 : index
    %c0_196 = arith.constant 0 : index
    %c0_197 = arith.constant 0 : index
    %580 = vector.load %arg6[%c1_195, %c0_196, %c0_197] : memref<2x8x128xf32, #tpu.memory_space<vmem>>, vector<1x8x128xf32>
    %581 = vector.shape_cast %580 : vector<1x8x128xf32> to vector<8x128xf32>
    %582 = vector.shape_cast %575 : vector<8x128xf32> to vector<1x8x128xf32>
    tpu.vector_store %arg6[%c1_195, %c0_196, %c0_197], %582 {strides = array<i32>} : memref<2x8x128xf32, #tpu.memory_space<vmem>>, vector<1x8x128xf32>,
    %c1_198 = arith.constant 1 : index
    %c0_199 = arith.constant 0 : index
    %c0_200 = arith.constant 0 : index
    %583 = vector.load %arg7[%c1_198, %c0_199, %c0_200] : memref<2x8x128xf32, #tpu.memory_space<vmem>>, vector<1x8x128xf32>
    %584 = vector.shape_cast %583 : vector<1x8x128xf32> to vector<8x128xf32>
    %585 = vector.shape_cast %573 : vector<8x128xf32> to vector<1x8x128xf32>
    tpu.vector_store %arg7[%c1_198, %c0_199, %c0_200], %585 {strides = array<i32>} : memref<2x8x128xf32, #tpu.memory_space<vmem>>, vector<1x8x128xf32>,
    return
  }
  func.func @transform_0(%arg0: i32) -> (i32, i32, i32) {
    %c0_i32 = arith.constant 0 : i32
    %c0_i32_0 = arith.constant 0 : i32
    %c0_i32_1 = arith.constant 0 : i32
    %c0_i32_2 = arith.constant 0 : i32
    return %c0_i32, %c0_i32_0, %c0_i32_1 : i32, i32, i32
  }
  func.func @transform_1(%arg0: i32) -> (i32, i32, i32) {
    %c0_i32 = arith.constant 0 : i32
    %c0_i32_0 = arith.constant 0 : i32
    %c0_i32_1 = arith.constant 0 : i32
    %c0_i32_2 = arith.constant 0 : i32
    return %c0_i32, %c0_i32_0, %c0_i32_1 : i32, i32, i32
  }
  func.func @transform_2(%arg0: i32) -> (i32, i32, i32) {
    %c0_i32 = arith.constant 0 : i32
    %c0_i32_0 = arith.constant 0 : i32
    %c0_i32_1 = arith.constant 0 : i32
    %c0_i32_2 = arith.constant 0 : i32
    return %c0_i32, %c0_i32_0, %c0_i32_1 : i32, i32, i32
  }
  func.func @transform_3(%arg0: i32) -> (i32, i32, i32) {
    %c0_i32 = arith.constant 0 : i32
    %c0_i32_0 = arith.constant 0 : i32
    %c0_i32_1 = arith.constant 0 : i32
    %c0_i32_2 = arith.constant 0 : i32
    return %c0_i32, %c0_i32_0, %c0_i32_1 : i32, i32, i32
  }
  func.func @transform_4(%arg0: i32) -> (i32, i32, i32) {
    %c0_i32 = arith.constant 0 : i32
    %c0_i32_0 = arith.constant 0 : i32
    %c0_i32_1 = arith.constant 0 : i32
    %c0_i32_2 = arith.constant 0 : i32
    return %c0_i32, %c0_i32_0, %c0_i32_1 : i32, i32, i32
  }
  func.func @transform_5(%arg0: i32) -> (i32, i32, i32) {
    %c0_i32 = arith.constant 0 : i32
    %c0_i32_0 = arith.constant 0 : i32
    %c0_i32_1 = arith.constant 0 : i32
    %c0_i32_2 = arith.constant 0 : i32
    return %c0_i32, %c0_i32_0, %c0_i32_1 : i32, i32, i32
  }
  func.func @transform_6(%arg0: i32) -> (i32, i32, i32) {
    %c0_i32 = arith.constant 0 : i32
    %c0_i32_0 = arith.constant 0 : i32
    %c0_i32_1 = arith.constant 0 : i32
    %c0_i32_2 = arith.constant 0 : i32
    return %c0_i32, %c0_i32_0, %c0_i32_1 : i32, i32, i32
  }
}

</mosaic_0001>

<bundles_post_ra>
// kernel: tpu_custom_call.1
= control target key start
LH: loop header
LB: loop body
LE: loop exit
PB: predicated region body
PF: predicated region fallthrough
CT: control target
= control target key end

     0   :  { %12 = vsyncpa [#allocation4], 0  ;;  %s7158_s0 = inlined_call_operand.hbm [shape: f32[8,8,512], index: 0, kind: input, shape index: {}]   ;;  %s7159_s1 = inlined_call_operand.hbm [shape: bf16[1,128,512], index: 1, kind: input, shape index: {}]   ;;  %s7160_s2 = inlined_call_operand.hbm [shape: bf16[2,128,512], index: 2, kind: input, shape index: {}]   ;;  %s7161_s3 = inlined_call_operand.vmem [shape: f32[1,1,512], index: 3, kind: input, shape index: {}]   ;;  %s7162_s4 = inlined_call_operand.hbm [shape: f32[8,8,128], index: 4, kind: output, shape index: {0}]   ;;  %s7163_s5 = inlined_call_operand.hbm [shape: f32[2,8,128], index: 5, kind: output, shape index: {1}]   ;;  %s7164_s6 = inlined_call_operand.hbm [shape: f32[2,8,128], index: 6, kind: output, shape index: {2}]  }
   0x1   :  { %13 = vsyncpa [#allocation7], 0 }
   0x2   :  { %14 = vsyncpa [#allocation5], 0 }
   0x3   :  { %15 = vsyncpa [#allocation11], 0  ;;  %s6064_s21 = smov [#allocation6]   ;;  %s5924_s25 = scalar_lea.hbm %s7159_s1, 4096 }
   0x4   :  { %s33_s22 = sshll.u32 %s6064_s21, 4  ;;  %p5925_p0 = scmp.ne.s32.totalorder %s7159_s1, %s5924_s25  ;;  %s34_s22 = int_to_ptr.vmem [resolvable:$true] %s33_s22 }
   0x5   :  { %p5928_p1 = scmp.lt.u32.totalorder %s5924_s25, %s7159_s1 }
   0x7   :  { %p5930_p2 = pnand %p5928_p1, %p5925_p0 }
   0x9   :  { %5933 = shalt.err (!%p5930_p2)
}
   0xa   :  { %s5934_s30 = scalar_lea.vmem %s34_s22, 4096  ;;  %p5939_p4 = scmp.lt.s32.totalorder %s34_s22, %s34_s22 }
   0xb   :  { %p5935_p3 = scmp.ne.s32.totalorder %s34_s22, %s5934_s30  ;;  %p5940_p5 = scmp.lt.s32.totalorder %s5934_s30, %s5934_s30 }
   0xd   :  { %p5941_p6 = por %p5940_p5, %p5939_p4 }
   0xf   :  { %p5942_p7 = pnand %p5941_p6, %p5935_p3 }
  0x11   :  { %5945 = shalt.err (!%p5942_p7)
}
  0x12   :  { %s6065_s7 = smov 256   ;;  %s6066_s8 = smov 16  }
  0x13   :  { %39 = dma.hbm_to_vmem [thread:$0]  %s7159_s1, 4096, %s34_s22, [#allocation7], %s6065_s7, %s6065_s7, %s6066_s8  }
  0x14   :  { %s6067_s11 = smov [#allocation3]   ;;  %s5946_s15 = scalar_lea.hbm %s7158_s0, 4096 }
  0x15   :  { %s21_s12 = sshll.u32 %s6067_s11, 4  ;;  %p5947_p8 = scmp.ne.s32.totalorder %s7158_s0, %s5946_s15  ;;  %s22_s12 = int_to_ptr.vmem [resolvable:$true] %s21_s12 }
  0x16   :  { %p5950_p9 = scmp.lt.u32.totalorder %s5946_s15, %s7158_s0 }
  0x18   :  { %p5952_p10 = pnand %p5950_p9, %p5947_p8 }
  0x1a   :  { %5955 = shalt.err (!%p5952_p10)
}
  0x1b   :  { %s5956_s20 = scalar_lea.vmem %s22_s12, 4096  ;;  %p5961_p12 = scmp.lt.s32.totalorder %s22_s12, %s22_s12 }
  0x1c   :  { %p5957_p11 = scmp.ne.s32.totalorder %s22_s12, %s5956_s20  ;;  %p5962_p13 = scmp.lt.s32.totalorder %s5956_s20, %s5956_s20 }
  0x1e   :  { %p5963_p0 = por %p5962_p13, %p5961_p12 }
  0x20   :  { %p5964_p1 = pnand %p5963_p0, %p5957_p11 }
  0x22   :  { %5967 = shalt.err (!%p5964_p1)
}
  0x23   :  { %s6068_s1 = smov 512   ;;  %s6069_s21 = smov 32  }
  0x24   :  { %27 = dma.hbm_to_vmem [thread:$0]  %s7158_s0, 4096, %s22_s12, [#allocation4], %s6068_s1, %s6068_s1, %s6069_s21  }
  0x25   :  { %s6070_s24 = smov [#allocation8]   ;;  %s5968_s28 = scalar_lea.hbm %s7160_s2, 8192 }
  0x26   :  { %s45_s25 = sshll.u32 %s6070_s24, 4  ;;  %p5969_p2 = scmp.ne.s32.totalorder %s7160_s2, %s5968_s28  ;;  %s46_s25 = int_to_ptr.vmem [resolvable:$true] %s45_s25 }
  0x27   :  { %p5972_p3 = scmp.lt.u32.totalorder %s5968_s28, %s7160_s2 }
  0x29   :  { %p5974_p4 = pnand %p5972_p3, %p5969_p2 }
  0x2b   :  { %5977 = shalt.err (!%p5974_p4)
}
  0x2c   :  { %s5978_s11 = scalar_lea.vmem %s46_s25, 8192  ;;  %p5983_p6 = scmp.lt.s32.totalorder %s46_s25, %s46_s25 }
  0x2d   :  { %p5979_p5 = scmp.ne.s32.totalorder %s46_s25, %s5978_s11  ;;  %p5984_p7 = scmp.lt.s32.totalorder %s5978_s11, %s5978_s11 }
  0x2f   :  { %p5985_p8 = por %p5984_p7, %p5983_p6 }
  0x31   :  { %p5986_p9 = pnand %p5985_p8, %p5979_p5 }
  0x33   :  { %5989 = shalt.err (!%p5986_p9)
}
  0x34   :  { %51 = dma.hbm_to_vmem [thread:$0]  %s7160_s2, 8192, %s46_s25, [#allocation7], %s6065_s7, %s6065_s7, %s6066_s8  }
  0x35   :  { %6056 = dma.done.wait [#allocation4], 4096  }
  0x36   :  { %6057 = vsyncadd [#allocation4], 4294963200 }
  0x37   :  { %6058 = dma.done.wait [#allocation7], 12288  }
  0x38   :  { %6059 = vsyncadd [#allocation7], 4294955008  ;;  %v7165_v0 = vmov 0   ;;  %v6156_v1 = vld [vmem:[#allocation8 + $0x4] ss:$16 sps:$4 sm:$0xff]   ;;  %v66_v26 = vld [vmem:[#allocation3 + $0x18] sm:$0xff] }
  0x39   :  { %314 = vmatprep.mubr.bf16.mxu0 %v7165_v0  ;;  %355 = vmatprep.mubr.bf16.mxu1 %v7165_v0  ;;  %v6158_v2 = vld [vmem:[#allocation8] ss:$16 sps:$4 sm:$0xff]   ;;  %v6161_v3 = vld [vmem:[#allocation8 + $0x24] ss:$16 sps:$4 sm:$0xff]   ;;  %v6169_v6 = vld [vmem:[#allocation8 + $0xc] ss:$16 sps:$4 sm:$0xff]  }
  0x3a   :  { %282 = vmatprep.subr.bf16.mxu0 %v6156_v1  ;;  %v6164_v4 = vld [vmem:[#allocation8 + $0x20] ss:$16 sps:$4 sm:$0xff]   ;;  %v6167_v5 = vld [vmem:[#allocation8 + $0x44] ss:$16 sps:$4 sm:$0xff]   ;;  %v6171_v7 = vld [vmem:[#allocation8 + $0x8] ss:$16 sps:$4 sm:$0xff]   ;;  %323 = vmatprep.subr.bf16.mxu1 %v6169_v6 }
  0x3b   :  { %283 = vmatpush1.bf16.msra.mxu0 %v6158_v2  ;;  %v6174_v8 = vld [vmem:[#allocation8 + $0x40] ss:$16 sps:$4 sm:$0xff]   ;;  %v6178_v9 = vld [vmem:[#allocation8 + $0x64] ss:$16 sps:$4 sm:$0xff]   ;;  %324 = vmatpush1.bf16.msra.mxu1 %v6171_v7  ;;  %v6181_v10 = vld [vmem:[#allocation8 + $0x2c] ss:$16 sps:$4 sm:$0xff]  }
  0x3c   :  { %284 = vmatprep.subr.bf16.mxu0 %v6161_v3  ;;  %v6183_v11 = vld [vmem:[#allocation8 + $0x28] ss:$16 sps:$4 sm:$0xff]   ;;  %325 = vmatprep.subr.bf16.mxu1 %v6181_v10  ;;  %v6187_v12 = vld [vmem:[#allocation8 + $0x60] ss:$16 sps:$4 sm:$0xff]   ;;  %v6189_v13 = vld [vmem:[#allocation8 + $0x84] ss:$16 sps:$4 sm:$0xff]  }
  0x3d   :  { %v6191_v14 = vld [vmem:[#allocation8 + $0x4c] ss:$16 sps:$4 sm:$0xff]   ;;  %v6195_v15 = vld [vmem:[#allocation8 + $0x48] ss:$16 sps:$4 sm:$0xff]   ;;  %v6201_v17 = vld [vmem:[#allocation8 + $0x80] ss:$16 sps:$4 sm:$0xff]  }
  0x3e   :  { %v6198_v16 = vld [vmem:[#allocation8 + $0x6c] ss:$16 sps:$4 sm:$0xff]   ;;  %v6204_v18 = vld [vmem:[#allocation8 + $0xa4] ss:$16 sps:$4 sm:$0xff]   ;;  %v6207_v19 = vld [vmem:[#allocation8 + $0x68] ss:$16 sps:$4 sm:$0xff]  }
  0x3f   :  { %285 = vmatpush1.bf16.msra.mxu0 %v6164_v4  ;;  %326 = vmatpush1.bf16.msra.mxu1 %v6183_v11  ;;  %v6210_v20 = vld [vmem:[#allocation8 + $0x8c] ss:$16 sps:$4 sm:$0xff]   ;;  %v64_v21 = vld [vmem:[#allocation3] sm:$0xff]  ;;  %v6217_v25 = vld [vmem:[#allocation8 + $0x88] ss:$16 sps:$4 sm:$0xff]   ;;  %s6073_s13 = smov [#allocation9]  }
  0x40   :  { %286 = vmatprep.subr.bf16.mxu0 %v6167_v5  ;;  %327 = vmatprep.subr.bf16.mxu1 %v6191_v14  ;;  %v4897_v22 = vmul.f32 -1.442695, %v64_v21  ;;  %v6213_v23 = vld [vmem:[#allocation8 + $0xa0] ss:$16 sps:$4 sm:$0xff]   ;;  %v6215_v24 = vld [vmem:[#allocation8 + $0xc4] ss:$16 sps:$4 sm:$0xff]  }
  0x41   :  { %v6222_v27 = vld [vmem:[#allocation8 + $0xac] ss:$16 sps:$4 sm:$0xff]   ;;  %v6224_v28 = vld [vmem:[#allocation8 + $0xc0] ss:$16 sps:$4 sm:$0xff]   ;;  %v6226_v29 = vld [vmem:[#allocation8 + $0xe4] ss:$16 sps:$4 sm:$0xff]  }
  0x42   :  { %5676 = vpow2.f32 %v4897_v22  ;;  %v6228_v30 = vld [vmem:[#allocation8 + $0xa8] ss:$16 sps:$4 sm:$0xff]   ;;  %v4898_v31 = vmul.f32 -1.442695, %v66_v26  ;;  %v6231_v32 = vld [vmem:[#allocation8 + $0xcc] ss:$16 sps:$4 sm:$0xff]  }
  0x43   :  { %287 = vmatpush1.bf16.msra.mxu0 %v6174_v8  ;;  %328 = vmatpush1.bf16.msra.mxu1 %v6195_v15  ;;  %v6235_v33 = vld [vmem:[#allocation8 + $0xe0] ss:$16 sps:$4 sm:$0xff]   ;;  %v6238_v35 = vld [vmem:[#allocation8 + $0xc8] ss:$16 sps:$4 sm:$0xff]   ;;  %v6241_v36 = vld [vmem:[#allocation8 + $0xec] ss:$16 sps:$4 sm:$0xff]  }
  0x44   :  { %288 = vmatprep.subr.bf16.mxu0 %v6178_v9  ;;  %329 = vmatprep.subr.bf16.mxu1 %v6198_v16  ;;  %v65_v34 = vld [vmem:[#allocation3 + $0x10] sm:$0xff]  ;;  %5678 = vpow2.f32 %v4898_v31  ;;  %v6246_v38 = vld [vmem:[#allocation8 + $0xe8] ss:$16 sps:$4 sm:$0xff]   ;;  %v85_v49 = vld [vmem:[#allocation3 + $0x20] sm:$0xff]  ;;  %s4853_s14 = sshll.u32 %s6073_s13, 4  ;;  %s6074_s15 = smov [#allocation12]   ;;  %s7099_s14 = int_to_ptr.vmem [resolvable:$true] %s4853_s14 }
  0x45   :  { %5680 = vtanh.f32 %v65_v34  ;;  %v86_v50 = vld [vmem:[#allocation3 + $0x28] sm:$0xff]  ;;  %v88_v63 = vld [vmem:[#allocation3 + $0x38] sm:$0xff]  ;;  %v87_v22 = vld [vmem:[#allocation3 + $0x30] sm:$0xff]  ;;  %s4877_s16 = sshll.u32 %s6074_s15, 4  ;;  %s7101_s16 = int_to_ptr.vmem [resolvable:$true] %s4877_s16 }
  0x47   :  { %289 = vmatpush1.bf16.msra.mxu0 %v6187_v12  ;;  %330 = vmatpush1.bf16.msra.mxu1 %v6207_v19 }
  0x48   :  { %290 = vmatprep.subr.bf16.mxu0 %v6189_v13  ;;  %331 = vmatprep.subr.bf16.mxu1 %v6210_v20 }
  0x4b   :  { %291 = vmatpush1.bf16.msra.mxu0 %v6201_v17  ;;  %332 = vmatpush1.bf16.msra.mxu1 %v6217_v25 }
  0x4c   :  { %292 = vmatprep.subr.bf16.mxu0 %v6204_v18  ;;  %333 = vmatprep.subr.bf16.mxu1 %v6222_v27  ;;  %v5677_v37 = vpop.eup %5676 }
  0x4d   :  { %v70_v39 = vadd.f32 1.0, %v5677_v37 }
  0x4e   :  { %v5679_v40 = vpop.eup %5678 }
  0x4f   :  { %293 = vmatpush1.bf16.msra.mxu0 %v6213_v23  ;;  %334 = vmatpush1.bf16.msra.mxu1 %v6228_v30  ;;  %5682 = vrcp.f32 %v70_v39  ;;  %v77_v41 = vadd.f32 1.0, %v5679_v40  ;;  %v5681_v42 = vpop.eup %5680 }
  0x50   :  { %294 = vmatprep.subr.bf16.mxu0 %v6215_v24  ;;  %335 = vmatprep.subr.bf16.mxu1 %v6231_v32 }
  0x51   :  { %5684 = vrcp.f32 %v77_v41 }
  0x53   :  { %295 = vmatpush1.bf16.msra.mxu0 %v6224_v28  ;;  %336 = vmatpush1.bf16.msra.mxu1 %v6238_v35 }
  0x54   :  { %296 = vmatprep.subr.bf16.mxu0 %v6226_v29  ;;  %337 = vmatprep.subr.bf16.mxu1 %v6241_v36 }
  0x57   :  { %297 = vmatpush1.bf16.msra.mxu0 %v6235_v33  ;;  %338 = vmatpush1.bf16.msra.mxu1 %v6246_v38 }
  0x58   :  { %592 = vmatprep.subr.bf16.mxu0 %v6156_v1  ;;  %633 = vmatprep.subr.bf16.mxu1 %v6169_v6 }
  0x59   :  { %v5683_v43 = vpop.eup %5682 }
  0x5a   :  { %v6254_v44 = vmul.f32 %v5683_v43, %v5681_v42 }
  0x5b   :  { %v5685_v45 = vpop.eup %5684 }
  0x5c   :  { %5686 = vtanh.f32 %v6254_v44 }
  0x66   :  { %v5687_v46 = vpop.eup %5686 }
  0x67   :  { %v82_v47 = vmul.f32 %v5687_v46, %v5685_v45 }
  0x69   :  { %83 = vst [vmem:[#allocation9] sm:$0xff] %v82_v47  ;;  %v89_v48 = vpack.c.bf16 %v82_v47, %v82_v47 }
  0x6b   :  { %315 = vmatmul.mubr.bf16.vlgmr.msra.gmra.mrb[0].mxu0 %v89_v48  ;;  %356 = vmatmul.mubr.bf16.vlgmr.msra.gmra.mrb[0].mxu1 %v89_v48 }
  0x6c   :  { %593 = vmatpush1.bf16.msra.mxu0 %v6158_v2  ;;  %634 = vmatpush1.bf16.msra.mxu1 %v6171_v7 }
  0x6d   :  { %594 = vmatprep.subr.bf16.mxu0 %v6161_v3  ;;  %635 = vmatprep.subr.bf16.mxu1 %v6181_v10 }
  0x6e   :  { %624 = vmatprep.mubr.bf16.mxu0 %v7165_v0  ;;  %665 = vmatprep.mubr.bf16.mxu1 %v7165_v0 }
  0x70   :  { %595 = vmatpush1.bf16.msra.mxu0 %v6164_v4  ;;  %636 = vmatpush1.bf16.msra.mxu1 %v6183_v11 }
  0x71   :  { %596 = vmatprep.subr.bf16.mxu0 %v6167_v5  ;;  %637 = vmatprep.subr.bf16.mxu1 %v6191_v14 }
  0x74   :  { %597 = vmatpush1.bf16.msra.mxu0 %v6174_v8  ;;  %638 = vmatpush1.bf16.msra.mxu1 %v6195_v15 }
  0x75   :  { %598 = vmatprep.subr.bf16.mxu0 %v6178_v9  ;;  %639 = vmatprep.subr.bf16.mxu1 %v6198_v16 }
  0x78   :  { %599 = vmatpush1.bf16.msra.mxu0 %v6187_v12  ;;  %640 = vmatpush1.bf16.msra.mxu1 %v6207_v19 }
  0x79   :  { %600 = vmatprep.subr.bf16.mxu0 %v6189_v13  ;;  %641 = vmatprep.subr.bf16.mxu1 %v6210_v20 }
  0x7c   :  { %601 = vmatpush1.bf16.msra.mxu0 %v6201_v17  ;;  %642 = vmatpush1.bf16.msra.mxu1 %v6217_v25 }
  0x7d   :  { %602 = vmatprep.subr.bf16.mxu0 %v6204_v18  ;;  %643 = vmatprep.subr.bf16.mxu1 %v6222_v27 }
  0x80   :  { %603 = vmatpush1.bf16.msra.mxu0 %v6213_v23  ;;  %644 = vmatpush1.bf16.msra.mxu1 %v6228_v30 }
  0x81   :  { %604 = vmatprep.subr.bf16.mxu0 %v6215_v24  ;;  %645 = vmatprep.subr.bf16.mxu1 %v6231_v32 }
  0x84   :  { %605 = vmatpush1.bf16.msra.mxu0 %v6224_v28  ;;  %646 = vmatpush1.bf16.msra.mxu1 %v6238_v35 }
  0x85   :  { %606 = vmatprep.subr.bf16.mxu0 %v6226_v29  ;;  %647 = vmatprep.subr.bf16.mxu1 %v6241_v36 }
  0x88   :  { %607 = vmatpush1.bf16.msra.mxu0 %v6235_v33  ;;  %648 = vmatpush1.bf16.msra.mxu1 %v6246_v38 }
  0x89   :  { %902 = vmatprep.subr.bf16.mxu0 %v6156_v1  ;;  %943 = vmatprep.subr.bf16.mxu1 %v6169_v6 }
 0x13e   :  { %v316_v51 = vpop.f32.mrb[0].mxu0  ;;  %v357_v52 = vpop.f32.mrb[0].mxu1 }
 0x13f   :  { %v364_v53 = vadd.f32 %v316_v51, %v85_v49  ;;  %v318_v54 = vpop.f32.mrb[1].mxu0  ;;  %v359_v55 = vpop.f32.mrb[1].mxu1  ;;  %v366_v31 = vadd.f32 %v357_v52, %v87_v22 }
 0x140   :  { %v365_v56 = vadd.f32 %v318_v54, %v86_v50  ;;  %v320_v57 = vpop.f32.mrb[2].mxu0  ;;  %v361_v58 = vpop.f32.mrb[2].mxu1  ;;  %v367_v21 = vadd.f32 %v359_v55, %v88_v63  ;;  %v396_v54 = vld [vmem:[#allocation3 + $0x48] sm:$0xff] }
 0x141   :  { %v4931_v59 = vmul.f32 -1.442695, %v364_v53  ;;  %v321_v60 = vpop.f32.mrb[3].mxu0  ;;  %v362_v61 = vpop.f32.mrb[3].mxu1 }
 0x142   :  { %v4932_v62 = vmul.f32 -1.442695, %v365_v56  ;;  %v4933_v26 = vmul.f32 -1.442695, %v367_v21 }
 0x143   :  { %5688 = vpow2.f32 %v4931_v59 }
 0x144   :  { %5690 = vpow2.f32 %v4932_v62 }
 0x145   :  { %5692 = vpow2.f32 %v4933_v26 }
 0x146   :  { %5694 = vtanh.f32 %v366_v31  ;;  %v398_v31 = vld [vmem:[#allocation3 + $0x58] sm:$0xff] }
 0x14d   :  { %v5689_v34 = vpop.eup %5688 }
 0x14e   :  { %v5691_v37 = vpop.eup %5690  ;;  %v371_v39 = vadd.f32 1.0, %v5689_v34  ;;  %v397_v34 = vld [vmem:[#allocation3 + $0x50] sm:$0xff] }
 0x14f   :  { %v377_v40 = vadd.f32 1.0, %v5691_v37  ;;  %v5693_v41 = vpop.eup %5692 }
 0x150   :  { %5696 = vrcp.f32 %v371_v39  ;;  %v5695_v42 = vpop.eup %5694  ;;  %v384_v45 = vadd.f32 1.0, %v5693_v41 }
 0x151   :  { %5698 = vrcp.f32 %v377_v40 }
 0x152   :  { %5700 = vrcp.f32 %v384_v45 }
 0x15a   :  { %v5697_v43 = vpop.eup %5696 }
 0x15b   :  { %v5699_v46 = vpop.eup %5698  ;;  %v388_v47 = vmul.f32 %v5697_v43, %v5695_v42 }
 0x15c   :  { %v387_v48 = vmul.f32 %v5699_v46, %v6254_v44  ;;  %v5701_v50 = vpop.eup %5700  ;;  %v395_v44 = vld [vmem:[#allocation3 + $0x40] sm:$0xff] }
 0x15e   :  { %v6292_v49 = vadd.f32 %v388_v47, %v387_v48 }
 0x160   :  { %5702 = vtanh.f32 %v6292_v49 }
 0x16a   :  { %v5703_v51 = vpop.eup %5702 }
 0x16b   :  { %v391_v52 = vmul.f32 %v5703_v51, %v5701_v50 }
 0x16d   :  { %393 = vst [vmem:[#allocation9 + $0x8] sm:$0xff] %v391_v52  ;;  %v399_v53 = vpack.c.bf16 %v391_v52, %v391_v52 }
 0x16f   :  { %625 = vmatmul.mubr.bf16.vlgmr.msra.gmra.mrb[4].mxu0 %v399_v53  ;;  %666 = vmatmul.mubr.bf16.vlgmr.msra.gmra.mrb[4].mxu1 %v399_v53 }
 0x170   :  { %903 = vmatpush1.bf16.msra.mxu0 %v6158_v2  ;;  %944 = vmatpush1.bf16.msra.mxu1 %v6171_v7 }
 0x171   :  { %904 = vmatprep.subr.bf16.mxu0 %v6161_v3  ;;  %945 = vmatprep.subr.bf16.mxu1 %v6181_v10 }
 0x172   :  { %934 = vmatprep.mubr.bf16.mxu0 %v7165_v0  ;;  %975 = vmatprep.mubr.bf16.mxu1 %v7165_v0 }
 0x174   :  { %905 = vmatpush1.bf16.msra.mxu0 %v6164_v4  ;;  %946 = vmatpush1.bf16.msra.mxu1 %v6183_v11 }
 0x175   :  { %906 = vmatprep.subr.bf16.mxu0 %v6167_v5  ;;  %947 = vmatprep.subr.bf16.mxu1 %v6191_v14 }
 0x178   :  { %907 = vmatpush1.bf16.msra.mxu0 %v6174_v8  ;;  %948 = vmatpush1.bf16.msra.mxu1 %v6195_v15 }
 0x179   :  { %908 = vmatprep.subr.bf16.mxu0 %v6178_v9  ;;  %949 = vmatprep.subr.bf16.mxu1 %v6198_v16 }
 0x17c   :  { %909 = vmatpush1.bf16.msra.mxu0 %v6187_v12  ;;  %950 = vmatpush1.bf16.msra.mxu1 %v6207_v19 }
 0x17d   :  { %910 = vmatprep.subr.bf16.mxu0 %v6189_v13  ;;  %951 = vmatprep.subr.bf16.mxu1 %v6210_v20 }
 0x180   :  { %911 = vmatpush1.bf16.msra.mxu0 %v6201_v17  ;;  %952 = vmatpush1.bf16.msra.mxu1 %v6217_v25 }
 0x181   :  { %912 = vmatprep.subr.bf16.mxu0 %v6204_v18  ;;  %953 = vmatprep.subr.bf16.mxu1 %v6222_v27 }
 0x184   :  { %913 = vmatpush1.bf16.msra.mxu0 %v6213_v23  ;;  %954 = vmatpush1.bf16.msra.mxu1 %v6228_v30 }
 0x185   :  { %914 = vmatprep.subr.bf16.mxu0 %v6215_v24  ;;  %955 = vmatprep.subr.bf16.mxu1 %v6231_v32 }
 0x188   :  { %915 = vmatpush1.bf16.msra.mxu0 %v6224_v28  ;;  %956 = vmatpush1.bf16.msra.mxu1 %v6238_v35 }
 0x189   :  { %916 = vmatprep.subr.bf16.mxu0 %v6226_v29  ;;  %957 = vmatprep.subr.bf16.mxu1 %v6241_v36 }
 0x18c   :  { %917 = vmatpush1.bf16.msra.mxu0 %v6235_v33  ;;  %958 = vmatpush1.bf16.msra.mxu1 %v6246_v38 }
 0x18d   :  { %1212 = vmatprep.subr.bf16.mxu0 %v6156_v1  ;;  %1253 = vmatprep.subr.bf16.mxu1 %v6169_v6 }
 0x242   :  { %v626_v55 = vpop.f32.mrb[4].mxu0  ;;  %v667_v56 = vpop.f32.mrb[4].mxu1 }
 0x243   :  { %v674_v57 = vadd.f32 %v626_v55, %v395_v44  ;;  %v628_v58 = vpop.f32.mrb[5].mxu0  ;;  %v669_v59 = vpop.f32.mrb[5].mxu1  ;;  %v676_v37 = vadd.f32 %v667_v56, %v397_v34  ;;  %v6397_v34 = vld [vmem:[#allocation8 + $0x4c] ss:$16 sps:$4 sm:$0xff]  }
 0x244   :  { %v675_v60 = vadd.f32 %v628_v58, %v396_v54  ;;  %v630_v61 = vpop.f32.mrb[6].mxu0  ;;  %v671_v62 = vpop.f32.mrb[6].mxu1  ;;  %v677_v1 = vadd.f32 %v669_v59, %v398_v31  ;;  %v6389_v31 = vld [vmem:[#allocation8 + $0x28] ss:$16 sps:$4 sm:$0xff]  }
 0x245   :  { %v4966_v63 = vmul.f32 -1.442695, %v674_v57  ;;  %v631_v21 = vpop.f32.mrb[7].mxu0  ;;  %v672_v22 = vpop.f32.mrb[7].mxu1  ;;  %v6373_v61 = vld [vmem:[#allocation8 + $0xc] ss:$16 sps:$4 sm:$0xff]  }
 0x246   :  { %v4967_v26 = vmul.f32 -1.442695, %v675_v60  ;;  %v4968_v6 = vmul.f32 -1.442695, %v677_v1  ;;  %v6371_v60 = vld [vmem:[#allocation8 + $0x4] ss:$16 sps:$4 sm:$0xff]  }
 0x247   :  { %5704 = vpow2.f32 %v4966_v63  ;;  %v6375_v62 = vld [vmem:[#allocation8] ss:$16 sps:$4 sm:$0xff]   ;;  %v6377_v63 = vld [vmem:[#allocation8 + $0x8] ss:$16 sps:$4 sm:$0xff]   ;;  %v6383_v21 = vld [vmem:[#allocation8 + $0x24] ss:$16 sps:$4 sm:$0xff]  }
 0x248   :  { %5706 = vpow2.f32 %v4967_v26  ;;  %v6385_v22 = vld [vmem:[#allocation8 + $0x2c] ss:$16 sps:$4 sm:$0xff]   ;;  %v6387_v26 = vld [vmem:[#allocation8 + $0x20] ss:$16 sps:$4 sm:$0xff]   ;;  %v6395_v1 = vld [vmem:[#allocation8 + $0x44] ss:$16 sps:$4 sm:$0xff]  }
 0x249   :  { %5708 = vpow2.f32 %v4968_v6  ;;  %v6399_v6 = vld [vmem:[#allocation8 + $0x40] ss:$16 sps:$4 sm:$0xff]  }
 0x24a   :  { %5710 = vtanh.f32 %v676_v37  ;;  %v6401_v37 = vld [vmem:[#allocation8 + $0x48] ss:$16 sps:$4 sm:$0xff]  }
 0x251   :  { %v5705_v39 = vpop.eup %5704 }
 0x252   :  { %v5707_v40 = vpop.eup %5706  ;;  %v681_v41 = vadd.f32 1.0, %v5705_v39  ;;  %v6407_v39 = vld [vmem:[#allocation8 + $0x64] ss:$16 sps:$4 sm:$0xff]  }
 0x253   :  { %v687_v42 = vadd.f32 1.0, %v5707_v40  ;;  %v5709_v43 = vpop.eup %5708  ;;  %v6409_v40 = vld [vmem:[#allocation8 + $0x6c] ss:$16 sps:$4 sm:$0xff]  }
 0x254   :  { %5712 = vrcp.f32 %v681_v41  ;;  %v5711_v45 = vpop.eup %5710  ;;  %v694_v50 = vadd.f32 1.0, %v5709_v43  ;;  %v6411_v41 = vld [vmem:[#allocation8 + $0x60] ss:$16 sps:$4 sm:$0xff]   ;;  %v6419_v43 = vld [vmem:[#allocation8 + $0x84] ss:$16 sps:$4 sm:$0xff]  }
 0x255   :  { %5714 = vrcp.f32 %v687_v42  ;;  %v6413_v42 = vld [vmem:[#allocation8 + $0x68] ss:$16 sps:$4 sm:$0xff]  }
 0x256   :  { %5716 = vrcp.f32 %v694_v50  ;;  %v6433_v50 = vld [vmem:[#allocation8 + $0xa0] ss:$16 sps:$4 sm:$0xff]  }
 0x25e   :  { %v5713_v46 = vpop.eup %5712 }
 0x25f   :  { %v5715_v47 = vpop.eup %5714  ;;  %v698_v48 = vmul.f32 %v5713_v46, %v5711_v45  ;;  %v6421_v45 = vld [vmem:[#allocation8 + $0x8c] ss:$16 sps:$4 sm:$0xff]   ;;  %v6423_v46 = vld [vmem:[#allocation8 + $0x80] ss:$16 sps:$4 sm:$0xff]  }
 0x260   :  { %v697_v51 = vmul.f32 %v5715_v47, %v6292_v49  ;;  %v5717_v53 = vpop.eup %5716  ;;  %v6425_v47 = vld [vmem:[#allocation8 + $0x88] ss:$16 sps:$4 sm:$0xff]  }
 0x262   :  { %v6330_v52 = vadd.f32 %v698_v48, %v697_v51  ;;  %v6429_v48 = vld [vmem:[#allocation8 + $0xa4] ss:$16 sps:$4 sm:$0xff]   ;;  %v6435_v51 = vld [vmem:[#allocation8 + $0xa8] ss:$16 sps:$4 sm:$0xff]  }
 0x264   :  { %5718 = vtanh.f32 %v6330_v52 }
 0x26e   :  { %v5719_v44 = vpop.eup %5718 }
 0x26f   :  { %v701_v54 = vmul.f32 %v5719_v44, %v5717_v53  ;;  %v6440_v53 = vld [vmem:[#allocation8 + $0xc4] ss:$16 sps:$4 sm:$0xff]   ;;  %v6442_v44 = vld [vmem:[#allocation8 + $0xcc] ss:$16 sps:$4 sm:$0xff]  }
 0x271   :  { %703 = vst [vmem:[#allocation9 + $0x10] sm:$0xff] %v701_v54  ;;  %v709_v55 = vpack.c.bf16 %v701_v54, %v701_v54  ;;  %v6447_v54 = vld [vmem:[#allocation8 + $0xc0] ss:$16 sps:$4 sm:$0xff]  }
 0x273   :  { %935 = vmatmul.mubr.bf16.vlgmr.msra.gmra.mrb[8].mxu0 %v709_v55  ;;  %976 = vmatmul.mubr.bf16.vlgmr.msra.gmra.mrb[8].mxu1 %v709_v55  ;;  %v6449_v55 = vld [vmem:[#allocation8 + $0xc8] ss:$16 sps:$4 sm:$0xff]  }
 0x274   :  { %1213 = vmatpush1.bf16.msra.mxu0 %v6158_v2  ;;  %1254 = vmatpush1.bf16.msra.mxu1 %v6171_v7  ;;  %v705_v2 = vld [vmem:[#allocation3 + $0x60] sm:$0xff] }
 0x275   :  { %1214 = vmatprep.subr.bf16.mxu0 %v6161_v3  ;;  %1255 = vmatprep.subr.bf16.mxu1 %v6181_v10  ;;  %v706_v3 = vld [vmem:[#allocation3 + $0x68] sm:$0xff] }
 0x276   :  { %1244 = vmatprep.mubr.bf16.mxu0 %v7165_v0  ;;  %1285 = vmatprep.mubr.bf16.mxu1 %v7165_v0 }
 0x278   :  { %1215 = vmatpush1.bf16.msra.mxu0 %v6164_v4  ;;  %1256 = vmatpush1.bf16.msra.mxu1 %v6183_v11 }
 0x279   :  { %1216 = vmatprep.subr.bf16.mxu0 %v6167_v5  ;;  %1257 = vmatprep.subr.bf16.mxu1 %v6191_v14 }
 0x27c   :  { %1217 = vmatpush1.bf16.msra.mxu0 %v6174_v8  ;;  %1258 = vmatpush1.bf16.msra.mxu1 %v6195_v15 }
 0x27d   :  { %1218 = vmatprep.subr.bf16.mxu0 %v6178_v9  ;;  %1259 = vmatprep.subr.bf16.mxu1 %v6198_v16 }
 0x280   :  { %1219 = vmatpush1.bf16.msra.mxu0 %v6187_v12  ;;  %1260 = vmatpush1.bf16.msra.mxu1 %v6207_v19  ;;  %v707_v19 = vld [vmem:[#allocation3 + $0x70] sm:$0xff] }
 0x281   :  { %1220 = vmatprep.subr.bf16.mxu0 %v6189_v13  ;;  %1261 = vmatprep.subr.bf16.mxu1 %v6210_v20 }
 0x284   :  { %1221 = vmatpush1.bf16.msra.mxu0 %v6201_v17  ;;  %1262 = vmatpush1.bf16.msra.mxu1 %v6217_v25  ;;  %v708_v17 = vld [vmem:[#allocation3 + $0x78] sm:$0xff] }
 0x285   :  { %1222 = vmatprep.subr.bf16.mxu0 %v6204_v18  ;;  %1263 = vmatprep.subr.bf16.mxu1 %v6222_v27 }
 0x288   :  { %1223 = vmatpush1.bf16.msra.mxu0 %v6213_v23  ;;  %1264 = vmatpush1.bf16.msra.mxu1 %v6228_v30 }
 0x289   :  { %1224 = vmatprep.subr.bf16.mxu0 %v6215_v24  ;;  %1265 = vmatprep.subr.bf16.mxu1 %v6231_v32 }
 0x28c   :  { %1225 = vmatpush1.bf16.msra.mxu0 %v6224_v28  ;;  %1266 = vmatpush1.bf16.msra.mxu1 %v6238_v35 }
 0x28d   :  { %1226 = vmatprep.subr.bf16.mxu0 %v6226_v29  ;;  %1267 = vmatprep.subr.bf16.mxu1 %v6241_v36 }
 0x290   :  { %1227 = vmatpush1.bf16.msra.mxu0 %v6235_v33  ;;  %1268 = vmatpush1.bf16.msra.mxu1 %v6246_v38 }
 0x291   :  { %1522 = vmatprep.subr.bf16.mxu0 %v6371_v60  ;;  %1563 = vmatprep.subr.bf16.mxu1 %v6373_v61 }
 0x346   :  { %v936_v4 = vpop.f32.mrb[8].mxu0  ;;  %v977_v5 = vpop.f32.mrb[8].mxu1 }
 0x347   :  { %v984_v7 = vadd.f32 %v936_v4, %v705_v2  ;;  %v938_v8 = vpop.f32.mrb[9].mxu0  ;;  %v979_v9 = vpop.f32.mrb[9].mxu1  ;;  %v986_v23 = vadd.f32 %v977_v5, %v707_v19  ;;  %v6453_v2 = vld [vmem:[#allocation8 + $0xe4] ss:$16 sps:$4 sm:$0xff]   ;;  %v6459_v4 = vld [vmem:[#allocation8 + $0xe0] ss:$16 sps:$4 sm:$0xff]  }
 0x348   :  { %v985_v10 = vadd.f32 %v938_v8, %v706_v3  ;;  %v940_v11 = vpop.f32.mrb[10].mxu0  ;;  %v981_v12 = vpop.f32.mrb[10].mxu1  ;;  %v987_v18 = vadd.f32 %v979_v9, %v708_v17  ;;  %v6455_v3 = vld [vmem:[#allocation8 + $0xec] ss:$16 sps:$4 sm:$0xff]   ;;  %v6461_v5 = vld [vmem:[#allocation8 + $0xe8] ss:$16 sps:$4 sm:$0xff]  }
 0x349   :  { %v5001_v13 = vmul.f32 -1.442695, %v984_v7  ;;  %v941_v14 = vpop.f32.mrb[11].mxu0  ;;  %v982_v15 = vpop.f32.mrb[11].mxu1  ;;  %v1015_v7 = vld [vmem:[#allocation3 + $0x80] sm:$0xff]  ;;  %v1016_v8 = vld [vmem:[#allocation3 + $0x88] sm:$0xff] }
 0x34a   :  { %v5002_v16 = vmul.f32 -1.442695, %v985_v10  ;;  %v5003_v20 = vmul.f32 -1.442695, %v987_v18 }
 0x34b   :  { %5720 = vpow2.f32 %v5001_v13 }
 0x34c   :  { %5722 = vpow2.f32 %v5002_v16 }
 0x34d   :  { %5724 = vpow2.f32 %v5003_v20 }
 0x34e   :  { %5726 = vtanh.f32 %v986_v23  ;;  %v1018_v23 = vld [vmem:[#allocation3 + $0x98] sm:$0xff] }
 0x355   :  { %v5721_v24 = vpop.eup %5720 }
 0x356   :  { %v5723_v25 = vpop.eup %5722  ;;  %v991_v27 = vadd.f32 1.0, %v5721_v24 }
 0x357   :  { %v997_v28 = vadd.f32 1.0, %v5723_v25  ;;  %v5725_v29 = vpop.eup %5724  ;;  %v1017_v25 = vld [vmem:[#allocation3 + $0x90] sm:$0xff] }
 0x358   :  { %5728 = vrcp.f32 %v991_v27  ;;  %v5727_v30 = vpop.eup %5726  ;;  %v1004_v36 = vadd.f32 1.0, %v5725_v29 }
 0x359   :  { %5730 = vrcp.f32 %v997_v28 }
 0x35a   :  { %5732 = vrcp.f32 %v1004_v36 }
 0x362   :  { %v5729_v32 = vpop.eup %5728 }
 0x363   :  { %v5731_v33 = vpop.eup %5730  ;;  %v1008_v35 = vmul.f32 %v5729_v32, %v5727_v30 }
 0x364   :  { %v1007_v38 = vmul.f32 %v5731_v33, %v6330_v52  ;;  %v5733_v56 = vpop.eup %5732  ;;  %v6437_v52 = vld [vmem:[#allocation8 + $0xac] ss:$16 sps:$4 sm:$0xff]  }
 0x366   :  { %v6366_v49 = vadd.f32 %v1008_v35, %v1007_v38 }
 0x368   :  { %5734 = vtanh.f32 %v6366_v49 }
 0x372   :  { %v5735_v57 = vpop.eup %5734 }
 0x373   :  { %v1011_v58 = vmul.f32 %v5735_v57, %v5733_v56 }
 0x375   :  { %1013 = vst [vmem:[#allocation9 + $0x18] sm:$0xff] %v1011_v58  ;;  %v1019_v59 = vpack.c.bf16 %v1011_v58, %v1011_v58 }
 0x377   :  { %1245 = vmatmul.mubr.bf16.vlgmr.msra.gmra.mrb[12].mxu0 %v1019_v59  ;;  %1286 = vmatmul.mubr.bf16.vlgmr.msra.gmra.mrb[12].mxu1 %v1019_v59 }
 0x378   :  { %1554 = vmatprep.mubr.bf16.mxu0 %v7165_v0  ;;  %1595 = vmatprep.mubr.bf16.mxu1 %v7165_v0 }
 0x379   :  { %1523 = vmatpush1.bf16.msra.mxu0 %v6375_v62  ;;  %1564 = vmatpush1.bf16.msra.mxu1 %v6377_v63 }
 0x37a   :  { %1524 = vmatprep.subr.bf16.mxu0 %v6383_v21  ;;  %1565 = vmatprep.subr.bf16.mxu1 %v6385_v22 }
 0x37d   :  { %1525 = vmatpush1.bf16.msra.mxu0 %v6387_v26  ;;  %1566 = vmatpush1.bf16.msra.mxu1 %v6389_v31 }
 0x37e   :  { %1526 = vmatprep.subr.bf16.mxu0 %v6395_v1  ;;  %1567 = vmatprep.subr.bf16.mxu1 %v6397_v34 }
 0x381   :  { %1527 = vmatpush1.bf16.msra.mxu0 %v6399_v6  ;;  %1568 = vmatpush1.bf16.msra.mxu1 %v6401_v37 }
 0x382   :  { %1528 = vmatprep.subr.bf16.mxu0 %v6407_v39  ;;  %1569 = vmatprep.subr.bf16.mxu1 %v6409_v40 }
 0x385   :  { %1529 = vmatpush1.bf16.msra.mxu0 %v6411_v41  ;;  %1570 = vmatpush1.bf16.msra.mxu1 %v6413_v42 }
 0x386   :  { %1530 = vmatprep.subr.bf16.mxu0 %v6419_v43  ;;  %1571 = vmatprep.subr.bf16.mxu1 %v6421_v45 }
 0x389   :  { %1531 = vmatpush1.bf16.msra.mxu0 %v6423_v46  ;;  %1572 = vmatpush1.bf16.msra.mxu1 %v6425_v47 }
 0x38a   :  { %1532 = vmatprep.subr.bf16.mxu0 %v6429_v48  ;;  %1573 = vmatprep.subr.bf16.mxu1 %v6437_v52 }
 0x38d   :  { %1533 = vmatpush1.bf16.msra.mxu0 %v6433_v50  ;;  %1574 = vmatpush1.bf16.msra.mxu1 %v6435_v51 }
 0x38e   :  { %1534 = vmatprep.subr.bf16.mxu0 %v6440_v53  ;;  %1575 = vmatprep.subr.bf16.mxu1 %v6442_v44 }
 0x391   :  { %1535 = vmatpush1.bf16.msra.mxu0 %v6447_v54  ;;  %1576 = vmatpush1.bf16.msra.mxu1 %v6449_v55 }
 0x392   :  { %1536 = vmatprep.subr.bf16.mxu0 %v6453_v2  ;;  %1577 = vmatprep.subr.bf16.mxu1 %v6455_v3 }
 0x395   :  { %1537 = vmatpush1.bf16.msra.mxu0 %v6459_v4  ;;  %1578 = vmatpush1.bf16.msra.mxu1 %v6461_v5 }
 0x396   :  { %1832 = vmatprep.subr.bf16.mxu0 %v6371_v60  ;;  %1873 = vmatprep.subr.bf16.mxu1 %v6373_v61 }
 0x44a   :  { %v1246_v9 = vpop.f32.mrb[12].mxu0  ;;  %v1287_v10 = vpop.f32.mrb[12].mxu1 }
 0x44b   :  { %v1294_v11 = vadd.f32 %v1246_v9, %v1015_v7  ;;  %v1248_v12 = vpop.f32.mrb[13].mxu0  ;;  %v1289_v13 = vpop.f32.mrb[13].mxu1  ;;  %v1296_v28 = vadd.f32 %v1287_v10, %v1017_v25 }
 0x44c   :  { %v1295_v14 = vadd.f32 %v1248_v12, %v1016_v8  ;;  %v1250_v15 = vpop.f32.mrb[14].mxu0  ;;  %v1291_v16 = vpop.f32.mrb[14].mxu1  ;;  %v1297_v24 = vadd.f32 %v1289_v13, %v1018_v23  ;;  %v1326_v12 = vld [vmem:[#allocation3 + $0xa8] sm:$0xff] }
 0x44d   :  { %v5036_v17 = vmul.f32 -1.442695, %v1294_v11  ;;  %v1251_v18 = vpop.f32.mrb[15].mxu0  ;;  %v1292_v19 = vpop.f32.mrb[15].mxu1 }
 0x44e   :  { %v5037_v20 = vmul.f32 -1.442695, %v1295_v14  ;;  %v5038_v27 = vmul.f32 -1.442695, %v1297_v24 }
 0x44f   :  { %5736 = vpow2.f32 %v5036_v17 }
 0x450   :  { %5738 = vpow2.f32 %v5037_v20 }
 0x451   :  { %5740 = vpow2.f32 %v5038_v27 }
 0x452   :  { %5742 = vtanh.f32 %v1296_v28  ;;  %v1328_v28 = vld [vmem:[#allocation3 + $0xb8] sm:$0xff] }
 0x459   :  { %v5737_v29 = vpop.eup %5736 }
 0x45a   :  { %v5739_v30 = vpop.eup %5738  ;;  %v1301_v32 = vadd.f32 1.0, %v5737_v29  ;;  %v1327_v29 = vld [vmem:[#allocation3 + $0xb0] sm:$0xff] }
 0x45b   :  { %v1307_v33 = vadd.f32 1.0, %v5739_v30  ;;  %v5741_v35 = vpop.eup %5740 }
 0x45c   :  { %5744 = vrcp.f32 %v1301_v32  ;;  %v5743_v36 = vpop.eup %5742  ;;  %v1314_v58 = vadd.f32 1.0, %v5741_v35 }
 0x45d   :  { %5746 = vrcp.f32 %v1307_v33 }
 0x45e   :  { %5748 = vrcp.f32 %v1314_v58 }
 0x466   :  { %v5745_v38 = vpop.eup %5744 }
 0x467   :  { %v5747_v56 = vpop.eup %5746  ;;  %v1318_v57 = vmul.f32 %v5745_v38, %v5743_v36 }
 0x468   :  { %v1317_v59 = vmul.f32 %v5747_v56, %v6366_v49  ;;  %v5749_v8 = vpop.eup %5748  ;;  %v1325_v49 = vld [vmem:[#allocation3 + $0xa0] sm:$0xff] }
 0x46a   :  { %v6470_v7 = vadd.f32 %v1318_v57, %v1317_v59 }
 0x46c   :  { %5750 = vtanh.f32 %v6470_v7 }
 0x476   :  { %v5751_v9 = vpop.eup %5750 }
 0x477   :  { %v6473_v10 = vmul.f32 %v5751_v9, %v5749_v8 }
 0x479   :  { %v1329_v11 = vpack.c.bf16 %v6473_v10, %v6473_v10 }
 0x47b   :  { %1555 = vmatmul.mubr.bf16.vlgmr.msra.gmra.mrb[16].mxu0 %v1329_v11  ;;  %1596 = vmatmul.mubr.bf16.vlgmr.msra.gmra.mrb[16].mxu1 %v1329_v11 }
 0x47c   :  { %1833 = vmatpush1.bf16.msra.mxu0 %v6375_v62  ;;  %1874 = vmatpush1.bf16.msra.mxu1 %v6377_v63 }
 0x47d   :  { %1834 = vmatprep.subr.bf16.mxu0 %v6383_v21  ;;  %1875 = vmatprep.subr.bf16.mxu1 %v6385_v22 }
 0x47e   :  { %1864 = vmatprep.mubr.bf16.mxu0 %v7165_v0  ;;  %1905 = vmatprep.mubr.bf16.mxu1 %v7165_v0 }
 0x480   :  { %1835 = vmatpush1.bf16.msra.mxu0 %v6387_v26  ;;  %1876 = vmatpush1.bf16.msra.mxu1 %v6389_v31 }
 0x481   :  { %1836 = vmatprep.subr.bf16.mxu0 %v6395_v1  ;;  %1877 = vmatprep.subr.bf16.mxu1 %v6397_v34 }
 0x484   :  { %1837 = vmatpush1.bf16.msra.mxu0 %v6399_v6  ;;  %1878 = vmatpush1.bf16.msra.mxu1 %v6401_v37 }
 0x485   :  { %1838 = vmatprep.subr.bf16.mxu0 %v6407_v39  ;;  %1879 = vmatprep.subr.bf16.mxu1 %v6409_v40 }
 0x488   :  { %1839 = vmatpush1.bf16.msra.mxu0 %v6411_v41  ;;  %1880 = vmatpush1.bf16.msra.mxu1 %v6413_v42 }
 0x489   :  { %1840 = vmatprep.subr.bf16.mxu0 %v6419_v43  ;;  %1881 = vmatprep.subr.bf16.mxu1 %v6421_v45 }
 0x48c   :  { %1841 = vmatpush1.bf16.msra.mxu0 %v6423_v46  ;;  %1882 = vmatpush1.bf16.msra.mxu1 %v6425_v47 }
 0x48d   :  { %1842 = vmatprep.subr.bf16.mxu0 %v6429_v48  ;;  %1883 = vmatprep.subr.bf16.mxu1 %v6437_v52 }
 0x490   :  { %1843 = vmatpush1.bf16.msra.mxu0 %v6433_v50  ;;  %1884 = vmatpush1.bf16.msra.mxu1 %v6435_v51 }
 0x491   :  { %1844 = vmatprep.subr.bf16.mxu0 %v6440_v53  ;;  %1885 = vmatprep.subr.bf16.mxu1 %v6442_v44 }
 0x494   :  { %1845 = vmatpush1.bf16.msra.mxu0 %v6447_v54  ;;  %1886 = vmatpush1.bf16.msra.mxu1 %v6449_v55 }
 0x495   :  { %1846 = vmatprep.subr.bf16.mxu0 %v6453_v2  ;;  %1887 = vmatprep.subr.bf16.mxu1 %v6455_v3 }
 0x498   :  { %1847 = vmatpush1.bf16.msra.mxu0 %v6459_v4  ;;  %1888 = vmatpush1.bf16.msra.mxu1 %v6461_v5 }
 0x499   :  { %2142 = vmatprep.subr.bf16.mxu0 %v6371_v60  ;;  %2183 = vmatprep.subr.bf16.mxu1 %v6373_v61 }
 0x54e   :  { %v1556_v13 = vpop.f32.mrb[16].mxu0  ;;  %v1597_v14 = vpop.f32.mrb[16].mxu1 }
 0x54f   :  { %v1604_v15 = vadd.f32 %v1556_v13, %v1325_v49  ;;  %v1558_v16 = vpop.f32.mrb[17].mxu0  ;;  %v1599_v17 = vpop.f32.mrb[17].mxu1  ;;  %v1606_v30 = vadd.f32 %v1597_v14, %v1327_v29  ;;  %v5546_v29 = vld [vmem:[#allocation6 + $0x44] ss:$16 sps:$4 sm:$0xff]  }
 0x550   :  { %v1605_v18 = vadd.f32 %v1558_v16, %v1326_v12  ;;  %v1560_v19 = vpop.f32.mrb[18].mxu0  ;;  %v1601_v20 = vpop.f32.mrb[18].mxu1  ;;  %v1607_v60 = vadd.f32 %v1599_v17, %v1328_v28  ;;  %v5538_v28 = vld [vmem:[#allocation6 + $0x20] ss:$16 sps:$4 sm:$0xff]  }
 0x551   :  { %v5071_v23 = vmul.f32 -1.442695, %v1604_v15  ;;  %v1561_v24 = vpop.f32.mrb[19].mxu0  ;;  %v1602_v25 = vpop.f32.mrb[19].mxu1  ;;  %v5532_v20 = vld [vmem:[#allocation6] ss:$16 sps:$4 sm:$0xff]  }
 0x552   :  { %v5072_v27 = vmul.f32 -1.442695, %v1605_v18  ;;  %v5073_v61 = vmul.f32 -1.442695, %v1607_v60  ;;  %v5540_v25 = vld [vmem:[#allocation6 + $0x24] ss:$16 sps:$4 sm:$0xff]  }
 0x553   :  { %5752 = vpow2.f32 %v5071_v23  ;;  %v5535_v23 = vld [vmem:[#allocation6 + $0x8] ss:$16 sps:$4 sm:$0xff]  }
 0x554   :  { %5754 = vpow2.f32 %v5072_v27  ;;  %v5543_v27 = vld [vmem:[#allocation6 + $0x2c] ss:$16 sps:$4 sm:$0xff]   ;;  %v5541_v60 = vld [vmem:[#allocation6 + $0x28] ss:$16 sps:$4 sm:$0xff]  }
 0x555   :  { %5756 = vpow2.f32 %v5073_v61  ;;  %v5549_v61 = vld [vmem:[#allocation6 + $0x4c] ss:$16 sps:$4 sm:$0xff]  }
 0x556   :  { %5758 = vtanh.f32 %v1606_v30  ;;  %v5544_v30 = vld [vmem:[#allocation6 + $0x40] ss:$16 sps:$4 sm:$0xff]  }
 0x55d   :  { %v5753_v32 = vpop.eup %5752 }
 0x55e   :  { %v5755_v33 = vpop.eup %5754  ;;  %v1611_v35 = vadd.f32 1.0, %v5753_v32  ;;  %v5547_v32 = vld [vmem:[#allocation6 + $0x48] ss:$16 sps:$4 sm:$0xff]  }
 0x55f   :  { %v1617_v36 = vadd.f32 1.0, %v5755_v33  ;;  %v5757_v38 = vpop.eup %5756  ;;  %v5552_v33 = vld [vmem:[#allocation6 + $0x64] ss:$16 sps:$4 sm:$0xff]  }
 0x560   :  { %5760 = vrcp.f32 %v1611_v35  ;;  %v5759_v56 = vpop.eup %5758  ;;  %v1624_v8 = vadd.f32 1.0, %v5757_v38  ;;  %v5555_v35 = vld [vmem:[#allocation6 + $0x6c] ss:$16 sps:$4 sm:$0xff]   ;;  %v5553_v38 = vld [vmem:[#allocation6 + $0x68] ss:$16 sps:$4 sm:$0xff]  }
 0x561   :  { %5762 = vrcp.f32 %v1617_v36  ;;  %v5550_v36 = vld [vmem:[#allocation6 + $0x60] ss:$16 sps:$4 sm:$0xff]  }
 0x562   :  { %5764 = vrcp.f32 %v1624_v8  ;;  %v5564_v8 = vld [vmem:[#allocation6 + $0xa4] ss:$16 sps:$4 sm:$0xff]  }
 0x56a   :  { %v5761_v57 = vpop.eup %5760 }
 0x56b   :  { %v5763_v58 = vpop.eup %5762  ;;  %v1628_v59 = vmul.f32 %v5761_v57, %v5759_v56  ;;  %v5558_v56 = vld [vmem:[#allocation6 + $0x84] ss:$16 sps:$4 sm:$0xff]   ;;  %v5561_v57 = vld [vmem:[#allocation6 + $0x8c] ss:$16 sps:$4 sm:$0xff]  }
 0x56c   :  { %v1627_v9 = vmul.f32 %v5763_v58, %v6470_v7  ;;  %v5765_v49 = vpop.eup %5764  ;;  %v5556_v58 = vld [vmem:[#allocation6 + $0x80] ss:$16 sps:$4 sm:$0xff]  }
 0x56e   :  { %v6512_v11 = vadd.f32 %v1628_v59, %v1627_v9  ;;  %v5559_v59 = vld [vmem:[#allocation6 + $0x88] ss:$16 sps:$4 sm:$0xff]   ;;  %v5567_v9 = vld [vmem:[#allocation6 + $0xac] ss:$16 sps:$4 sm:$0xff]  }
 0x570   :  { %5766 = vtanh.f32 %v6512_v11 }
 0x57a   :  { %v5767_v12 = vpop.eup %5766 }
 0x57b   :  { %v6515_v13 = vmul.f32 %v5767_v12, %v5765_v49  ;;  %v5565_v49 = vld [vmem:[#allocation6 + $0xa8] ss:$16 sps:$4 sm:$0xff]   ;;  %v5570_v12 = vld [vmem:[#allocation6 + $0xc4] ss:$16 sps:$4 sm:$0xff]  }
 0x57d   :  { %v1639_v14 = vpack.c.bf16 %v6515_v13, %v6515_v13 }
 0x57f   :  { %1865 = vmatmul.mubr.bf16.vlgmr.msra.gmra.mrb[20].mxu0 %v1639_v14  ;;  %1906 = vmatmul.mubr.bf16.vlgmr.msra.gmra.mrb[20].mxu1 %v1639_v14  ;;  %v5573_v14 = vld [vmem:[#allocation6 + $0xcc] ss:$16 sps:$4 sm:$0xff]  }
 0x580   :  { %2143 = vmatpush1.bf16.msra.mxu0 %v6375_v62  ;;  %2184 = vmatpush1.bf16.msra.mxu1 %v6377_v63  ;;  %v5534_v62 = vld [vmem:[#allocation6 + $0x4] ss:$16 sps:$4 sm:$0xff]   ;;  %v5537_v63 = vld [vmem:[#allocation6 + $0xc] ss:$16 sps:$4 sm:$0xff]  }
 0x581   :  { %2144 = vmatprep.subr.bf16.mxu0 %v6383_v21  ;;  %2185 = vmatprep.subr.bf16.mxu1 %v6385_v22  ;;  %v1635_v21 = vld [vmem:[#allocation3 + $0xc0] sm:$0xff]  ;;  %v1636_v22 = vld [vmem:[#allocation3 + $0xc8] sm:$0xff] }
 0x582   :  { %2174 = vmatprep.mubr.bf16.mxu0 %v7165_v0  ;;  %2215 = vmatprep.mubr.bf16.mxu1 %v7165_v0 }
 0x584   :  { %2145 = vmatpush1.bf16.msra.mxu0 %v6387_v26  ;;  %2186 = vmatpush1.bf16.msra.mxu1 %v6389_v31 }
 0x585   :  { %2146 = vmatprep.subr.bf16.mxu0 %v6395_v1  ;;  %2187 = vmatprep.subr.bf16.mxu1 %v6397_v34 }
 0x588   :  { %2147 = vmatpush1.bf16.msra.mxu0 %v6399_v6  ;;  %2188 = vmatpush1.bf16.msra.mxu1 %v6401_v37 }
 0x589   :  { %2148 = vmatprep.subr.bf16.mxu0 %v6407_v39  ;;  %2189 = vmatprep.subr.bf16.mxu1 %v6409_v40 }
 0x58c   :  { %2149 = vmatpush1.bf16.msra.mxu0 %v6411_v41  ;;  %2190 = vmatpush1.bf16.msra.mxu1 %v6413_v42 }
 0x58d   :  { %2150 = vmatprep.subr.bf16.mxu0 %v6419_v43  ;;  %2191 = vmatprep.subr.bf16.mxu1 %v6421_v45 }
 0x590   :  { %2151 = vmatpush1.bf16.msra.mxu0 %v6423_v46  ;;  %2192 = vmatpush1.bf16.msra.mxu1 %v6425_v47  ;;  %v1638_v46 = vld [vmem:[#allocation3 + $0xd8] sm:$0xff] }
 0x591   :  { %2152 = vmatprep.subr.bf16.mxu0 %v6429_v48  ;;  %2193 = vmatprep.subr.bf16.mxu1 %v6437_v52  ;;  %v1637_v48 = vld [vmem:[#allocation3 + $0xd0] sm:$0xff] }
 0x594   :  { %2153 = vmatpush1.bf16.msra.mxu0 %v6433_v50  ;;  %2194 = vmatpush1.bf16.msra.mxu1 %v6435_v51 }
 0x595   :  { %2154 = vmatprep.subr.bf16.mxu0 %v6440_v53  ;;  %2195 = vmatprep.subr.bf16.mxu1 %v6442_v44 }
 0x598   :  { %2155 = vmatpush1.bf16.msra.mxu0 %v6447_v54  ;;  %2196 = vmatpush1.bf16.msra.mxu1 %v6449_v55 }
 0x599   :  { %2156 = vmatprep.subr.bf16.mxu0 %v6453_v2  ;;  %2197 = vmatprep.subr.bf16.mxu1 %v6455_v3 }
 0x59c   :  { %2157 = vmatpush1.bf16.msra.mxu0 %v6459_v4  ;;  %2198 = vmatpush1.bf16.msra.mxu1 %v6461_v5 }
 0x59d   :  { %2482 = vmatprep.subr.bf16.mxu0 %v5534_v62  ;;  %2555 = vmatprep.subr.bf16.mxu1 %v5537_v63  ;;  %v5568_v62 = vld [vmem:[#allocation6 + $0xc0] ss:$16 sps:$4 sm:$0xff]   ;;  %v5571_v63 = vld [vmem:[#allocation6 + $0xc8] ss:$16 sps:$4 sm:$0xff]  }
 0x652   :  { %v1866_v26 = vpop.f32.mrb[20].mxu0  ;;  %v1907_v31 = vpop.f32.mrb[20].mxu1 }
 0x653   :  { %v1914_v1 = vadd.f32 %v1866_v26, %v1635_v21  ;;  %v1868_v34 = vpop.f32.mrb[21].mxu0  ;;  %v1909_v6 = vpop.f32.mrb[21].mxu1  ;;  %v1916_v51 = vadd.f32 %v1907_v31, %v1637_v48  ;;  %v5576_v21 = vld [vmem:[#allocation6 + $0xe4] ss:$16 sps:$4 sm:$0xff]   ;;  %v5574_v26 = vld [vmem:[#allocation6 + $0xe0] ss:$16 sps:$4 sm:$0xff]  }
 0x654   :  { %v1915_v37 = vadd.f32 %v1868_v34, %v1636_v22  ;;  %v1870_v39 = vpop.f32.mrb[22].mxu0  ;;  %v1911_v40 = vpop.f32.mrb[22].mxu1  ;;  %v1917_v47 = vadd.f32 %v1909_v6, %v1638_v46  ;;  %v5579_v22 = vld [vmem:[#allocation6 + $0xec] ss:$16 sps:$4 sm:$0xff]   ;;  %v5577_v31 = vld [vmem:[#allocation6 + $0xe8] ss:$16 sps:$4 sm:$0xff]  }
 0x655   :  { %v5106_v41 = vmul.f32 -1.442695, %v1914_v1  ;;  %v1871_v42 = vpop.f32.mrb[23].mxu0  ;;  %v1912_v43 = vpop.f32.mrb[23].mxu1  ;;  %v2256_v1 = vld [vmem:[#allocation9] sm:$0xff]  ;;  %v2257_v34 = vld [vmem:[#allocation9 + $0x8] sm:$0xff] }
 0x656   :  { %v5107_v45 = vmul.f32 -1.442695, %v1915_v37  ;;  %v5108_v50 = vmul.f32 -1.442695, %v1917_v47  ;;  %v2264_v6 = vpack.c.bf16 %v2257_v34, %v2256_v1  ;;  %v2259_v37 = vld [vmem:[#allocation9 + $0x18] sm:$0xff]  ;;  %v2258_v39 = vld [vmem:[#allocation9 + $0x10] sm:$0xff]  ;;  %v2302_v42 = vlaneseq }
 0x657   :  { %5768 = vpow2.f32 %v5106_v41  ;;  %v2265_v40 = vpack.c.bf16 %v2259_v37, %v2258_v39  ;;  %v2266_v41 = vpack.c.bf16 %v6515_v13, %v6473_v10  ;;  %v6575_v46 = vld [vmem:[%s7161_s3] sm:$0xf]  ;;  %v6580_v10 = vld [vmem:[#allocation8 + $0x104] ss:$16 sps:$4 sm:$0xff]   ;;  %v6582_v13 = vld [vmem:[#allocation8 + $0x10c] ss:$16 sps:$4 sm:$0xff]  }
 0x658   :  { %5770 = vpow2.f32 %v5107_v45  ;;  %v6569_v43 = vshrl.u32 %v2302_v42, 7  ;;  %v6584_v48 = vld [vmem:[#allocation8 + $0x100] ss:$16 sps:$4 sm:$0xff]   ;;  %s6072_s3 = smov [#allocation10]  }
 0x659   :  { %5772 = vpow2.f32 %v5108_v50  ;;  %v6586_v50 = vld [vmem:[#allocation8 + $0x108] ss:$16 sps:$4 sm:$0xff]   ;;  %s4865_s8 = sshll.u32 %s6072_s3, 4  ;;  %s4866_s8 = int_to_ptr.vmem [resolvable:$true] %s4865_s8 }
 0x65a   :  { %5774 = vtanh.f32 %v1916_v51  ;;  %v2308_v45 = vsub.s32 1, %v6569_v43  ;;  %v6592_v51 = vld [vmem:[#allocation8 + $0x124] ss:$16 sps:$4 sm:$0xff]   ;;  %s5990_s17 = scalar_lea.vmem %s4866_s8, 256  ;;  %p5995_p11 = scmp.lt.s32.totalorder %s4866_s8, %s4866_s8 }
 0x65b   :  { %p5991_p10 = scmp.ne.s32.totalorder %s4866_s8, %s5990_s17  ;;  %p5996_p12 = scmp.lt.s32.totalorder %s5990_s17, %s5990_s17 }
 0x65c   :  { %v6578_v47 = vrot.slane %v6575_v46, %v2308_v45 }
 0x65d   :  { %p5997_p13 = por %p5996_p12, %p5995_p11 }
 0x65f   :  { %p5998_p0 = pnand %p5997_p13, %p5991_p10 }
 0x661   :  { %v5769_v52 = vpop.eup %5768 }
 0x662   :  { %v5771_v53 = vpop.eup %5770  ;;  %v1921_v44 = vadd.f32 1.0, %v5769_v52  ;;  %v6594_v52 = vld [vmem:[#allocation8 + $0x12c] ss:$16 sps:$4 sm:$0xff]  }
 0x663   :  { %v1927_v54 = vadd.f32 1.0, %v5771_v53  ;;  %v5773_v55 = vpop.eup %5772  ;;  %v6596_v53 = vld [vmem:[#allocation8 + $0x120] ss:$16 sps:$4 sm:$0xff]  }
 0x664   :  { %5776 = vrcp.f32 %v1921_v44  ;;  %v5775_v2 = vpop.eup %5774  ;;  %v1934_v7 = vadd.f32 1.0, %v5773_v55  ;;  %v6598_v44 = vld [vmem:[#allocation8 + $0x128] ss:$16 sps:$4 sm:$0xff]   ;;  %v6606_v55 = vld [vmem:[#allocation8 + $0x14c] ss:$16 sps:$4 sm:$0xff]  }
 0x665   :  { %5778 = vrcp.f32 %v1927_v54  ;;  %v6604_v54 = vld [vmem:[#allocation8 + $0x144] ss:$16 sps:$4 sm:$0xff]  }
 0x666   :  { %5780 = vrcp.f32 %v1934_v7  ;;  %v6620_v7 = vld [vmem:[#allocation8 + $0x160] ss:$16 sps:$4 sm:$0xff]  }
 0x66e   :  { %v5777_v3 = vpop.eup %5776 }
 0x66f   :  { %v5779_v4 = vpop.eup %5778  ;;  %v1938_v5 = vmul.f32 %v5777_v3, %v5775_v2  ;;  %v6608_v2 = vld [vmem:[#allocation8 + $0x140] ss:$16 sps:$4 sm:$0xff]   ;;  %v6610_v3 = vld [vmem:[#allocation8 + $0x148] ss:$16 sps:$4 sm:$0xff]  }
 0x670   :  { %v1937_v15 = vmul.f32 %v5779_v4, %v6512_v11  ;;  %v5781_v17 = vpop.eup %5780  ;;  %v5562_v11 = vld [vmem:[#allocation6 + $0xa0] ss:$16 sps:$4 sm:$0xff]   ;;  %v6616_v4 = vld [vmem:[#allocation8 + $0x164] ss:$16 sps:$4 sm:$0xff]  }
 0x672   :  { %v6552_v16 = vadd.f32 %v1938_v5, %v1937_v15  ;;  %v6618_v5 = vld [vmem:[#allocation8 + $0x16c] ss:$16 sps:$4 sm:$0xff]   ;;  %v6622_v15 = vld [vmem:[#allocation8 + $0x168] ss:$16 sps:$4 sm:$0xff]  }
 0x674   :  { %5782 = vtanh.f32 %v6552_v16 }
 0x67e   :  { %v5783_v18 = vpop.eup %5782 }
 0x67f   :  { %v6555_v19 = vmul.f32 %v5783_v18, %v5781_v17  ;;  %v6628_v17 = vld [vmem:[#allocation8 + $0x184] ss:$16 sps:$4 sm:$0xff]   ;;  %v6630_v18 = vld [vmem:[#allocation8 + $0x18c] ss:$16 sps:$4 sm:$0xff]  }
 0x681   :  { %v1949_v24 = vpack.c.bf16 %v6555_v19, %v6555_v19 }
 0x683   :  { %2175 = vmatmul.mubr.bf16.vlgmr.msra.gmra.mrb[24].mxu0 %v1949_v24  ;;  %2216 = vmatmul.mubr.bf16.vlgmr.msra.gmra.mrb[24].mxu1 %v1949_v24  ;;  %v6640_v24 = vld [vmem:[#allocation8 + $0x1a0] ss:$16 sps:$4 sm:$0xff]  }
 0x684   :  { %2483 = vmatpush1.bf16.msra.mxu0 %v5532_v20  ;;  %2556 = vmatpush1.bf16.msra.mxu1 %v5535_v23  ;;  %v6632_v20 = vld [vmem:[#allocation8 + $0x180] ss:$16 sps:$4 sm:$0xff]   ;;  %v6634_v23 = vld [vmem:[#allocation8 + $0x188] ss:$16 sps:$4 sm:$0xff]  }
 0x685   :  { %2484 = vmatprep.subr.bf16.mxu0 %v5540_v25  ;;  %2557 = vmatprep.subr.bf16.mxu1 %v5543_v27  ;;  %v6642_v25 = vld [vmem:[#allocation8 + $0x1a4] ss:$16 sps:$4 sm:$0xff]   ;;  %v6644_v27 = vld [vmem:[#allocation8 + $0x1a8] ss:$16 sps:$4 sm:$0xff]  }
 0x686   :  { %2514 = vmatprep.mubr.bf16.mxu0 %v7165_v0  ;;  %2587 = vmatprep.mubr.bf16.mxu1 %v7165_v0 }
 0x688   :  { %2485 = vmatpush1.bf16.msra.mxu0 %v5538_v28  ;;  %2558 = vmatpush1.bf16.msra.mxu1 %v5541_v60  ;;  %v6646_v28 = vld [vmem:[#allocation8 + $0x1ac] ss:$16 sps:$4 sm:$0xff]   ;;  %v6648_v60 = vld [vmem:[#allocation8 + $0x1c4] ss:$16 sps:$4 sm:$0xff]  }
 0x689   :  { %2486 = vmatprep.subr.bf16.mxu0 %v5546_v29  ;;  %2559 = vmatprep.subr.bf16.mxu1 %v5549_v61  ;;  %v6651_v29 = vld [vmem:[#allocation8 + $0x1cc] ss:$16 sps:$4 sm:$0xff]   ;;  %v6656_v61 = vld [vmem:[#allocation8 + $0x1c0] ss:$16 sps:$4 sm:$0xff]  }
 0x68c   :  { %2487 = vmatpush1.bf16.msra.mxu0 %v5544_v30  ;;  %2560 = vmatpush1.bf16.msra.mxu1 %v5547_v32  ;;  %v6658_v30 = vld [vmem:[#allocation8 + $0x1c8] ss:$16 sps:$4 sm:$0xff]   ;;  %v6662_v32 = vld [vmem:[#allocation8 + $0x1e4] ss:$16 sps:$4 sm:$0xff]  }
 0x68d   :  { %2488 = vmatprep.subr.bf16.mxu0 %v5552_v33  ;;  %2561 = vmatprep.subr.bf16.mxu1 %v5555_v35  ;;  %v6664_v33 = vld [vmem:[#allocation8 + $0x1ec] ss:$16 sps:$4 sm:$0xff]   ;;  %v6668_v35 = vld [vmem:[#allocation8 + $0x1e0] ss:$16 sps:$4 sm:$0xff]  }
 0x690   :  { %2489 = vmatpush1.bf16.msra.mxu0 %v5550_v36  ;;  %2562 = vmatpush1.bf16.msra.mxu1 %v5553_v38  ;;  %v6670_v36 = vld [vmem:[#allocation8 + $0x1e8] ss:$16 sps:$4 sm:$0xff]   ;;  %v1945_v38 = vld [vmem:[#allocation3 + $0xe0] sm:$0xff] }
 0x691   :  { %2490 = vmatprep.subr.bf16.mxu0 %v5558_v56  ;;  %2563 = vmatprep.subr.bf16.mxu1 %v5561_v57  ;;  %v1946_v56 = vld [vmem:[#allocation3 + $0xe8] sm:$0xff] }
 0x694   :  { %2491 = vmatpush1.bf16.msra.mxu0 %v5556_v58  ;;  %2564 = vmatpush1.bf16.msra.mxu1 %v5559_v59 }
 0x695   :  { %2492 = vmatprep.subr.bf16.mxu0 %v5564_v8  ;;  %2565 = vmatprep.subr.bf16.mxu1 %v5567_v9 }
 0x698   :  { %2493 = vmatpush1.bf16.msra.mxu0 %v5562_v11  ;;  %2566 = vmatpush1.bf16.msra.mxu1 %v5565_v49 }
 0x699   :  { %2494 = vmatprep.subr.bf16.mxu0 %v5570_v12  ;;  %2567 = vmatprep.subr.bf16.mxu1 %v5573_v14 }
 0x69c   :  { %2495 = vmatpush1.bf16.msra.mxu0 %v5568_v62  ;;  %2568 = vmatpush1.bf16.msra.mxu1 %v5571_v63 }
 0x69d   :  { %2496 = vmatprep.subr.bf16.mxu0 %v5576_v21  ;;  %2569 = vmatprep.subr.bf16.mxu1 %v5579_v22  ;;  %v1948_v22 = vld [vmem:[#allocation3 + $0xf8] sm:$0xff] }
 0x6a0   :  { %2497 = vmatpush1.bf16.msra.mxu0 %v5574_v26  ;;  %2570 = vmatpush1.bf16.msra.mxu1 %v5577_v31  ;;  %v1947_v31 = vld [vmem:[#allocation3 + $0xf0] sm:$0xff] }
 0x6a1   :  { %2879 = vmatprep.subr.bf16.mxu0 %v6580_v10  ;;  %2920 = vmatprep.subr.bf16.mxu1 %v6582_v13 }
 0x6a3   :  { %2515 = vmatmul.mubr.bf16.vlgmr.msra.gmra.mrb[28].mxu0 %v2264_v6  ;;  %2588 = vmatmul.mubr.bf16.vlgmr.msra.gmra.mrb[28].mxu1 %v2264_v6 }
 0x6a4   :  { %2524 = vmatprep.mubr.bf16.mxu0 %v7165_v0  ;;  %2597 = vmatprep.mubr.bf16.mxu1 %v7165_v0 }
 0x6a5   :  { %2880 = vmatpush1.bf16.msra.mxu0 %v6584_v48  ;;  %2921 = vmatpush1.bf16.msra.mxu1 %v6586_v50 }
 0x6a6   :  { %2881 = vmatprep.subr.bf16.mxu0 %v6592_v51  ;;  %2922 = vmatprep.subr.bf16.mxu1 %v6594_v52 }
 0x6a9   :  { %2882 = vmatpush1.bf16.msra.mxu0 %v6596_v53  ;;  %2923 = vmatpush1.bf16.msra.mxu1 %v6598_v44 }
 0x6aa   :  { %2883 = vmatprep.subr.bf16.mxu0 %v6604_v54  ;;  %2924 = vmatprep.subr.bf16.mxu1 %v6606_v55 }
 0x6ab   :  { %2525 = vmatmul.mubr.bf16.gmra.mrb[32].mxu0 %v2265_v40  ;;  %2598 = vmatmul.mubr.bf16.gmra.mrb[32].mxu1 %v2265_v40 }
 0x6ac   :  { %2534 = vmatprep.mubr.bf16.mxu0 %v7165_v0  ;;  %2607 = vmatprep.mubr.bf16.mxu1 %v7165_v0 }
 0x6ad   :  { %2884 = vmatpush1.bf16.msra.mxu0 %v6608_v2  ;;  %2925 = vmatpush1.bf16.msra.mxu1 %v6610_v3 }
 0x6ae   :  { %2885 = vmatprep.subr.bf16.mxu0 %v6616_v4  ;;  %2926 = vmatprep.subr.bf16.mxu1 %v6618_v5 }
 0x6b1   :  { %2886 = vmatpush1.bf16.msra.mxu0 %v6620_v7  ;;  %2927 = vmatpush1.bf16.msra.mxu1 %v6622_v15 }
 0x6b2   :  { %2887 = vmatprep.subr.bf16.mxu0 %v6628_v17  ;;  %2928 = vmatprep.subr.bf16.mxu1 %v6630_v18 }
 0x6b3   :  { %2535 = vmatmul.mubr.bf16.gmra.mrb[36].mxu0 %v2266_v41  ;;  %2608 = vmatmul.mubr.bf16.gmra.mrb[36].mxu1 %v2266_v41  ;;  %v2304_v41 = vsub.s32 0, %v6569_v43 }
 0x6b4   :  { %2544 = vmatprep.mubr.bf16.mxu0 %v7165_v0  ;;  %2617 = vmatprep.mubr.bf16.mxu1 %v7165_v0 }
 0x6b5   :  { %2888 = vmatpush1.bf16.msra.mxu0 %v6632_v20  ;;  %2929 = vmatpush1.bf16.msra.mxu1 %v6634_v23 }
 0x6b6   :  { %2889 = vmatprep.subr.bf16.mxu0 %v6642_v25  ;;  %2930 = vmatprep.subr.bf16.mxu1 %v6646_v28 }
 0x6b9   :  { %2890 = vmatpush1.bf16.msra.mxu0 %v6640_v24  ;;  %2931 = vmatpush1.bf16.msra.mxu1 %v6644_v27 }
 0x6ba   :  { %2891 = vmatprep.subr.bf16.mxu0 %v6648_v60  ;;  %2932 = vmatprep.subr.bf16.mxu1 %v6651_v29 }
 0x6bd   :  { %2892 = vmatpush1.bf16.msra.mxu0 %v6656_v61  ;;  %2933 = vmatpush1.bf16.msra.mxu1 %v6658_v30 }
 0x6be   :  { %2893 = vmatprep.subr.bf16.mxu0 %v6662_v32  ;;  %2934 = vmatprep.subr.bf16.mxu1 %v6664_v33 }
 0x6c1   :  { %2894 = vmatpush1.bf16.msra.mxu0 %v6668_v35  ;;  %2935 = vmatpush1.bf16.msra.mxu1 %v6670_v36 }
 0x6c2   :  { %3188 = vmatprep.subr.bf16.mxu0 %v6580_v10  ;;  %3229 = vmatprep.subr.bf16.mxu1 %v6582_v13 }
 0x756   :  { %v2176_v57 = vpop.f32.mrb[24].mxu0  ;;  %v2217_v58 = vpop.f32.mrb[24].mxu1 }
 0x757   :  { %v2224_v59 = vadd.f32 %v2176_v57, %v1945_v38  ;;  %v2178_v8 = vpop.f32.mrb[25].mxu0  ;;  %v2219_v9 = vpop.f32.mrb[25].mxu1  ;;  %v2226_v34 = vadd.f32 %v2217_v58, %v1947_v31  ;;  %v2316_v58 = vsub.s32 3, %v6569_v43 }
 0x758   :  { %v2225_v11 = vadd.f32 %v2178_v8, %v1946_v56  ;;  %v2180_v49 = vpop.f32.mrb[26].mxu0  ;;  %v2221_v12 = vpop.f32.mrb[26].mxu1  ;;  %v2227_v26 = vadd.f32 %v2219_v9, %v1948_v22  ;;  %v6680_v8 = vrot.slane %v6575_v46, %v2304_v41 }
 0x759   :  { %v5141_v14 = vmul.f32 -1.442695, %v2224_v59  ;;  %v2181_v62 = vpop.f32.mrb[27].mxu0  ;;  %v2222_v63 = vpop.f32.mrb[27].mxu1 }
 0x75a   :  { %v5142_v21 = vmul.f32 -1.442695, %v2225_v11  ;;  %v5143_v1 = vmul.f32 -1.442695, %v2227_v26  ;;  %v6686_v63 = vrot.slane %v6575_v46, %v2316_v58 }
 0x75b   :  { %5784 = vpow2.f32 %v5141_v14 }
 0x75c   :  { %5786 = vpow2.f32 %v5142_v21 }
 0x75d   :  { %5788 = vpow2.f32 %v5143_v1 }
 0x75e   :  { %5790 = vtanh.f32 %v2226_v34  ;;  %v2312_v34 = vsub.s32 2, %v6569_v43 }
 0x765   :  { %v5785_v6 = vpop.eup %5784 }
 0x766   :  { %v5787_v37 = vpop.eup %5786  ;;  %v2231_v39 = vadd.f32 1.0, %v5785_v6 }
 0x767   :  { %v2237_v40 = vadd.f32 1.0, %v5787_v37  ;;  %v5789_v42 = vpop.eup %5788 }
 0x768   :  { %5792 = vrcp.f32 %v2231_v39  ;;  %v5791_v45 = vpop.eup %5790  ;;  %v2244_v59 = vadd.f32 1.0, %v5789_v42 }
 0x769   :  { %5794 = vrcp.f32 %v2237_v40  ;;  %v6703_v40 = vrot.slane %v6575_v46, %v2312_v34 }
 0x76a   :  { %5796 = vrcp.f32 %v2244_v59 }
 0x772   :  { %v5793_v38 = vpop.eup %5792 }
 0x773   :  { %v5795_v56 = vpop.eup %5794  ;;  %v2248_v57 = vmul.f32 %v5793_v38, %v5791_v45 }
 0x774   :  { %v2247_v9 = vmul.f32 %v5795_v56, %v6552_v16 }
 0x776   :  { %v2249_v11 = vadd.f32 %v2248_v57, %v2247_v9  ;;  %v2516_v49 = vpop.f32.mrb[28].mxu0  ;;  %v2589_v12 = vpop.f32.mrb[28].mxu1 }
 0x777   :  { %v2517_v14 = vadd.f32 %v2516_v49, %v6680_v8  ;;  %v2518_v62 = vpop.f32.mrb[29].mxu0  ;;  %v2591_v21 = vpop.f32.mrb[29].mxu1 }
 0x778   :  { %5798 = vtanh.f32 %v2249_v11  ;;  %2255 = vst [vmem:[#allocation12] sm:$0xff] %v2249_v11  ;;  %v6688_v22 = vpop.f32.mrb[30].mxu0  ;;  %v6690_v26 = vpop.f32.mrb[30].mxu1  ;;  %v2592_v6 = vadd.f32 %v2591_v21, %v6686_v63  ;;  %v2590_v11 = vadd.f32 %v2589_v12, %v6703_v40 }
 0x779   :  { %v5176_v31 = vmul.f32 -1.442695, %v2517_v14  ;;  %v6692_v1 = vpop.f32.mrb[31].mxu0  ;;  %v6694_v16 = vpop.f32.mrb[31].mxu1 }
 0x77a   :  { %v5177_v41 = vmul.f32 -1.442695, %v2592_v6  ;;  %v5797_v57 = vpop.eup %5796 }
 0x77b   :  { %5800 = vpow2.f32 %v5176_v31 }
 0x77c   :  { %5802 = vpow2.f32 %v5177_v41 }
 0x77d   :  { %5804 = vtanh.f32 %v2590_v11 }
 0x77e   :  { %v6698_v37 = vpop.f32.mrb[32].mxu0  ;;  %v6700_v39 = vpop.f32.mrb[32].mxu1 }
 0x77f   :  { %v6705_v42 = vpop.f32.mrb[33].mxu0  ;;  %v6707_v45 = vpop.f32.mrb[33].mxu1 }
 0x780   :  { %v6709_v38 = vpop.f32.mrb[34].mxu0  ;;  %v6711_v56 = vpop.f32.mrb[34].mxu1 }
 0x781   :  { %7167 = vst [vmem:[#allocation17_spill] sm:$0xff] %v6711_v56  ;;  %v6713_v43 = vpop.f32.mrb[35].mxu0  ;;  %v6715_v59 = vpop.f32.mrb[35].mxu1 }
 0x782   :  { %7168 = vst [vmem:[#allocation18_spill] sm:$0xff] %v6713_v43  ;;  %7169 = vst [vmem:[#allocation19_spill] sm:$0xff] %v6715_v59  ;;  %v5799_v58 = vpop.eup %5798 }
 0x783   :  { %v2251_v9 = vmul.f32 %v5799_v58, %v5797_v57 }
 0x785   :  { %v5801_v46 = vpop.eup %5800  ;;  %2254 = vst [vmem:[#allocation10] sm:$0xff] %v2251_v9  ;;  %v2267_v49 = vpack.c.bf16 %v2251_v9, %v6555_v19 }
 0x786   :  { %v2666_v14 = vadd.f32 1.0, %v5801_v46  ;;  %v6719_v62 = vpop.f32.mrb[36].mxu0  ;;  %v6721_v21 = vpop.f32.mrb[36].mxu1 }
 0x787   :  { %7170 = vst [vmem:[#allocation20_spill] sm:$0xff] %v6719_v62  ;;  %7171 = vst [vmem:[#allocation21_spill] sm:$0xff] %v6721_v21  ;;  %v6723_v31 = vpop.f32.mrb[37].mxu0  ;;  %v6725_v34 = vpop.f32.mrb[37].mxu1  ;;  %2545 = vmatmul.mubr.bf16.gmra.mrb[40].mxu0 %v2267_v49  ;;  %2618 = vmatmul.mubr.bf16.gmra.mrb[40].mxu1 %v2267_v49 }
 0x788   :  { %7172 = vst [vmem:[#allocation22_spill] sm:$0xff] %v6723_v31  ;;  %7173 = vst [vmem:[#allocation23_spill] sm:$0xff] %v6725_v34  ;;  %5806 = vrcp.f32 %v2666_v14  ;;  %v6727_v6 = vpop.f32.mrb[38].mxu0  ;;  %v6729_v12 = vpop.f32.mrb[38].mxu1  ;;  %2911 = vmatprep.mubr.bf16.mxu0 %v7165_v0  ;;  %2952 = vmatprep.mubr.bf16.mxu1 %v7165_v0 }
 0x789   :  { %7174 = vst [vmem:[#allocation24_spill] sm:$0xff] %v6727_v6  ;;  %7175 = vst [vmem:[#allocation25_spill] sm:$0xff] %v6729_v12  ;;  %v6733_v19 = vpop.f32.mrb[39].mxu0  ;;  %v6735_v41 = vpop.f32.mrb[39].mxu1 }
 0x78a   :  { %7176 = vst [vmem:[#allocation26_spill] sm:$0xff] %v6733_v19  ;;  %7177 = vst [vmem:[#allocation27_spill] sm:$0xff] %v6735_v41  ;;  %v5803_v57 = vpop.eup %5802 }
 0x78b   :  { %v2673_v58 = vadd.f32 1.0, %v5803_v57  ;;  %v5805_v9 = vpop.eup %5804 }
 0x78d   :  { %5808 = vrcp.f32 %v2673_v58 }
 0x792   :  { %v5807_v11 = vpop.eup %5806 }
 0x793   :  { %v6737_v46 = vmul.f32 %v5807_v11, %v5805_v9 }
 0x795   :  { %5810 = vtanh.f32 %v6737_v46 }
 0x797   :  { %v5809_v49 = vpop.eup %5808 }
 0x79f   :  { %v5811_v14 = vpop.eup %5810 }
 0x7a0   :  { %v2678_v12 = vmul.f32 %v5811_v14, %v5809_v49 }
 0x7a2   :  { %2679 = vst [vmem:[#allocation9] sm:$0xff] %v2678_v12  ;;  %v2685_v6 = vpack.c.bf16 %v2678_v12, %v2678_v12 }
 0x7a4   :  { %2912 = vmatmul.mubr.bf16.vlgmr.msra.gmra.mrb[44].mxu0 %v2685_v6  ;;  %2953 = vmatmul.mubr.bf16.vlgmr.msra.gmra.mrb[44].mxu1 %v2685_v6 }
 0x7a5   :  { %3189 = vmatpush1.bf16.msra.mxu0 %v6584_v48  ;;  %3230 = vmatpush1.bf16.msra.mxu1 %v6586_v50 }
 0x7a6   :  { %3190 = vmatprep.subr.bf16.mxu0 %v6592_v51  ;;  %3231 = vmatprep.subr.bf16.mxu1 %v6594_v52 }
 0x7a7   :  { %3220 = vmatprep.mubr.bf16.mxu0 %v7165_v0  ;;  %3261 = vmatprep.mubr.bf16.mxu1 %v7165_v0  ;;  %v2521_v0 = vadd.f32 %v6688_v22, %v6680_v8 }
 0x7a9   :  { %3191 = vmatpush1.bf16.msra.mxu0 %v6596_v53  ;;  %3232 = vmatpush1.bf16.msra.mxu1 %v6598_v44 }
 0x7aa   :  { %3192 = vmatprep.subr.bf16.mxu0 %v6604_v54  ;;  %3233 = vmatprep.subr.bf16.mxu1 %v6606_v55 }
 0x7ad   :  { %3193 = vmatpush1.bf16.msra.mxu0 %v6608_v2  ;;  %3234 = vmatpush1.bf16.msra.mxu1 %v6610_v3 }
 0x7ae   :  { %3194 = vmatprep.subr.bf16.mxu0 %v6616_v4  ;;  %3235 = vmatprep.subr.bf16.mxu1 %v6618_v5 }
 0x7b1   :  { %3195 = vmatpush1.bf16.msra.mxu0 %v6620_v7  ;;  %3236 = vmatpush1.bf16.msra.mxu1 %v6622_v15 }
 0x7b2   :  { %3196 = vmatprep.subr.bf16.mxu0 %v6628_v17  ;;  %3237 = vmatprep.subr.bf16.mxu1 %v6630_v18 }
 0x7b5   :  { %3197 = vmatpush1.bf16.msra.mxu0 %v6632_v20  ;;  %3238 = vmatpush1.bf16.msra.mxu1 %v6634_v23 }
 0x7b6   :  { %3198 = vmatprep.subr.bf16.mxu0 %v6642_v25  ;;  %3239 = vmatprep.subr.bf16.mxu1 %v6646_v28 }
 0x7b9   :  { %3199 = vmatpush1.bf16.msra.mxu0 %v6640_v24  ;;  %3240 = vmatpush1.bf16.msra.mxu1 %v6644_v27 }
 0x7ba   :  { %3200 = vmatprep.subr.bf16.mxu0 %v6648_v60  ;;  %3241 = vmatprep.subr.bf16.mxu1 %v6651_v29 }
 0x7bd   :  { %3201 = vmatpush1.bf16.msra.mxu0 %v6656_v61  ;;  %3242 = vmatpush1.bf16.msra.mxu1 %v6658_v30 }
 0x7be   :  { %3202 = vmatprep.subr.bf16.mxu0 %v6662_v32  ;;  %3243 = vmatprep.subr.bf16.mxu1 %v6664_v33 }
 0x7c1   :  { %3203 = vmatpush1.bf16.msra.mxu0 %v6668_v35  ;;  %3244 = vmatpush1.bf16.msra.mxu1 %v6670_v36 }
 0x7c2   :  { %3497 = vmatprep.subr.bf16.mxu0 %v6580_v10  ;;  %3538 = vmatprep.subr.bf16.mxu1 %v6582_v13 }
 0x85a   :  { %v6774_v6 = vpop.f32.mrb[40].mxu0  ;;  %v6776_v12 = vpop.f32.mrb[40].mxu1 }
 0x85b   :  { %7178 = vst [vmem:[#allocation28_spill] sm:$0xff] %v6774_v6  ;;  %7179 = vst [vmem:[#allocation29_spill] sm:$0xff] %v6776_v12  ;;  %v6778_v57 = vpop.f32.mrb[41].mxu0  ;;  %v6780_v58 = vpop.f32.mrb[41].mxu1  ;;  %v2594_v6 = vadd.f32 %v6690_v26, %v6703_v40  ;;  %v2523_v12 = vadd.f32 %v6692_v1, %v6578_v47 }
 0x85c   :  { %7180 = vst [vmem:[#allocation30_spill] sm:$0xff] %v6778_v57  ;;  %7181 = vst [vmem:[#allocation31_spill] sm:$0xff] %v6780_v58  ;;  %v6782_v9 = vpop.f32.mrb[42].mxu0  ;;  %v6784_v11 = vpop.f32.mrb[42].mxu1  ;;  %v2596_v58 = vadd.f32 %v6694_v16, %v6686_v63 }
 0x85d   :  { %7182 = vst [vmem:[#allocation32_spill] sm:$0xff] %v6782_v9  ;;  %7183 = vst [vmem:[#allocation33_spill] sm:$0xff] %v6784_v11  ;;  %v6786_v49 = vpop.f32.mrb[43].mxu0  ;;  %v6788_v14 = vpop.f32.mrb[43].mxu1 }
 0x85e   :  { %7184 = vst [vmem:[#allocation34_spill] sm:$0xff] %v6786_v49  ;;  %7185 = vst [vmem:[#allocation35_spill] sm:$0xff] %v6788_v14 }
 0x877   :  { %v2913_v57 = vpop.f32.mrb[44].mxu0  ;;  %v2954_v9 = vpop.f32.mrb[44].mxu1 }
 0x878   :  { %v2961_v41 = vadd.f32 %v2913_v57, %v2521_v0  ;;  %v2963_v11 = vadd.f32 %v2954_v9, %v2594_v6  ;;  %v2915_v19 = vpop.f32.mrb[45].mxu0  ;;  %v2956_v49 = vpop.f32.mrb[45].mxu1  ;;  %v2600_v9 = vadd.f32 %v6700_v39, %v6703_v40 }
 0x879   :  { %v2962_v34 = vadd.f32 %v2915_v19, %v2523_v12  ;;  %v2964_v14 = vadd.f32 %v2956_v49, %v2596_v58  ;;  %v2917_v31 = vpop.f32.mrb[46].mxu0  ;;  %v2958_v21 = vpop.f32.mrb[46].mxu1  ;;  %v2527_v58 = vadd.f32 %v6698_v37, %v6680_v8  ;;  %v2602_v49 = vadd.f32 %v6707_v45, %v6686_v63 }
 0x87a   :  { %v5210_v22 = vmul.f32 -1.442695, %v2961_v41  ;;  %v2918_v62 = vpop.f32.mrb[47].mxu0  ;;  %v2959_v59 = vpop.f32.mrb[47].mxu1 }
 0x87b   :  { %v5211_v26 = vmul.f32 -1.442695, %v2962_v34  ;;  %v5212_v1 = vmul.f32 -1.442695, %v2964_v14 }
 0x87c   :  { %5812 = vpow2.f32 %v5210_v22 }
 0x87d   :  { %5814 = vpow2.f32 %v5211_v26 }
 0x87e   :  { %5816 = vpow2.f32 %v5212_v1 }
 0x87f   :  { %5818 = vtanh.f32 %v2963_v11  ;;  %v2529_v11 = vadd.f32 %v6705_v42, %v6578_v47 }
 0x886   :  { %v5813_v43 = vpop.eup %5812 }
 0x887   :  { %v5815_v56 = vpop.eup %5814  ;;  %v2968_v16 = vadd.f32 1.0, %v5813_v43 }
 0x888   :  { %v2974_v0 = vadd.f32 1.0, %v5815_v56  ;;  %v5817_v6 = vpop.eup %5816 }
 0x889   :  { %5820 = vrcp.f32 %v2968_v16  ;;  %v5819_v19 = vpop.eup %5818  ;;  %v2981_v41 = vadd.f32 1.0, %v5817_v6 }
 0x88a   :  { %5822 = vrcp.f32 %v2974_v0 }
 0x88b   :  { %5824 = vrcp.f32 %v2981_v41 }
 0x893   :  { %v5821_v12 = vpop.eup %5820 }
 0x894   :  { %v5823_v31 = vpop.eup %5822  ;;  %v2985_v21 = vmul.f32 %v5821_v12, %v5819_v19 }
 0x895   :  { %v2984_v59 = vmul.f32 %v5823_v31, %v6737_v46  ;;  %v5825_v34 = vpop.eup %5824  ;;  %v7186_v46 = vmov 0  }
 0x897   :  { %v6799_v62 = vadd.f32 %v2985_v21, %v2984_v59 }
 0x899   :  { %5826 = vtanh.f32 %v6799_v62 }
 0x8a3   :  { %v5827_v43 = vpop.eup %5826 }
 0x8a4   :  { %v2988_v57 = vmul.f32 %v5827_v43, %v5825_v34 }
 0x8a6   :  { %2989 = vst [vmem:[#allocation9 + $0x8] sm:$0xff] %v2988_v57  ;;  %v2995_v56 = vpack.c.bf16 %v2988_v57, %v2988_v57 }
 0x8a8   :  { %3221 = vmatmul.mubr.bf16.vlgmr.msra.gmra.mrb[48].mxu0 %v2995_v56  ;;  %3262 = vmatmul.mubr.bf16.vlgmr.msra.gmra.mrb[48].mxu1 %v2995_v56 }
 0x8a9   :  { %3498 = vmatpush1.bf16.msra.mxu0 %v6584_v48  ;;  %3539 = vmatpush1.bf16.msra.mxu1 %v6586_v50 }
 0x8aa   :  { %3499 = vmatprep.subr.bf16.mxu0 %v6592_v51  ;;  %3540 = vmatprep.subr.bf16.mxu1 %v6594_v52 }
 0x8ab   :  { %3529 = vmatprep.mubr.bf16.mxu0 %v7186_v46  ;;  %3570 = vmatprep.mubr.bf16.mxu1 %v7186_v46 }
 0x8ad   :  { %3500 = vmatpush1.bf16.msra.mxu0 %v6596_v53  ;;  %3541 = vmatpush1.bf16.msra.mxu1 %v6598_v44 }
 0x8ae   :  { %3501 = vmatprep.subr.bf16.mxu0 %v6604_v54  ;;  %3542 = vmatprep.subr.bf16.mxu1 %v6606_v55 }
 0x8b1   :  { %3502 = vmatpush1.bf16.msra.mxu0 %v6608_v2  ;;  %3543 = vmatpush1.bf16.msra.mxu1 %v6610_v3 }
 0x8b2   :  { %3503 = vmatprep.subr.bf16.mxu0 %v6616_v4  ;;  %3544 = vmatprep.subr.bf16.mxu1 %v6618_v5 }
 0x8b5   :  { %3504 = vmatpush1.bf16.msra.mxu0 %v6620_v7  ;;  %3545 = vmatpush1.bf16.msra.mxu1 %v6622_v15 }
 0x8b6   :  { %3505 = vmatprep.subr.bf16.mxu0 %v6628_v17  ;;  %3546 = vmatprep.subr.bf16.mxu1 %v6630_v18 }
 0x8b9   :  { %3506 = vmatpush1.bf16.msra.mxu0 %v6632_v20  ;;  %3547 = vmatpush1.bf16.msra.mxu1 %v6634_v23 }
 0x8ba   :  { %3507 = vmatprep.subr.bf16.mxu0 %v6642_v25  ;;  %3548 = vmatprep.subr.bf16.mxu1 %v6646_v28 }
 0x8bd   :  { %3508 = vmatpush1.bf16.msra.mxu0 %v6640_v24  ;;  %3549 = vmatpush1.bf16.msra.mxu1 %v6644_v27 }
 0x8be   :  { %3509 = vmatprep.subr.bf16.mxu0 %v6648_v60  ;;  %3550 = vmatprep.subr.bf16.mxu1 %v6651_v29 }
 0x8c1   :  { %3510 = vmatpush1.bf16.msra.mxu0 %v6656_v61  ;;  %3551 = vmatpush1.bf16.msra.mxu1 %v6658_v30 }
 0x8c2   :  { %3511 = vmatprep.subr.bf16.mxu0 %v6662_v32  ;;  %3552 = vmatprep.subr.bf16.mxu1 %v6664_v33 }
 0x8c5   :  { %3512 = vmatpush1.bf16.msra.mxu0 %v6668_v35  ;;  %3553 = vmatpush1.bf16.msra.mxu1 %v6670_v36 }
 0x8c6   :  { %3806 = vmatprep.subr.bf16.mxu0 %v6580_v10  ;;  %3847 = vmatprep.subr.bf16.mxu1 %v6582_v13 }
 0x97b   :  { %v3222_v14 = vpop.f32.mrb[48].mxu0  ;;  %v3263_v22 = vpop.f32.mrb[48].mxu1 }
 0x97c   :  { %v3270_v26 = vadd.f32 %v3222_v14, %v2527_v58  ;;  %v3272_v1 = vadd.f32 %v3263_v22, %v2600_v9  ;;  %v3224_v16 = vpop.f32.mrb[49].mxu0  ;;  %v3265_v10 = vpop.f32.mrb[49].mxu1 }
 0x97d   :  { %v3271_v0 = vadd.f32 %v3224_v16, %v2529_v11  ;;  %v3273_v13 = vadd.f32 %v3265_v10, %v2602_v49  ;;  %v3226_v6 = vpop.f32.mrb[50].mxu0  ;;  %v3267_v19 = vpop.f32.mrb[50].mxu1 }
 0x97e   :  { %v5245_v37 = vmul.f32 -1.442695, %v3270_v26  ;;  %v3227_v12 = vpop.f32.mrb[51].mxu0  ;;  %v3268_v31 = vpop.f32.mrb[51].mxu1 }
 0x97f   :  { %v5246_v39 = vmul.f32 -1.442695, %v3271_v0  ;;  %v5247_v42 = vmul.f32 -1.442695, %v3273_v13  ;;  %v6896_v12 = vld [vmem:[#allocation8 + $0x10c] ss:$16 sps:$4 sm:$0xff]  }
 0x980   :  { %5828 = vpow2.f32 %v5245_v37  ;;  %v6894_v37 = vld [vmem:[#allocation8 + $0x104] ss:$16 sps:$4 sm:$0xff]   ;;  %v6898_v31 = vld [vmem:[#allocation8 + $0x100] ss:$16 sps:$4 sm:$0xff]  }
 0x981   :  { %5830 = vpow2.f32 %v5246_v39  ;;  %v6900_v39 = vld [vmem:[#allocation8 + $0x108] ss:$16 sps:$4 sm:$0xff]  }
 0x982   :  { %5832 = vpow2.f32 %v5247_v42  ;;  %v6906_v42 = vld [vmem:[#allocation8 + $0x124] ss:$16 sps:$4 sm:$0xff]  }
 0x983   :  { %5834 = vtanh.f32 %v3272_v1 }
 0x98a   :  { %v5829_v21 = vpop.eup %5828 }
 0x98b   :  { %v5831_v41 = vpop.eup %5830  ;;  %v3277_v45 = vadd.f32 1.0, %v5829_v21  ;;  %v6908_v21 = vld [vmem:[#allocation8 + $0x12c] ss:$16 sps:$4 sm:$0xff]  }
 0x98c   :  { %v3283_v59 = vadd.f32 1.0, %v5831_v41  ;;  %v5833_v34 = vpop.eup %5832  ;;  %v6910_v41 = vld [vmem:[#allocation8 + $0x120] ss:$16 sps:$4 sm:$0xff]  }
 0x98d   :  { %5836 = vrcp.f32 %v3277_v45  ;;  %v5835_v43 = vpop.eup %5834  ;;  %v3290_v9 = vadd.f32 1.0, %v5833_v34  ;;  %v6912_v45 = vld [vmem:[#allocation8 + $0x128] ss:$16 sps:$4 sm:$0xff]   ;;  %v6920_v34 = vld [vmem:[#allocation8 + $0x14c] ss:$16 sps:$4 sm:$0xff]  }
 0x98e   :  { %5838 = vrcp.f32 %v3283_v59  ;;  %v6918_v59 = vld [vmem:[#allocation8 + $0x144] ss:$16 sps:$4 sm:$0xff]  }
 0x98f   :  { %5840 = vrcp.f32 %v3290_v9  ;;  %v6934_v9 = vld [vmem:[#allocation8 + $0x160] ss:$16 sps:$4 sm:$0xff]  }
 0x997   :  { %v5837_v57 = vpop.eup %5836 }
 0x998   :  { %v5839_v56 = vpop.eup %5838  ;;  %v3294_v58 = vmul.f32 %v5837_v57, %v5835_v43  ;;  %v6922_v43 = vld [vmem:[#allocation8 + $0x140] ss:$16 sps:$4 sm:$0xff]   ;;  %v6924_v57 = vld [vmem:[#allocation8 + $0x148] ss:$16 sps:$4 sm:$0xff]  }
 0x999   :  { %v3293_v11 = vmul.f32 %v5839_v56, %v6799_v62  ;;  %v5841_v14 = vpop.eup %5840  ;;  %v6930_v56 = vld [vmem:[#allocation8 + $0x164] ss:$16 sps:$4 sm:$0xff]  }
 0x99b   :  { %v6845_v49 = vadd.f32 %v3294_v58, %v3293_v11  ;;  %v6932_v58 = vld [vmem:[#allocation8 + $0x16c] ss:$16 sps:$4 sm:$0xff]   ;;  %v6936_v11 = vld [vmem:[#allocation8 + $0x168] ss:$16 sps:$4 sm:$0xff]  }
 0x99d   :  { %5842 = vtanh.f32 %v6845_v49 }
 0x9a7   :  { %v5843_v22 = vpop.eup %5842 }
 0x9a8   :  { %v3297_v26 = vmul.f32 %v5843_v22, %v5841_v14  ;;  %v6944_v14 = vld [vmem:[#allocation8 + $0x18c] ss:$16 sps:$4 sm:$0xff]   ;;  %v6946_v22 = vld [vmem:[#allocation8 + $0x180] ss:$16 sps:$4 sm:$0xff]  }
 0x9aa   :  { %3298 = vst [vmem:[#allocation9 + $0x10] sm:$0xff] %v3297_v26  ;;  %v3304_v1 = vpack.c.bf16 %v3297_v26, %v3297_v26  ;;  %v6948_v26 = vld [vmem:[#allocation8 + $0x188] ss:$16 sps:$4 sm:$0xff]  }
 0x9ac   :  { %3530 = vmatmul.mubr.bf16.vlgmr.msra.gmra.mrb[52].mxu0 %v3304_v1  ;;  %3571 = vmatmul.mubr.bf16.vlgmr.msra.gmra.mrb[52].mxu1 %v3304_v1  ;;  %v6952_v1 = vld [vmem:[#allocation8 + $0x1a4] ss:$16 sps:$4 sm:$0xff]  }
 0x9ad   :  { %3807 = vmatpush1.bf16.msra.mxu0 %v6584_v48  ;;  %3848 = vmatpush1.bf16.msra.mxu1 %v6586_v50  ;;  %v2531_v48 = vadd.f32 %v6709_v38, %v6680_v8  ;;  %v7187_v50 = vld [vmem:[#allocation17_spill] sm:$0xff] }
 0x9ae   :  { %3808 = vmatprep.subr.bf16.mxu0 %v6592_v51  ;;  %3849 = vmatprep.subr.bf16.mxu1 %v6594_v52  ;;  %v2604_v51 = vadd.f32 %v7187_v50, %v6703_v40  ;;  %v7188_v52 = vld [vmem:[#allocation18_spill] sm:$0xff] }
 0x9af   :  { %3838 = vmatprep.mubr.bf16.mxu0 %v7186_v46  ;;  %3879 = vmatprep.mubr.bf16.mxu1 %v7186_v46  ;;  %v6958_v50 = vld [vmem:[#allocation8 + $0x1a8] ss:$16 sps:$4 sm:$0xff]  }
 0x9b1   :  { %3809 = vmatpush1.bf16.msra.mxu0 %v6596_v53  ;;  %3850 = vmatpush1.bf16.msra.mxu1 %v6598_v44  ;;  %v2533_v53 = vadd.f32 %v7188_v52, %v6578_v47  ;;  %v7189_v44 = vld [vmem:[#allocation19_spill] sm:$0xff] }
 0x9b2   :  { %3810 = vmatprep.subr.bf16.mxu0 %v6604_v54  ;;  %3851 = vmatprep.subr.bf16.mxu1 %v6606_v55  ;;  %v2606_v54 = vadd.f32 %v7189_v44, %v6686_v63  ;;  %v6963_v52 = vld [vmem:[#allocation8 + $0x1c4] ss:$16 sps:$4 sm:$0xff]   ;;  %v6970_v44 = vld [vmem:[#allocation8 + $0x1c0] ss:$16 sps:$4 sm:$0xff]  }
 0x9b5   :  { %3811 = vmatpush1.bf16.msra.mxu0 %v6608_v2  ;;  %3852 = vmatpush1.bf16.msra.mxu1 %v6610_v3 }
 0x9b6   :  { %3812 = vmatprep.subr.bf16.mxu0 %v6616_v4  ;;  %3853 = vmatprep.subr.bf16.mxu1 %v6618_v5 }
 0x9b9   :  { %3813 = vmatpush1.bf16.msra.mxu0 %v6620_v7  ;;  %3854 = vmatpush1.bf16.msra.mxu1 %v6622_v15 }
 0x9ba   :  { %3814 = vmatprep.subr.bf16.mxu0 %v6628_v17  ;;  %3855 = vmatprep.subr.bf16.mxu1 %v6630_v18 }
 0x9bd   :  { %3815 = vmatpush1.bf16.msra.mxu0 %v6632_v20  ;;  %3856 = vmatpush1.bf16.msra.mxu1 %v6634_v23 }
 0x9be   :  { %3816 = vmatprep.subr.bf16.mxu0 %v6642_v25  ;;  %3857 = vmatprep.subr.bf16.mxu1 %v6646_v28 }
 0x9c1   :  { %3817 = vmatpush1.bf16.msra.mxu0 %v6640_v24  ;;  %3858 = vmatpush1.bf16.msra.mxu1 %v6644_v27 }
 0x9c2   :  { %3818 = vmatprep.subr.bf16.mxu0 %v6648_v60  ;;  %3859 = vmatprep.subr.bf16.mxu1 %v6651_v29 }
 0x9c5   :  { %3819 = vmatpush1.bf16.msra.mxu0 %v6656_v61  ;;  %3860 = vmatpush1.bf16.msra.mxu1 %v6658_v30 }
 0x9c6   :  { %3820 = vmatprep.subr.bf16.mxu0 %v6662_v32  ;;  %3861 = vmatprep.subr.bf16.mxu1 %v6664_v33 }
 0x9c9   :  { %3821 = vmatpush1.bf16.msra.mxu0 %v6668_v35  ;;  %3862 = vmatpush1.bf16.msra.mxu1 %v6670_v36 }
 0x9ca   :  { %4115 = vmatprep.subr.bf16.mxu0 %v6894_v37  ;;  %4156 = vmatprep.subr.bf16.mxu1 %v6896_v12 }
 0xa7f   :  { %v3531_v55 = vpop.f32.mrb[52].mxu0  ;;  %v3572_v2 = vpop.f32.mrb[52].mxu1 }
 0xa80   :  { %v3579_v3 = vadd.f32 %v3531_v55, %v2531_v48  ;;  %v3581_v4 = vadd.f32 %v3572_v2, %v2604_v51  ;;  %v3533_v5 = vpop.f32.mrb[53].mxu0  ;;  %v3574_v7 = vpop.f32.mrb[53].mxu1  ;;  %v6956_v48 = vld [vmem:[#allocation8 + $0x1a0] ss:$16 sps:$4 sm:$0xff]   ;;  %v6960_v51 = vld [vmem:[#allocation8 + $0x1ac] ss:$16 sps:$4 sm:$0xff]  }
 0xa81   :  { %v3580_v15 = vadd.f32 %v3533_v5, %v2533_v53  ;;  %v3582_v17 = vadd.f32 %v3574_v7, %v2606_v54  ;;  %v3535_v18 = vpop.f32.mrb[54].mxu0  ;;  %v3576_v20 = vpop.f32.mrb[54].mxu1  ;;  %v6965_v53 = vld [vmem:[#allocation8 + $0x1cc] ss:$16 sps:$4 sm:$0xff]   ;;  %v6972_v54 = vld [vmem:[#allocation8 + $0x1c8] ss:$16 sps:$4 sm:$0xff]  }
 0xa82   :  { %v5280_v23 = vmul.f32 -1.442695, %v3579_v3  ;;  %v3536_v24 = vpop.f32.mrb[55].mxu0  ;;  %v3577_v25 = vpop.f32.mrb[55].mxu1  ;;  %v6976_v55 = vld [vmem:[#allocation8 + $0x1e4] ss:$16 sps:$4 sm:$0xff]  }
 0xa83   :  { %v5281_v27 = vmul.f32 -1.442695, %v3580_v15  ;;  %v5282_v28 = vmul.f32 -1.442695, %v3582_v17  ;;  %v6978_v2 = vld [vmem:[#allocation8 + $0x1ec] ss:$16 sps:$4 sm:$0xff]  }
 0xa84   :  { %5844 = vpow2.f32 %v5280_v23  ;;  %v6982_v3 = vld [vmem:[#allocation8 + $0x1e0] ss:$16 sps:$4 sm:$0xff]   ;;  %v7190_v5 = vld [vmem:[#allocation20_spill] sm:$0xff]  ;;  %v7192_v18 = vld [vmem:[#allocation22_spill] sm:$0xff] }
 0xa85   :  { %5846 = vpow2.f32 %v5281_v27  ;;  %v2537_v7 = vadd.f32 %v7190_v5, %v6680_v8  ;;  %v7191_v15 = vld [vmem:[#allocation21_spill] sm:$0xff]  ;;  %v2539_v20 = vadd.f32 %v7192_v18, %v6578_v47  ;;  %v7193_v23 = vld [vmem:[#allocation23_spill] sm:$0xff] }
 0xa86   :  { %5848 = vpow2.f32 %v5282_v28  ;;  %v2610_v17 = vadd.f32 %v7191_v15, %v6703_v40  ;;  %v2612_v24 = vadd.f32 %v7193_v23, %v6686_v63 }
 0xa87   :  { %5850 = vtanh.f32 %v3581_v4  ;;  %v6984_v4 = vld [vmem:[#allocation8 + $0x1e8] ss:$16 sps:$4 sm:$0xff]  }
 0xa8e   :  { %v5845_v60 = vpop.eup %5844 }
 0xa8f   :  { %v5847_v29 = vpop.eup %5846  ;;  %v3586_v61 = vadd.f32 1.0, %v5845_v60 }
 0xa90   :  { %v3592_v30 = vadd.f32 1.0, %v5847_v29  ;;  %v5849_v32 = vpop.eup %5848 }
 0xa91   :  { %5852 = vrcp.f32 %v3586_v61  ;;  %v5851_v33 = vpop.eup %5850  ;;  %v3599_v62 = vadd.f32 1.0, %v5849_v32 }
 0xa92   :  { %5854 = vrcp.f32 %v3592_v30 }
 0xa93   :  { %5856 = vrcp.f32 %v3599_v62 }
 0xa9b   :  { %v5853_v35 = vpop.eup %5852 }
 0xa9c   :  { %v5855_v36 = vpop.eup %5854  ;;  %v3603_v38 = vmul.f32 %v5853_v35, %v5851_v33 }
 0xa9d   :  { %v3602_v16 = vmul.f32 %v5855_v36, %v6845_v49  ;;  %v5857_v0 = vpop.eup %5856  ;;  %v6942_v49 = vld [vmem:[#allocation8 + $0x184] ss:$16 sps:$4 sm:$0xff]  }
 0xa9f   :  { %v6889_v10 = vadd.f32 %v3603_v38, %v3602_v16 }
 0xaa1   :  { %5858 = vtanh.f32 %v6889_v10 }
 0xaab   :  { %v5859_v13 = vpop.eup %5858 }
 0xaac   :  { %v3606_v6 = vmul.f32 %v5859_v13, %v5857_v0 }
 0xaae   :  { %3607 = vst [vmem:[#allocation9 + $0x18] sm:$0xff] %v3606_v6  ;;  %v3613_v19 = vpack.c.bf16 %v3606_v6, %v3606_v6 }
 0xab0   :  { %3839 = vmatmul.mubr.bf16.vlgmr.msra.gmra.mrb[56].mxu0 %v3613_v19  ;;  %3880 = vmatmul.mubr.bf16.vlgmr.msra.gmra.mrb[56].mxu1 %v3613_v19 }
 0xab1   :  { %4147 = vmatprep.mubr.bf16.mxu0 %v7186_v46  ;;  %4188 = vmatprep.mubr.bf16.mxu1 %v7186_v46 }
 0xab2   :  { %4116 = vmatpush1.bf16.msra.mxu0 %v6898_v31  ;;  %4157 = vmatpush1.bf16.msra.mxu1 %v6900_v39 }
 0xab3   :  { %4117 = vmatprep.subr.bf16.mxu0 %v6906_v42  ;;  %4158 = vmatprep.subr.bf16.mxu1 %v6908_v21 }
 0xab6   :  { %4118 = vmatpush1.bf16.msra.mxu0 %v6910_v41  ;;  %4159 = vmatpush1.bf16.msra.mxu1 %v6912_v45 }
 0xab7   :  { %4119 = vmatprep.subr.bf16.mxu0 %v6918_v59  ;;  %4160 = vmatprep.subr.bf16.mxu1 %v6920_v34 }
 0xaba   :  { %4120 = vmatpush1.bf16.msra.mxu0 %v6922_v43  ;;  %4161 = vmatpush1.bf16.msra.mxu1 %v6924_v57 }
 0xabb   :  { %4121 = vmatprep.subr.bf16.mxu0 %v6930_v56  ;;  %4162 = vmatprep.subr.bf16.mxu1 %v6932_v58 }
 0xabe   :  { %4122 = vmatpush1.bf16.msra.mxu0 %v6934_v9  ;;  %4163 = vmatpush1.bf16.msra.mxu1 %v6936_v11 }
 0xabf   :  { %4123 = vmatprep.subr.bf16.mxu0 %v6942_v49  ;;  %4164 = vmatprep.subr.bf16.mxu1 %v6944_v14 }
 0xac2   :  { %4124 = vmatpush1.bf16.msra.mxu0 %v6946_v22  ;;  %4165 = vmatpush1.bf16.msra.mxu1 %v6948_v26 }
 0xac3   :  { %4125 = vmatprep.subr.bf16.mxu0 %v6952_v1  ;;  %4166 = vmatprep.subr.bf16.mxu1 %v6960_v51 }
 0xac6   :  { %4126 = vmatpush1.bf16.msra.mxu0 %v6956_v48  ;;  %4167 = vmatpush1.bf16.msra.mxu1 %v6958_v50 }
 0xac7   :  { %4127 = vmatprep.subr.bf16.mxu0 %v6963_v52  ;;  %4168 = vmatprep.subr.bf16.mxu1 %v6965_v53 }
 0xaca   :  { %4128 = vmatpush1.bf16.msra.mxu0 %v6970_v44  ;;  %4169 = vmatpush1.bf16.msra.mxu1 %v6972_v54 }
 0xacb   :  { %4129 = vmatprep.subr.bf16.mxu0 %v6976_v55  ;;  %4170 = vmatprep.subr.bf16.mxu1 %v6978_v2 }
 0xace   :  { %4130 = vmatpush1.bf16.msra.mxu0 %v6982_v3  ;;  %4171 = vmatpush1.bf16.msra.mxu1 %v6984_v4 }
 0xacf   :  { %4424 = vmatprep.subr.bf16.mxu0 %v6894_v37  ;;  %4465 = vmatprep.subr.bf16.mxu1 %v6896_v12 }
 0xb83   :  { %v3840_v25 = vpop.f32.mrb[56].mxu0  ;;  %v3881_v27 = vpop.f32.mrb[56].mxu1 }
 0xb84   :  { %v3888_v28 = vadd.f32 %v3840_v25, %v2537_v7  ;;  %v3890_v60 = vadd.f32 %v3881_v27, %v2610_v17  ;;  %v3842_v29 = vpop.f32.mrb[57].mxu0  ;;  %v3883_v61 = vpop.f32.mrb[57].mxu1 }
 0xb85   :  { %v3889_v30 = vadd.f32 %v3842_v29, %v2539_v20  ;;  %v3891_v32 = vadd.f32 %v3883_v61, %v2612_v24  ;;  %v3844_v33 = vpop.f32.mrb[58].mxu0  ;;  %v3885_v35 = vpop.f32.mrb[58].mxu1 }
 0xb86   :  { %v5315_v36 = vmul.f32 -1.442695, %v3888_v28  ;;  %v3845_v38 = vpop.f32.mrb[59].mxu0  ;;  %v3886_v62 = vpop.f32.mrb[59].mxu1  ;;  %v7196_v33 = vld [vmem:[#allocation26_spill] sm:$0xff] }
 0xb87   :  { %v5316_v16 = vmul.f32 -1.442695, %v3889_v30  ;;  %v5317_v0 = vmul.f32 -1.442695, %v3891_v32  ;;  %v7195_v30 = vld [vmem:[#allocation25_spill] sm:$0xff]  ;;  %v2543_v35 = vadd.f32 %v7196_v33, %v6578_v47 }
 0xb88   :  { %5860 = vpow2.f32 %v5315_v36  ;;  %v2614_v32 = vadd.f32 %v7195_v30, %v6703_v40  ;;  %v7197_v36 = vld [vmem:[#allocation27_spill] sm:$0xff] }
 0xb89   :  { %5862 = vpow2.f32 %v5316_v16  ;;  %v2616_v38 = vadd.f32 %v7197_v36, %v6686_v63 }
 0xb8a   :  { %5864 = vpow2.f32 %v5317_v0 }
 0xb8b   :  { %5866 = vtanh.f32 %v3890_v60 }
 0xb92   :  { %v5861_v13 = vpop.eup %5860 }
 0xb93   :  { %v5863_v6 = vpop.eup %5862  ;;  %v3895_v19 = vadd.f32 1.0, %v5861_v13 }
 0xb94   :  { %v3901_v5 = vadd.f32 1.0, %v5863_v6  ;;  %v5865_v7 = vpop.eup %5864 }
 0xb95   :  { %5868 = vrcp.f32 %v3895_v19  ;;  %v5867_v15 = vpop.eup %5866  ;;  %v3908_v23 = vadd.f32 1.0, %v5865_v7 }
 0xb96   :  { %5870 = vrcp.f32 %v3901_v5 }
 0xb97   :  { %5872 = vrcp.f32 %v3908_v23 }
 0xb9f   :  { %v5869_v17 = vpop.eup %5868 }
 0xba0   :  { %v5871_v18 = vpop.eup %5870  ;;  %v3912_v20 = vmul.f32 %v5869_v17, %v5867_v15 }
 0xba1   :  { %v3911_v24 = vmul.f32 %v5871_v18, %v6889_v10  ;;  %v5873_v27 = vpop.eup %5872  ;;  %v7194_v10 = vld [vmem:[#allocation24_spill] sm:$0xff] }
 0xba2   :  { %v2541_v61 = vadd.f32 %v7194_v10, %v6680_v8 }
 0xba3   :  { %v7001_v25 = vadd.f32 %v3912_v20, %v3911_v24 }
 0xba5   :  { %5874 = vtanh.f32 %v7001_v25 }
 0xbaf   :  { %v5875_v28 = vpop.eup %5874 }
 0xbb0   :  { %v3915_v29 = vmul.f32 %v5875_v28, %v5873_v27 }
 0xbb2   :  { %3916 = vst [vmem:[#allocation9 + $0x20] sm:$0xff] %v3915_v29  ;;  %v3922_v60 = vpack.c.bf16 %v3915_v29, %v3915_v29 }
 0xbb4   :  { %4148 = vmatmul.mubr.bf16.vlgmr.msra.gmra.mrb[60].mxu0 %v3922_v60  ;;  %4189 = vmatmul.mubr.bf16.vlgmr.msra.gmra.mrb[60].mxu1 %v3922_v60 }
 0xbb5   :  { %4425 = vmatpush1.bf16.msra.mxu0 %v6898_v31  ;;  %4466 = vmatpush1.bf16.msra.mxu1 %v6900_v39 }
 0xbb6   :  { %4426 = vmatprep.subr.bf16.mxu0 %v6906_v42  ;;  %4467 = vmatprep.subr.bf16.mxu1 %v6908_v21 }
 0xbb7   :  { %4456 = vmatprep.mubr.bf16.mxu0 %v7186_v46  ;;  %4497 = vmatprep.mubr.bf16.mxu1 %v7186_v46 }
 0xbb9   :  { %4427 = vmatpush1.bf16.msra.mxu0 %v6910_v41  ;;  %4468 = vmatpush1.bf16.msra.mxu1 %v6912_v45 }
 0xbba   :  { %4428 = vmatprep.subr.bf16.mxu0 %v6918_v59  ;;  %4469 = vmatprep.subr.bf16.mxu1 %v6920_v34 }
 0xbbd   :  { %4429 = vmatpush1.bf16.msra.mxu0 %v6922_v43  ;;  %4470 = vmatpush1.bf16.msra.mxu1 %v6924_v57 }
 0xbbe   :  { %4430 = vmatprep.subr.bf16.mxu0 %v6930_v56  ;;  %4471 = vmatprep.subr.bf16.mxu1 %v6932_v58 }
 0xbc1   :  { %4431 = vmatpush1.bf16.msra.mxu0 %v6934_v9  ;;  %4472 = vmatpush1.bf16.msra.mxu1 %v6936_v11 }
 0xbc2   :  { %4432 = vmatprep.subr.bf16.mxu0 %v6942_v49  ;;  %4473 = vmatprep.subr.bf16.mxu1 %v6944_v14 }
 0xbc5   :  { %4433 = vmatpush1.bf16.msra.mxu0 %v6946_v22  ;;  %4474 = vmatpush1.bf16.msra.mxu1 %v6948_v26 }
 0xbc6   :  { %4434 = vmatprep.subr.bf16.mxu0 %v6952_v1  ;;  %4475 = vmatprep.subr.bf16.mxu1 %v6960_v51 }
 0xbc9   :  { %4435 = vmatpush1.bf16.msra.mxu0 %v6956_v48  ;;  %4476 = vmatpush1.bf16.msra.mxu1 %v6958_v50 }
 0xbca   :  { %4436 = vmatprep.subr.bf16.mxu0 %v6963_v52  ;;  %4477 = vmatprep.subr.bf16.mxu1 %v6965_v53 }
 0xbcd   :  { %4437 = vmatpush1.bf16.msra.mxu0 %v6970_v44  ;;  %4478 = vmatpush1.bf16.msra.mxu1 %v6972_v54 }
 0xbce   :  { %4438 = vmatprep.subr.bf16.mxu0 %v6976_v55  ;;  %4479 = vmatprep.subr.bf16.mxu1 %v6978_v2 }
 0xbd1   :  { %4439 = vmatpush1.bf16.msra.mxu0 %v6982_v3  ;;  %4480 = vmatpush1.bf16.msra.mxu1 %v6984_v4 }
 0xbd2   :  { %4733 = vmatprep.subr.bf16.mxu0 %v6894_v37  ;;  %4774 = vmatprep.subr.bf16.mxu1 %v6896_v12 }
 0xc87   :  { %v4149_v62 = vpop.f32.mrb[60].mxu0  ;;  %v4190_v16 = vpop.f32.mrb[60].mxu1 }
 0xc88   :  { %v4197_v0 = vadd.f32 %v4149_v62, %v2541_v61  ;;  %v4199_v13 = vadd.f32 %v4190_v16, %v2614_v32  ;;  %v4151_v6 = vpop.f32.mrb[61].mxu0  ;;  %v4192_v37 = vpop.f32.mrb[61].mxu1 }
 0xc89   :  { %v4198_v19 = vadd.f32 %v4151_v6, %v2543_v35  ;;  %v4200_v12 = vadd.f32 %v4192_v37, %v2616_v38  ;;  %v4153_v5 = vpop.f32.mrb[62].mxu0  ;;  %v4194_v7 = vpop.f32.mrb[62].mxu1 }
 0xc8a   :  { %v5350_v15 = vmul.f32 -1.442695, %v4197_v0  ;;  %v4154_v17 = vpop.f32.mrb[63].mxu0  ;;  %v4195_v18 = vpop.f32.mrb[63].mxu1 }
 0xc8b   :  { %v5351_v20 = vmul.f32 -1.442695, %v4198_v19  ;;  %v5352_v23 = vmul.f32 -1.442695, %v4200_v12  ;;  %v7203_v18 = vld [vmem:[#allocation33_spill] sm:$0xff] }
 0xc8c   :  { %5876 = vpow2.f32 %v5350_v15  ;;  %v7202_v15 = vld [vmem:[#allocation32_spill] sm:$0xff] }
 0xc8d   :  { %5878 = vpow2.f32 %v5351_v20  ;;  %v2551_v17 = vadd.f32 %v7202_v15, %v6680_v8  ;;  %v2624_v20 = vadd.f32 %v7203_v18, %v6703_v40 }
 0xc8e   :  { %5880 = vpow2.f32 %v5352_v23  ;;  %v7204_v23 = vld [vmem:[#allocation34_spill] sm:$0xff] }
 0xc8f   :  { %5882 = vtanh.f32 %v4199_v13 }
 0xc96   :  { %v5877_v24 = vpop.eup %5876 }
 0xc97   :  { %v5879_v27 = vpop.eup %5878  ;;  %v4204_v28 = vadd.f32 1.0, %v5877_v24  ;;  %v2553_v24 = vadd.f32 %v7204_v23, %v6578_v47 }
 0xc98   :  { %v4210_v29 = vadd.f32 1.0, %v5879_v27  ;;  %v5881_v60 = vpop.eup %5880  ;;  %v7205_v27 = vld [vmem:[#allocation35_spill] sm:$0xff] }
 0xc99   :  { %5884 = vrcp.f32 %v4204_v28  ;;  %v5883_v10 = vpop.eup %5882  ;;  %v4217_v33 = vadd.f32 1.0, %v5881_v60  ;;  %v2626_v28 = vadd.f32 %v7205_v27, %v6686_v63 }
 0xc9a   :  { %5886 = vrcp.f32 %v4210_v29 }
 0xc9b   :  { %5888 = vrcp.f32 %v4217_v33 }
 0xca3   :  { %v5885_v61 = vpop.eup %5884 }
 0xca4   :  { %v5887_v30 = vpop.eup %5886  ;;  %v4221_v32 = vmul.f32 %v5885_v61, %v5883_v10 }
 0xca5   :  { %v4220_v35 = vmul.f32 %v5887_v30, %v7001_v25  ;;  %v5889_v38 = vpop.eup %5888 }
 0xca7   :  { %v7047_v36 = vadd.f32 %v4221_v32, %v4220_v35 }
 0xca9   :  { %5890 = vtanh.f32 %v7047_v36 }
 0xcb3   :  { %v5891_v62 = vpop.eup %5890 }
 0xcb4   :  { %v4224_v16 = vmul.f32 %v5891_v62, %v5889_v38 }
 0xcb6   :  { %4225 = vst [vmem:[#allocation9 + $0x28] sm:$0xff] %v4224_v16  ;;  %v4231_v0 = vpack.c.bf16 %v4224_v16, %v4224_v16 }
 0xcb8   :  { %4457 = vmatmul.mubr.bf16.vlgmr.msra.gmra.mrb[64].mxu0 %v4231_v0  ;;  %4498 = vmatmul.mubr.bf16.vlgmr.msra.gmra.mrb[64].mxu1 %v4231_v0 }
 0xcb9   :  { %4734 = vmatpush1.bf16.msra.mxu0 %v6898_v31  ;;  %4775 = vmatpush1.bf16.msra.mxu1 %v6900_v39  ;;  %v7199_v39 = vld [vmem:[#allocation29_spill] sm:$0xff] }
 0xcba   :  { %4735 = vmatprep.subr.bf16.mxu0 %v6906_v42  ;;  %4776 = vmatprep.subr.bf16.mxu1 %v6908_v21  ;;  %v2620_v42 = vadd.f32 %v7199_v39, %v6703_v40  ;;  %v7200_v21 = vld [vmem:[#allocation30_spill] sm:$0xff] }
 0xcbb   :  { %4765 = vmatprep.mubr.bf16.mxu0 %v7186_v46  ;;  %4806 = vmatprep.mubr.bf16.mxu1 %v7186_v46  ;;  %v7198_v46 = vld [vmem:[#allocation28_spill] sm:$0xff] }
 0xcbc   :  { %v2547_v31 = vadd.f32 %v7198_v46, %v6680_v8 }
 0xcbd   :  { %4736 = vmatpush1.bf16.msra.mxu0 %v6910_v41  ;;  %4777 = vmatpush1.bf16.msra.mxu1 %v6912_v45  ;;  %v2549_v41 = vadd.f32 %v7200_v21, %v6578_v47  ;;  %v7201_v45 = vld [vmem:[#allocation31_spill] sm:$0xff] }
 0xcbe   :  { %4737 = vmatprep.subr.bf16.mxu0 %v6918_v59  ;;  %4778 = vmatprep.subr.bf16.mxu1 %v6920_v34  ;;  %v2622_v59 = vadd.f32 %v7201_v45, %v6686_v63 }
 0xcc1   :  { %4738 = vmatpush1.bf16.msra.mxu0 %v6922_v43  ;;  %4779 = vmatpush1.bf16.msra.mxu1 %v6924_v57 }
 0xcc2   :  { %4739 = vmatprep.subr.bf16.mxu0 %v6930_v56  ;;  %4780 = vmatprep.subr.bf16.mxu1 %v6932_v58 }
 0xcc5   :  { %4740 = vmatpush1.bf16.msra.mxu0 %v6934_v9  ;;  %4781 = vmatpush1.bf16.msra.mxu1 %v6936_v11 }
 0xcc6   :  { %4741 = vmatprep.subr.bf16.mxu0 %v6942_v49  ;;  %4782 = vmatprep.subr.bf16.mxu1 %v6944_v14 }
 0xcc9   :  { %4742 = vmatpush1.bf16.msra.mxu0 %v6946_v22  ;;  %4783 = vmatpush1.bf16.msra.mxu1 %v6948_v26 }
 0xcca   :  { %4743 = vmatprep.subr.bf16.mxu0 %v6952_v1  ;;  %4784 = vmatprep.subr.bf16.mxu1 %v6960_v51 }
 0xccd   :  { %4744 = vmatpush1.bf16.msra.mxu0 %v6956_v48  ;;  %4785 = vmatpush1.bf16.msra.mxu1 %v6958_v50 }
 0xcce   :  { %4745 = vmatprep.subr.bf16.mxu0 %v6963_v52  ;;  %4786 = vmatprep.subr.bf16.mxu1 %v6965_v53 }
 0xcd1   :  { %4746 = vmatpush1.bf16.msra.mxu0 %v6970_v44  ;;  %4787 = vmatpush1.bf16.msra.mxu1 %v6972_v54 }
 0xcd2   :  { %4747 = vmatprep.subr.bf16.mxu0 %v6976_v55  ;;  %4788 = vmatprep.subr.bf16.mxu1 %v6978_v2 }
 0xcd5   :  { %4748 = vmatpush1.bf16.msra.mxu0 %v6982_v3  ;;  %4789 = vmatpush1.bf16.msra.mxu1 %v6984_v4 }
 0xd8b   :  { %v4458_v34 = vpop.f32.mrb[64].mxu0  ;;  %v4499_v43 = vpop.f32.mrb[64].mxu1 }
 0xd8c   :  { %v4506_v57 = vadd.f32 %v4458_v34, %v2547_v31  ;;  %v4508_v56 = vadd.f32 %v4499_v43, %v2620_v42  ;;  %v4460_v58 = vpop.f32.mrb[65].mxu0  ;;  %v4501_v9 = vpop.f32.mrb[65].mxu1 }
 0xd8d   :  { %v4507_v11 = vadd.f32 %v4460_v58, %v2549_v41  ;;  %v4509_v49 = vadd.f32 %v4501_v9, %v2622_v59  ;;  %v4462_v14 = vpop.f32.mrb[66].mxu0  ;;  %v4503_v22 = vpop.f32.mrb[66].mxu1 }
 0xd8e   :  { %v5385_v26 = vmul.f32 -1.442695, %v4506_v57  ;;  %v4463_v1 = vpop.f32.mrb[67].mxu0  ;;  %v4504_v48 = vpop.f32.mrb[67].mxu1 }
 0xd8f   :  { %v5386_v50 = vmul.f32 -1.442695, %v4507_v11  ;;  %v5387_v51 = vmul.f32 -1.442695, %v4509_v49 }
 0xd90   :  { %5892 = vpow2.f32 %v5385_v26 }
 0xd91   :  { %5894 = vpow2.f32 %v5386_v50 }
 0xd92   :  { %5896 = vpow2.f32 %v5387_v51 }
 0xd93   :  { %5898 = vtanh.f32 %v4508_v56 }
 0xd9a   :  { %v5893_v52 = vpop.eup %5892 }
 0xd9b   :  { %v5895_v53 = vpop.eup %5894  ;;  %v4513_v44 = vadd.f32 1.0, %v5893_v52 }
 0xd9c   :  { %v4519_v54 = vadd.f32 1.0, %v5895_v53  ;;  %v5897_v55 = vpop.eup %5896 }
 0xd9d   :  { %5900 = vrcp.f32 %v4513_v44  ;;  %v5899_v2 = vpop.eup %5898  ;;  %v4526_v13 = vadd.f32 1.0, %v5897_v55 }
 0xd9e   :  { %5902 = vrcp.f32 %v4519_v54 }
 0xd9f   :  { %5904 = vrcp.f32 %v4526_v13 }
 0xda7   :  { %v5901_v3 = vpop.eup %5900 }
 0xda8   :  { %v5903_v4 = vpop.eup %5902  ;;  %v4530_v25 = vmul.f32 %v5901_v3, %v5899_v2 }
 0xda9   :  { %v4529_v6 = vmul.f32 %v5903_v4, %v7047_v36  ;;  %v5905_v19 = vpop.eup %5904 }
 0xdab   :  { %v4531_v37 = vadd.f32 %v4530_v25, %v4529_v6 }
 0xdad   :  { %5906 = vtanh.f32 %v4531_v37 }
 0xdb7   :  { %v5907_v12 = vpop.eup %5906 }
 0xdb8   :  { %v4533_v5 = vmul.f32 %v5907_v12, %v5905_v19 }
 0xdba   :  { %4534 = vst [vmem:[#allocation9 + $0x30] sm:$0xff] %v4533_v5  ;;  %v4540_v7 = vpack.c.bf16 %v4533_v5, %v4533_v5 }
 0xdbc   :  { %4766 = vmatmul.mubr.bf16.vlgmr.msra.gmra.mrb[68].mxu0 %v4540_v7  ;;  %4807 = vmatmul.mubr.bf16.vlgmr.msra.gmra.mrb[68].mxu1 %v4540_v7 }
 0xe8f   :  { %v4767_v29 = vpop.f32.mrb[68].mxu0  ;;  %v4808_v60 = vpop.f32.mrb[68].mxu1 }
 0xe90   :  { %v4815_v10 = vadd.f32 %v4767_v29, %v2551_v17  ;;  %v4817_v61 = vadd.f32 %v4808_v60, %v2624_v20  ;;  %v4769_v30 = vpop.f32.mrb[69].mxu0  ;;  %v4810_v32 = vpop.f32.mrb[69].mxu1 }
 0xe91   :  { %v4816_v33 = vadd.f32 %v4769_v30, %v2553_v24  ;;  %v4818_v35 = vadd.f32 %v4810_v32, %v2626_v28  ;;  %v4771_v36 = vpop.f32.mrb[70].mxu0  ;;  %v4812_v38 = vpop.f32.mrb[70].mxu1 }
 0xe92   :  { %v5420_v8 = vmul.f32 -1.442695, %v4815_v10  ;;  %v4772_v62 = vpop.f32.mrb[71].mxu0  ;;  %v4813_v16 = vpop.f32.mrb[71].mxu1 }
 0xe93   :  { %v5421_v40 = vmul.f32 -1.442695, %v4816_v33  ;;  %v5422_v47 = vmul.f32 -1.442695, %v4818_v35 }
 0xe94   :  { %5908 = vpow2.f32 %v5420_v8 }
 0xe95   :  { %5910 = vpow2.f32 %v5421_v40 }
 0xe96   :  { %5912 = vpow2.f32 %v5422_v47 }
 0xe97   :  { %5914 = vtanh.f32 %v4817_v61 }
 0xe9e   :  { %v5909_v0 = vpop.eup %5908 }
 0xe9f   :  { %v5911_v46 = vpop.eup %5910  ;;  %v4822_v63 = vadd.f32 1.0, %v5909_v0 }
 0xea0   :  { %v4828_v31 = vadd.f32 1.0, %v5911_v46  ;;  %v5913_v39 = vpop.eup %5912 }
 0xea1   :  { %5916 = vrcp.f32 %v4822_v63  ;;  %v5915_v42 = vpop.eup %5914  ;;  %v4835_v59 = vadd.f32 1.0, %v5913_v39 }
 0xea2   :  { %5918 = vrcp.f32 %v4828_v31 }
 0xea3   :  { %5920 = vrcp.f32 %v4835_v59 }
 0xeab   :  { %v5917_v21 = vpop.eup %5916 }
 0xeac   :  { %v5919_v41 = vpop.eup %5918  ;;  %v4839_v45 = vmul.f32 %v5917_v21, %v5915_v42 }
 0xead   :  { %v4838_v34 = vmul.f32 %v5919_v41, %v4531_v37  ;;  %v5921_v57 = vpop.eup %5920 }
 0xeaf   :  { %v4840_v43 = vadd.f32 %v4839_v45, %v4838_v34 }
 0xeb1   :  { %5922 = vtanh.f32 %v4840_v43  ;;  %4847 = vst [vmem:[#allocation12 + $0x8] sm:$0xff] %v4840_v43 }
 0xebb   :  { %v5923_v56 = vpop.eup %5922 }
 0xebc   :  { %v4842_v58 = vmul.f32 %v5923_v56, %v5921_v57 }
 0xebe   :  { %4843 = vst [vmem:[#allocation9 + $0x38] sm:$0xff] %v4842_v58  ;;  %4845 = vst [vmem:[#allocation10 + $0x8] sm:$0xff] %v4842_v58 }
 0xebf   :  { %6001 = shalt.err (!%p5998_p0)
}
 0xec0   :  { %s6002_s20 = scalar_lea.hbm %s7163_s5, 256 }
 0xec1   :  { %p6003_p1 = scmp.ne.s32.totalorder %s7163_s5, %s6002_s20  ;;  %p6006_p2 = scmp.lt.u32.totalorder %s6002_s20, %s7163_s5 }
 0xec3   :  { %p6008_p3 = pnand %p6006_p2, %p6003_p1 }
 0xec5   :  { %6011 = shalt.err (!%p6008_p3)
}
 0xec6   :  { %s6075_s24 = smov 128   ;;  %s6076_s25 = smov 8  }
 0xec7   :  { %4871 = dma.vmem_to_hbm [thread:$0]  %s4866_s8, 256, %s7163_s5, [#allocation11], %s6075_s24, %s6075_s24, %s6076_s25  }
 0xec8   :  { %s6012_s28 = scalar_lea.vmem %s7099_s14, 1024  ;;  %p6017_p5 = scmp.lt.s32.totalorder %s7099_s14, %s7099_s14 }
 0xec9   :  { %p6013_p4 = scmp.ne.s32.totalorder %s7099_s14, %s6012_s28  ;;  %p6018_p6 = scmp.lt.s32.totalorder %s6012_s28, %s6012_s28 }
 0xecb   :  { %p6019_p7 = por %p6018_p6, %p6017_p5 }
 0xecd   :  { %p6020_p8 = pnand %p6019_p7, %p6013_p4 }
 0xecf   :  { %6023 = shalt.err (!%p6020_p8)
}
 0xed0   :  { %s6024_s9 = scalar_lea.hbm %s7162_s4, 1024 }
 0xed1   :  { %p6025_p9 = scmp.ne.s32.totalorder %s7162_s4, %s6024_s9  ;;  %p6028_p10 = scmp.lt.u32.totalorder %s6024_s9, %s7162_s4 }
 0xed3   :  { %p6030_p11 = pnand %p6028_p10, %p6025_p9 }
 0xed5   :  { %6033 = shalt.err (!%p6030_p11)
}
 0xed6   :  { %4859 = dma.vmem_to_hbm [thread:$0]  %s7099_s14, 1024, %s7162_s4, [#allocation5], %s6075_s24, %s6075_s24, %s6076_s25  }
 0xed7   :  { %s6034_s7 = scalar_lea.vmem %s7101_s16, 256  ;;  %p6039_p13 = scmp.lt.s32.totalorder %s7101_s16, %s7101_s16 }
 0xed8   :  { %p6035_p12 = scmp.ne.s32.totalorder %s7101_s16, %s6034_s7  ;;  %p6040_p0 = scmp.lt.s32.totalorder %s6034_s7, %s6034_s7 }
 0xeda   :  { %p6041_p1 = por %p6040_p0, %p6039_p13 }
 0xedc   :  { %p6042_p2 = pnand %p6041_p1, %p6035_p12 }
 0xede   :  { %6045 = shalt.err (!%p6042_p2)
}
 0xedf   :  { %s6046_s13 = scalar_lea.hbm %s7164_s6, 256 }
 0xee0   :  { %p6047_p3 = scmp.ne.s32.totalorder %s7164_s6, %s6046_s13  ;;  %p6050_p4 = scmp.lt.u32.totalorder %s6046_s13, %s7164_s6 }
 0xee2   :  { %p6052_p5 = pnand %p6050_p4, %p6047_p3 }
 0xee4   :  { %6055 = shalt.err (!%p6052_p5)
}
 0xee5   :  { %4883 = dma.vmem_to_hbm [thread:$0]  %s7101_s16, 256, %s7164_s6, [#allocation11], %s6075_s24, %s6075_s24, %s6076_s25  }
 0xee6   :  { %6060 = dma.done.wait [#allocation5], 1024  }
 0xee7   :  { %6061 = vsyncadd [#allocation5], 4294966272 }
 0xee8   :  { %6062 = dma.done.wait [#allocation11], 512  }
 0xee9   :  { %6063 = vsyncadd [#allocation11], 4294966784 }
 0xeea   :  { %4893 = vsyncpa [#allocation4], 1 }
 0xeeb   :  { %4894 = vsyncpa [#allocation7], 1 }
 0xeec   :  { %4895 = vsyncpa [#allocation5], 1 }
 0xeed   :  { %4896 = vsyncpa [#allocation11], 1 }

</bundles_post_ra>
